<compile_context>
chip_gen: v7x
topology: tpu7x:2x2x1
jax: 0.10.0
libtpu: 0.0.40
codegen_flags: <defaults>
</compile_context>

<pallas_src>
import functools

import jax
import jax.numpy as jnp
from jax.experimental import pallas as pl
from jax.experimental.pallas import tpu as pltpu


# --------------------------------------------------------------------------
# Fused temporal Pallas kernel:
#   GCN linear (alpha folded into weights) -> patch embedding (in-kernel
#   patch extraction) -> n_layers x (depthwise token conv + pointwise MLP)
#   -> mean over patches -> prediction head.
# Everything is kept as 2-D (rows, features) values in vregs/VMEM; no
# in-kernel reshapes, transposes or concatenations.
# --------------------------------------------------------------------------
def _temporal_fused_kernel(hcat_ref, ext_ref, wg_ref, bg_ref, we_ref, be_ref,
                           dww_ref, dwb_ref, pww_ref, pwb_ref, wp_ref, bp_ref,
                           o_ref, *, L, E, D, patch_len, stride, n_patches,
                           n_layers, K, pad_l):
    f32 = jnp.float32
    wg = wg_ref[...]                                   # (2*gcn_in, E)
    bg = bg_ref[...]                                   # (1, E)
    be = be_ref[...]                                   # (1, d_model)

    # Per-time-step features (2-D values only).
    fused = []                                         # alpha-fused GCN output
    extra = []                                         # [trends | seasons_enh]
    for t in range(L):
        fused.append(jnp.dot(hcat_ref[:, t, :], wg,
                             preferred_element_type=f32) + bg)
        extra.append(ext_ref[:, t, :])

    # Patch embedding.  z_p = b_emb + sum_k ti[p*stride+k] @ W_emb[k*D:(k+1)*D].
    # W_emb rows are split per source (fused / extra) so no lane-concat is
    # needed inside the kernel.
    we_f = [we_ref[k * D:k * D + E, :] for k in range(patch_len)]
    we_x = [we_ref[k * D + E:(k + 1) * D, :] for k in range(patch_len)]
    z = []
    for p in range(n_patches):
        acc = be
        for k in range(patch_len):
            t = p * stride + k
            acc = acc + jnp.dot(fused[t], we_f[k], preferred_element_type=f32)
            acc = acc + jnp.dot(extra[t], we_x[k], preferred_element_type=f32)
        z.append(acc)                                  # (tb, d_model)

    # Mixer layers.
    for layer in range(n_layers):
        dw_w = dww_ref[layer]                          # (K, d_model)
        dw_b = dwb_ref[layer]                          # (1, d_model)
        pw_w = pww_ref[layer]                          # (d_model, d_model)
        pw_b = pwb_ref[layer]                          # (1, d_model)

        # Token mixing: depthwise conv along the patch axis; the zero halo is
        # handled in-kernel (no jnp.pad HBM copy).
        conv = []
        for p in range(n_patches):
            acc = dw_b
            for k in range(K):
                q = p + k - pad_l
                if 0 <= q < n_patches:
                    acc = acc + z[q] * dw_w[k:k + 1, :]
            conv.append(jax.nn.gelu(acc, approximate=True))
        z = [z[p] + conv[p] for p in range(n_patches)]

        # Channel mixing: pointwise MLP + GELU + residual.
        z = [z[p] + jax.nn.gelu(
                 jnp.dot(z[p], pw_w, preferred_element_type=f32) + pw_b,
                 approximate=True)
             for p in range(n_patches)]

    # Mean over patches + prediction head; single (narrow) store at the end.
    pooled = z[0]
    for p in range(1, n_patches):
        pooled = pooled + z[p]
    pooled = pooled * (1.0 / n_patches)
    out = jnp.dot(pooled, wp_ref[...], preferred_element_type=f32) + bp_ref[...]
    o_ref[...] = out.astype(o_ref.dtype)


def temporal_fused(hcat, ext, wg, bg, we, be, dww, dwb, pww, pwb, wp, bp,
                   *, patch_len, stride):
    """hcat:(BN,L,2*gcn_in), ext:(BN,L,2*in_dim) -> (BN, horizon*out_dim)."""
    BN, L, F2 = hcat.shape
    C2 = ext.shape[-1]
    E = wg.shape[1]
    D = E + C2
    n_layers, K, d_model = dww.shape
    HO = wp.shape[1]
    assert we.shape == (patch_len * D, d_model)
    n_patches = (L - patch_len) // stride + 1
    pad_l = (K - 1) // 2

    tb = BN if BN <= 256 else 256                      # large tiles: few grid steps
    grid = (pl.cdiv(BN, tb),)

    kernel = functools.partial(
        _temporal_fused_kernel, L=L, E=E, D=D, patch_len=patch_len,
        stride=stride, n_patches=n_patches, n_layers=n_layers, K=K,
        pad_l=pad_l)

    in_specs = [
        pl.BlockSpec((tb, L, F2), lambda i: (i, 0, 0)),
        pl.BlockSpec((tb, L, C2), lambda i: (i, 0, 0)),
        pl.BlockSpec(wg.shape, lambda i: (0, 0)),
        pl.BlockSpec(bg.shape, lambda i: (0, 0)),
        pl.BlockSpec(we.shape, lambda i: (0, 0)),
        pl.BlockSpec(be.shape, lambda i: (0, 0)),
        pl.BlockSpec(dww.shape, lambda i: (0, 0, 0)),
        pl.BlockSpec(dwb.shape, lambda i: (0, 0, 0)),
        pl.BlockSpec(pww.shape, lambda i: (0, 0, 0)),
        pl.BlockSpec(pwb.shape, lambda i: (0, 0, 0)),
        pl.BlockSpec(wp.shape, lambda i: (0, 0)),
        pl.BlockSpec(bp.shape, lambda i: (0, 0)),
    ]
    return pl.pallas_call(
        kernel,
        out_shape=jax.ShapeDtypeStruct((BN, HO), hcat.dtype),
        grid=grid,
        in_specs=in_specs,
        out_specs=pl.BlockSpec((tb, HO), lambda i: (i, 0)),
        compiler_params=pltpu.CompilerParams(
            dimension_semantics=("parallel",)),
    )(hcat, ext, wg, bg, we, be, dww, dwb, pww, pwb, wp, bp)


# --------------------------------------------------------------------------
# Parameters
# --------------------------------------------------------------------------
def init_params(key, cfg):
    def glorot(k, shape):
        return (jax.random.normal(k, shape, jnp.float32)
                / jnp.sqrt(jnp.float32(shape[0])))

    keys = jax.random.split(key, 16)
    temporal_dim = cfg["embed_dim"] + 2 * cfg["in_dim"]
    gcn_in = cfg["in_dim"] * (cfg["gcn_depth"] + 1)
    dm = cfg["d_model"]
    K = cfg["mixer_kernel_size"]
    nl = cfg["layers"]

    P = {}
    P["cycle_embed"] = 0.1 * jax.random.normal(
        keys[0], (cfg["cycle_len"], cfg["in_dim"]), jnp.float32)
    P["ppg_W"] = glorot(keys[1], (gcn_in, cfg["embed_dim"]))
    P["ppg_b"] = jnp.zeros((cfg["embed_dim"],), jnp.float32)
    P["cag_W"] = glorot(keys[2], (gcn_in, cfg["embed_dim"]))
    P["cag_b"] = jnp.zeros((cfg["embed_dim"],), jnp.float32)
    P["W_emb"] = glorot(keys[3], (cfg["patch_len"] * temporal_dim, dm))
    P["b_emb"] = jnp.zeros((1, dm), jnp.float32)
    # stacked per-layer mixer weights (indexed with a static layer id in-kernel)
    dw_w, pw_w = [], []
    for l in range(nl):
        k1, k2 = jax.random.split(keys[4 + l])
        dw_w.append(0.1 * jax.random.normal(k1, (K, dm), jnp.float32))
        pw_w.append(glorot(k2, (dm, dm)))
    P["dw_w"] = jnp.stack(dw_w, axis=0)                 # (layers, K, dm)
    P["dw_b"] = jnp.zeros((nl, 1, dm), jnp.float32)
    P["pw_w"] = jnp.stack(pw_w, axis=0)                 # (layers, dm, dm)
    P["pw_b"] = jnp.zeros((nl, 1, dm), jnp.float32)
    P["W_pred"] = glorot(keys[10], (dm, cfg["horizon"] * cfg["out_dim"]))
    P["b_pred"] = jnp.zeros((1, cfg["horizon"] * cfg["out_dim"]), jnp.float32)
    return P


# --------------------------------------------------------------------------
# Forward pass
# --------------------------------------------------------------------------
def madgcn_forward(params, history_data, trends, seasons, residuals,
                   ppg_matrix, cag_matrix, *, cfg):
    B, L, N, C = history_data.shape
    E = cfg["embed_dim"]
    depth = cfg["gcn_depth"]

    # Seasonal enhancement (tiny gather + broadcast add; XLA glue).
    cycle_index = jnp.arange(B) % cfg["cycle_len"]
    seas_pat = params["cycle_embed"][cycle_index]                 # (B, C)
    seasons_enh = seasons + cfg["gamma"] * seas_pat[:, None, None, :]

    # Graph diffusion [x, Ax, A^2 x, ...] for both graphs.
    # TODO(synk): for large num_nodes move this into a Pallas kernel; at N=16
    # it is launch-overhead-bound and is left to XLA per the perf review.
    res2 = residuals.reshape(B * L, N, C)

    def diffuse(A):
        outs = [res2]
        h = res2
        for _ in range(depth):
            h = jnp.einsum('nm,bmc->bnc', A, h)
            outs.append(h)
        return jnp.concatenate(outs, axis=-1)                     # (B*L, N, gcn_in)

    hcat = jnp.concatenate([diffuse(cag_matrix), diffuse(ppg_matrix)], axis=-1)
    F2 = hcat.shape[-1]
    hcat_t = hcat.reshape(B, L, N, F2).transpose(0, 2, 1, 3).reshape(B * N, L, F2)

    # trends + enhanced seasons, channels-last, rows = (batch, node).
    ext = jnp.concatenate([trends, seasons_enh], axis=-1)         # (B, L, N, 2C)
    ext_t = ext.transpose(0, 2, 1, 3).reshape(B * N, L, 2 * C)

    # Fold the alpha fusion into one combined GCN output linear.
    a = jnp.asarray(cfg["fusion_alpha"], jnp.float32)
    W_comb = jnp.concatenate([a * params["cag_W"],
                              (1.0 - a) * params["ppg_W"]], axis=0)  # (2*gcn_in, E)
    b_comb = (a * params["cag_b"] + (1.0 - a) * params["ppg_b"]).reshape(1, E)

    # Single fused Pallas kernel: GCN linear + fusion + patch mixer + head.
    pred_flat = temporal_fused(
        hcat_t, ext_t, W_comb, b_comb,
        params["W_emb"], params["b_emb"],
        params["dw_w"], params["dw_b"], params["pw_w"], params["pw_b"],
        params["W_pred"], params["b_pred"],
        patch_len=cfg["patch_len"], stride=cfg["stride"])          # (B*N, H*out)

    pred = pred_flat.reshape(B, N, cfg["horizon"], cfg["out_dim"]).transpose(0, 2, 1, 3)
    return pred                                                    # (B, horizon, N, out_dim)


# --------------------------------------------------------------------------
if __name__ == "__main__":
    cfg = dict(num_nodes=16, in_dim=2, out_dim=1, embed_dim=8, gcn_depth=2,
               seq_length=8, horizon=4, layers=2, patch_len=4, stride=2,
               cycle_len=24, gamma=0.1, fusion_alpha=0.7, d_model=32,
               mixer_kernel_size=4)
    B, L, N, C = 2, cfg["seq_length"], cfg["num_nodes"], cfg["in_dim"]

    key = jax.random.PRNGKey(0)
    k_par, k_hist, k_tr, k_se, k_re, k_a, k_c = jax.random.split(key, 7)

    params = init_params(k_par, cfg)
    history = jax.random.normal(k_hist, (B, L, N, C), jnp.float32)
    trends = jax.random.normal(k_tr, (B, L, N, C), jnp.float32)
    seasons = jax.random.normal(k_se, (B, L, N, C), jnp.float32)
    residuals = jax.random.normal(k_re, (B, L, N, C), jnp.float32)

    def norm_adj(k):
        a = jax.random.uniform(k, (N, N), jnp.float32) + 0.1
        return a / jnp.sum(a, axis=1, keepdims=True)

    ppg = norm_adj(k_a)
    cag = norm_adj(k_c)

    fwd = jax.jit(functools.partial(madgcn_forward, cfg=cfg))
    out = fwd(params, history, trends, seasons, residuals, ppg, cag)
    out = jax.block_until_ready(out)

    assert out.shape == (B, cfg["horizon"], N, cfg["out_dim"]), out.shape
    assert bool(jnp.all(jnp.isfinite(out)))
    print("KERNEL_OK")
</pallas_src>

<mosaic_0001>
module attributes {stable_mosaic.version = 11 : i64} {
  func.func @_temporal_fused_kernel(%arg0: i32, %arg1: memref<32x8x12xf32, #tpu.memory_space<vmem>>, %arg2: memref<32x8x4xf32, #tpu.memory_space<vmem>>, %arg3: memref<12x8xf32, #tpu.memory_space<vmem>>, %arg4: memref<1x8xf32, #tpu.memory_space<vmem>>, %arg5: memref<48x32xf32, #tpu.memory_space<vmem>>, %arg6: memref<1x32xf32, #tpu.memory_space<vmem>>, %arg7: memref<2x4x32xf32, #tpu.memory_space<vmem>>, %arg8: memref<2x1x32xf32, #tpu.memory_space<vmem>>, %arg9: memref<2x32x32xf32, #tpu.memory_space<vmem>>, %arg10: memref<2x1x32xf32, #tpu.memory_space<vmem>>, %arg11: memref<32x4xf32, #tpu.memory_space<vmem>>, %arg12: memref<1x4xf32, #tpu.memory_space<vmem>>, %arg13: memref<32x4xf32, #tpu.memory_space<vmem>>) attributes {dimension_semantics = [#tpu.dimension_semantics<parallel>], iteration_bounds = array<i64: 1>, scalar_prefetch = 0 : i64, scratch_operands = 0 : i64, tpu.core_type = #tpu.core_type<tc>, window_params = [{transform_indices = @transform_0, window_bounds = array<i64: 32, 8, 12>}, {transform_indices = @transform_1, window_bounds = array<i64: 32, 8, 4>}, {pipeline_mode = #tpu.pipeline_mode<synchronous>, transform_indices = @transform_2, window_bounds = array<i64: 12, 8>}, {pipeline_mode = #tpu.pipeline_mode<synchronous>, transform_indices = @transform_3, window_bounds = array<i64: 1, 8>}, {pipeline_mode = #tpu.pipeline_mode<synchronous>, transform_indices = @transform_4, window_bounds = array<i64: 48, 32>}, {pipeline_mode = #tpu.pipeline_mode<synchronous>, transform_indices = @transform_5, window_bounds = array<i64: 1, 32>}, {pipeline_mode = #tpu.pipeline_mode<synchronous>, transform_indices = @transform_6, window_bounds = array<i64: 2, 4, 32>}, {pipeline_mode = #tpu.pipeline_mode<synchronous>, transform_indices = @transform_7, window_bounds = array<i64: 2, 1, 32>}, {pipeline_mode = #tpu.pipeline_mode<synchronous>, transform_indices = @transform_8, window_bounds = array<i64: 2, 32, 32>}, {pipeline_mode = #tpu.pipeline_mode<synchronous>, transform_indices = @transform_9, window_bounds = array<i64: 2, 1, 32>}, {pipeline_mode = #tpu.pipeline_mode<synchronous>, transform_indices = @transform_10, window_bounds = array<i64: 32, 4>}, {pipeline_mode = #tpu.pipeline_mode<synchronous>, transform_indices = @transform_11, window_bounds = array<i64: 1, 4>}, {transform_indices = @transform_12, window_bounds = array<i64: 32, 4>}]} {
    %c0 = arith.constant 0 : index
    %c0_0 = arith.constant 0 : index
    %0 = vector.load %arg3[%c0, %c0_0] : memref<12x8xf32, #tpu.memory_space<vmem>>, vector<12x8xf32>
    %c0_1 = arith.constant 0 : index
    %c0_2 = arith.constant 0 : index
    %1 = vector.load %arg4[%c0_1, %c0_2] : memref<1x8xf32, #tpu.memory_space<vmem>>, vector<1x8xf32>
    %c0_3 = arith.constant 0 : index
    %c0_4 = arith.constant 0 : index
    %2 = vector.load %arg6[%c0_3, %c0_4] : memref<1x32xf32, #tpu.memory_space<vmem>>, vector<1x32xf32>
    %c0_5 = arith.constant 0 : index
    %c0_6 = arith.constant 0 : index
    %c0_7 = arith.constant 0 : index
    %3 = vector.load %arg1[%c0_5, %c0_6, %c0_7] : memref<32x8x12xf32, #tpu.memory_space<vmem>>, vector<32x1x12xf32>
    %4 = vector.shape_cast %3 : vector<32x1x12xf32> to vector<32x12xf32>
    %cst = arith.constant dense<0.000000e+00> : vector<32x8xf32>
    %5 = tpu.matmul %4, %0, %cst {dimension_numbers = #tpu.dot_dimension_numbers<[1], [0], [0], [1], [0, 0, 1, 1], [], []>} : vector<32x12xf32>, vector<12x8xf32>, vector<32x8xf32> -> vector<32x8xf32>
    %6 = vector.broadcast %1 : vector<1x8xf32> to vector<32x8xf32>
    %7 = arith.addf %5, %6 : vector<32x8xf32>
    %c0_8 = arith.constant 0 : index
    %c0_9 = arith.constant 0 : index
    %c0_10 = arith.constant 0 : index
    %8 = vector.load %arg2[%c0_8, %c0_9, %c0_10] : memref<32x8x4xf32, #tpu.memory_space<vmem>>, vector<32x1x4xf32>
    %9 = vector.shape_cast %8 : vector<32x1x4xf32> to vector<32x4xf32>
    %c0_11 = arith.constant 0 : index
    %c1 = arith.constant 1 : index
    %c0_12 = arith.constant 0 : index
    %10 = vector.load %arg1[%c0_11, %c1, %c0_12] : memref<32x8x12xf32, #tpu.memory_space<vmem>>, vector<32x1x12xf32>
    %11 = vector.shape_cast %10 : vector<32x1x12xf32> to vector<32x12xf32>
    %cst_13 = arith.constant dense<0.000000e+00> : vector<32x8xf32>
    %12 = tpu.matmul %11, %0, %cst_13 {dimension_numbers = #tpu.dot_dimension_numbers<[1], [0], [0], [1], [0, 0, 1, 1], [], []>} : vector<32x12xf32>, vector<12x8xf32>, vector<32x8xf32> -> vector<32x8xf32>
    %13 = vector.broadcast %1 : vector<1x8xf32> to vector<32x8xf32>
    %14 = arith.addf %12, %13 : vector<32x8xf32>
    %c0_14 = arith.constant 0 : index
    %c1_15 = arith.constant 1 : index
    %c0_16 = arith.constant 0 : index
    %15 = vector.load %arg2[%c0_14, %c1_15, %c0_16] : memref<32x8x4xf32, #tpu.memory_space<vmem>>, vector<32x1x4xf32>
    %16 = vector.shape_cast %15 : vector<32x1x4xf32> to vector<32x4xf32>
    %c0_17 = arith.constant 0 : index
    %c2 = arith.constant 2 : index
    %c0_18 = arith.constant 0 : index
    %17 = vector.load %arg1[%c0_17, %c2, %c0_18] : memref<32x8x12xf32, #tpu.memory_space<vmem>>, vector<32x1x12xf32>
    %18 = vector.shape_cast %17 : vector<32x1x12xf32> to vector<32x12xf32>
    %cst_19 = arith.constant dense<0.000000e+00> : vector<32x8xf32>
    %19 = tpu.matmul %18, %0, %cst_19 {dimension_numbers = #tpu.dot_dimension_numbers<[1], [0], [0], [1], [0, 0, 1, 1], [], []>} : vector<32x12xf32>, vector<12x8xf32>, vector<32x8xf32> -> vector<32x8xf32>
    %20 = vector.broadcast %1 : vector<1x8xf32> to vector<32x8xf32>
    %21 = arith.addf %19, %20 : vector<32x8xf32>
    %c0_20 = arith.constant 0 : index
    %c2_21 = arith.constant 2 : index
    %c0_22 = arith.constant 0 : index
    %22 = vector.load %arg2[%c0_20, %c2_21, %c0_22] : memref<32x8x4xf32, #tpu.memory_space<vmem>>, vector<32x1x4xf32>
    %23 = vector.shape_cast %22 : vector<32x1x4xf32> to vector<32x4xf32>
    %c0_23 = arith.constant 0 : index
    %c3 = arith.constant 3 : index
    %c0_24 = arith.constant 0 : index
    %24 = vector.load %arg1[%c0_23, %c3, %c0_24] : memref<32x8x12xf32, #tpu.memory_space<vmem>>, vector<32x1x12xf32>
    %25 = vector.shape_cast %24 : vector<32x1x12xf32> to vector<32x12xf32>
    %cst_25 = arith.constant dense<0.000000e+00> : vector<32x8xf32>
    %26 = tpu.matmul %25, %0, %cst_25 {dimension_numbers = #tpu.dot_dimension_numbers<[1], [0], [0], [1], [0, 0, 1, 1], [], []>} : vector<32x12xf32>, vector<12x8xf32>, vector<32x8xf32> -> vector<32x8xf32>
    %27 = vector.broadcast %1 : vector<1x8xf32> to vector<32x8xf32>
    %28 = arith.addf %26, %27 : vector<32x8xf32>
    %c0_26 = arith.constant 0 : index
    %c3_27 = arith.constant 3 : index
    %c0_28 = arith.constant 0 : index
    %29 = vector.load %arg2[%c0_26, %c3_27, %c0_28] : memref<32x8x4xf32, #tpu.memory_space<vmem>>, vector<32x1x4xf32>
    %30 = vector.shape_cast %29 : vector<32x1x4xf32> to vector<32x4xf32>
    %c0_29 = arith.constant 0 : index
    %c4 = arith.constant 4 : index
    %c0_30 = arith.constant 0 : index
    %31 = vector.load %arg1[%c0_29, %c4, %c0_30] : memref<32x8x12xf32, #tpu.memory_space<vmem>>, vector<32x1x12xf32>
    %32 = vector.shape_cast %31 : vector<32x1x12xf32> to vector<32x12xf32>
    %cst_31 = arith.constant dense<0.000000e+00> : vector<32x8xf32>
    %33 = tpu.matmul %32, %0, %cst_31 {dimension_numbers = #tpu.dot_dimension_numbers<[1], [0], [0], [1], [0, 0, 1, 1], [], []>} : vector<32x12xf32>, vector<12x8xf32>, vector<32x8xf32> -> vector<32x8xf32>
    %34 = vector.broadcast %1 : vector<1x8xf32> to vector<32x8xf32>
    %35 = arith.addf %33, %34 : vector<32x8xf32>
    %c0_32 = arith.constant 0 : index
    %c4_33 = arith.constant 4 : index
    %c0_34 = arith.constant 0 : index
    %36 = vector.load %arg2[%c0_32, %c4_33, %c0_34] : memref<32x8x4xf32, #tpu.memory_space<vmem>>, vector<32x1x4xf32>
    %37 = vector.shape_cast %36 : vector<32x1x4xf32> to vector<32x4xf32>
    %c0_35 = arith.constant 0 : index
    %c5 = arith.constant 5 : index
    %c0_36 = arith.constant 0 : index
    %38 = vector.load %arg1[%c0_35, %c5, %c0_36] : memref<32x8x12xf32, #tpu.memory_space<vmem>>, vector<32x1x12xf32>
    %39 = vector.shape_cast %38 : vector<32x1x12xf32> to vector<32x12xf32>
    %cst_37 = arith.constant dense<0.000000e+00> : vector<32x8xf32>
    %40 = tpu.matmul %39, %0, %cst_37 {dimension_numbers = #tpu.dot_dimension_numbers<[1], [0], [0], [1], [0, 0, 1, 1], [], []>} : vector<32x12xf32>, vector<12x8xf32>, vector<32x8xf32> -> vector<32x8xf32>
    %41 = vector.broadcast %1 : vector<1x8xf32> to vector<32x8xf32>
    %42 = arith.addf %40, %41 : vector<32x8xf32>
    %c0_38 = arith.constant 0 : index
    %c5_39 = arith.constant 5 : index
    %c0_40 = arith.constant 0 : index
    %43 = vector.load %arg2[%c0_38, %c5_39, %c0_40] : memref<32x8x4xf32, #tpu.memory_space<vmem>>, vector<32x1x4xf32>
    %44 = vector.shape_cast %43 : vector<32x1x4xf32> to vector<32x4xf32>
    %c0_41 = arith.constant 0 : index
    %c6 = arith.constant 6 : index
    %c0_42 = arith.constant 0 : index
    %45 = vector.load %arg1[%c0_41, %c6, %c0_42] : memref<32x8x12xf32, #tpu.memory_space<vmem>>, vector<32x1x12xf32>
    %46 = vector.shape_cast %45 : vector<32x1x12xf32> to vector<32x12xf32>
    %cst_43 = arith.constant dense<0.000000e+00> : vector<32x8xf32>
    %47 = tpu.matmul %46, %0, %cst_43 {dimension_numbers = #tpu.dot_dimension_numbers<[1], [0], [0], [1], [0, 0, 1, 1], [], []>} : vector<32x12xf32>, vector<12x8xf32>, vector<32x8xf32> -> vector<32x8xf32>
    %48 = vector.broadcast %1 : vector<1x8xf32> to vector<32x8xf32>
    %49 = arith.addf %47, %48 : vector<32x8xf32>
    %c0_44 = arith.constant 0 : index
    %c6_45 = arith.constant 6 : index
    %c0_46 = arith.constant 0 : index
    %50 = vector.load %arg2[%c0_44, %c6_45, %c0_46] : memref<32x8x4xf32, #tpu.memory_space<vmem>>, vector<32x1x4xf32>
    %51 = vector.shape_cast %50 : vector<32x1x4xf32> to vector<32x4xf32>
    %c0_47 = arith.constant 0 : index
    %c7 = arith.constant 7 : index
    %c0_48 = arith.constant 0 : index
    %52 = vector.load %arg1[%c0_47, %c7, %c0_48] : memref<32x8x12xf32, #tpu.memory_space<vmem>>, vector<32x1x12xf32>
    %53 = vector.shape_cast %52 : vector<32x1x12xf32> to vector<32x12xf32>
    %cst_49 = arith.constant dense<0.000000e+00> : vector<32x8xf32>
    %54 = tpu.matmul %53, %0, %cst_49 {dimension_numbers = #tpu.dot_dimension_numbers<[1], [0], [0], [1], [0, 0, 1, 1], [], []>} : vector<32x12xf32>, vector<12x8xf32>, vector<32x8xf32> -> vector<32x8xf32>
    %55 = vector.broadcast %1 : vector<1x8xf32> to vector<32x8xf32>
    %56 = arith.addf %54, %55 : vector<32x8xf32>
    %c0_50 = arith.constant 0 : index
    %c7_51 = arith.constant 7 : index
    %c0_52 = arith.constant 0 : index
    %57 = vector.load %arg2[%c0_50, %c7_51, %c0_52] : memref<32x8x4xf32, #tpu.memory_space<vmem>>, vector<32x1x4xf32>
    %58 = vector.shape_cast %57 : vector<32x1x4xf32> to vector<32x4xf32>
    %c0_53 = arith.constant 0 : index
    %c0_54 = arith.constant 0 : index
    %59 = vector.load %arg5[%c0_53, %c0_54] : memref<48x32xf32, #tpu.memory_space<vmem>>, vector<8x32xf32>
    %c12 = arith.constant 12 : index
    %c0_55 = arith.constant 0 : index
    %60 = vector.load %arg5[%c12, %c0_55] : memref<48x32xf32, #tpu.memory_space<vmem>>, vector<8x32xf32>
    %c24 = arith.constant 24 : index
    %c0_56 = arith.constant 0 : index
    %61 = vector.load %arg5[%c24, %c0_56] : memref<48x32xf32, #tpu.memory_space<vmem>>, vector<8x32xf32>
    %c36 = arith.constant 36 : index
    %c0_57 = arith.constant 0 : index
    %62 = vector.load %arg5[%c36, %c0_57] : memref<48x32xf32, #tpu.memory_space<vmem>>, vector<8x32xf32>
    %c8 = arith.constant 8 : index
    %c0_58 = arith.constant 0 : index
    %63 = vector.load %arg5[%c8, %c0_58] : memref<48x32xf32, #tpu.memory_space<vmem>>, vector<4x32xf32>
    %c20 = arith.constant 20 : index
    %c0_59 = arith.constant 0 : index
    %64 = vector.load %arg5[%c20, %c0_59] : memref<48x32xf32, #tpu.memory_space<vmem>>, vector<4x32xf32>
    %c32 = arith.constant 32 : index
    %c0_60 = arith.constant 0 : index
    %65 = vector.load %arg5[%c32, %c0_60] : memref<48x32xf32, #tpu.memory_space<vmem>>, vector<4x32xf32>
    %c44 = arith.constant 44 : index
    %c0_61 = arith.constant 0 : index
    %66 = vector.load %arg5[%c44, %c0_61] : memref<48x32xf32, #tpu.memory_space<vmem>>, vector<4x32xf32>
    %cst_62 = arith.constant dense<0.000000e+00> : vector<32x32xf32>
    %67 = tpu.matmul %7, %59, %cst_62 {dimension_numbers = #tpu.dot_dimension_numbers<[1], [0], [0], [1], [0, 0, 1, 1], [], []>} : vector<32x8xf32>, vector<8x32xf32>, vector<32x32xf32> -> vector<32x32xf32>
    %68 = vector.broadcast %2 : vector<1x32xf32> to vector<32x32xf32>
    %69 = arith.addf %68, %67 : vector<32x32xf32>
    %cst_63 = arith.constant dense<0.000000e+00> : vector<32x32xf32>
    %70 = tpu.matmul %9, %63, %cst_63 {dimension_numbers = #tpu.dot_dimension_numbers<[1], [0], [0], [1], [0, 0, 1, 1], [], []>} : vector<32x4xf32>, vector<4x32xf32>, vector<32x32xf32> -> vector<32x32xf32>
    %71 = arith.addf %69, %70 : vector<32x32xf32>
    %cst_64 = arith.constant dense<0.000000e+00> : vector<32x32xf32>
    %72 = tpu.matmul %14, %60, %cst_64 {dimension_numbers = #tpu.dot_dimension_numbers<[1], [0], [0], [1], [0, 0, 1, 1], [], []>} : vector<32x8xf32>, vector<8x32xf32>, vector<32x32xf32> -> vector<32x32xf32>
    %73 = arith.addf %71, %72 : vector<32x32xf32>
    %cst_65 = arith.constant dense<0.000000e+00> : vector<32x32xf32>
    %74 = tpu.matmul %16, %64, %cst_65 {dimension_numbers = #tpu.dot_dimension_numbers<[1], [0], [0], [1], [0, 0, 1, 1], [], []>} : vector<32x4xf32>, vector<4x32xf32>, vector<32x32xf32> -> vector<32x32xf32>
    %75 = arith.addf %73, %74 : vector<32x32xf32>
    %cst_66 = arith.constant dense<0.000000e+00> : vector<32x32xf32>
    %76 = tpu.matmul %21, %61, %cst_66 {dimension_numbers = #tpu.dot_dimension_numbers<[1], [0], [0], [1], [0, 0, 1, 1], [], []>} : vector<32x8xf32>, vector<8x32xf32>, vector<32x32xf32> -> vector<32x32xf32>
    %77 = arith.addf %75, %76 : vector<32x32xf32>
    %cst_67 = arith.constant dense<0.000000e+00> : vector<32x32xf32>
    %78 = tpu.matmul %23, %65, %cst_67 {dimension_numbers = #tpu.dot_dimension_numbers<[1], [0], [0], [1], [0, 0, 1, 1], [], []>} : vector<32x4xf32>, vector<4x32xf32>, vector<32x32xf32> -> vector<32x32xf32>
    %79 = arith.addf %77, %78 : vector<32x32xf32>
    %cst_68 = arith.constant dense<0.000000e+00> : vector<32x32xf32>
    %80 = tpu.matmul %28, %62, %cst_68 {dimension_numbers = #tpu.dot_dimension_numbers<[1], [0], [0], [1], [0, 0, 1, 1], [], []>} : vector<32x8xf32>, vector<8x32xf32>, vector<32x32xf32> -> vector<32x32xf32>
    %81 = arith.addf %79, %80 : vector<32x32xf32>
    %cst_69 = arith.constant dense<0.000000e+00> : vector<32x32xf32>
    %82 = tpu.matmul %30, %66, %cst_69 {dimension_numbers = #tpu.dot_dimension_numbers<[1], [0], [0], [1], [0, 0, 1, 1], [], []>} : vector<32x4xf32>, vector<4x32xf32>, vector<32x32xf32> -> vector<32x32xf32>
    %83 = arith.addf %81, %82 : vector<32x32xf32>
    %cst_70 = arith.constant dense<0.000000e+00> : vector<32x32xf32>
    %84 = tpu.matmul %21, %59, %cst_70 {dimension_numbers = #tpu.dot_dimension_numbers<[1], [0], [0], [1], [0, 0, 1, 1], [], []>} : vector<32x8xf32>, vector<8x32xf32>, vector<32x32xf32> -> vector<32x32xf32>
    %85 = vector.broadcast %2 : vector<1x32xf32> to vector<32x32xf32>
    %86 = arith.addf %85, %84 : vector<32x32xf32>
    %cst_71 = arith.constant dense<0.000000e+00> : vector<32x32xf32>
    %87 = tpu.matmul %23, %63, %cst_71 {dimension_numbers = #tpu.dot_dimension_numbers<[1], [0], [0], [1], [0, 0, 1, 1], [], []>} : vector<32x4xf32>, vector<4x32xf32>, vector<32x32xf32> -> vector<32x32xf32>
    %88 = arith.addf %86, %87 : vector<32x32xf32>
    %cst_72 = arith.constant dense<0.000000e+00> : vector<32x32xf32>
    %89 = tpu.matmul %28, %60, %cst_72 {dimension_numbers = #tpu.dot_dimension_numbers<[1], [0], [0], [1], [0, 0, 1, 1], [], []>} : vector<32x8xf32>, vector<8x32xf32>, vector<32x32xf32> -> vector<32x32xf32>
    %90 = arith.addf %88, %89 : vector<32x32xf32>
    %cst_73 = arith.constant dense<0.000000e+00> : vector<32x32xf32>
    %91 = tpu.matmul %30, %64, %cst_73 {dimension_numbers = #tpu.dot_dimension_numbers<[1], [0], [0], [1], [0, 0, 1, 1], [], []>} : vector<32x4xf32>, vector<4x32xf32>, vector<32x32xf32> -> vector<32x32xf32>
    %92 = arith.addf %90, %91 : vector<32x32xf32>
    %cst_74 = arith.constant dense<0.000000e+00> : vector<32x32xf32>
    %93 = tpu.matmul %35, %61, %cst_74 {dimension_numbers = #tpu.dot_dimension_numbers<[1], [0], [0], [1], [0, 0, 1, 1], [], []>} : vector<32x8xf32>, vector<8x32xf32>, vector<32x32xf32> -> vector<32x32xf32>
    %94 = arith.addf %92, %93 : vector<32x32xf32>
    %cst_75 = arith.constant dense<0.000000e+00> : vector<32x32xf32>
    %95 = tpu.matmul %37, %65, %cst_75 {dimension_numbers = #tpu.dot_dimension_numbers<[1], [0], [0], [1], [0, 0, 1, 1], [], []>} : vector<32x4xf32>, vector<4x32xf32>, vector<32x32xf32> -> vector<32x32xf32>
    %96 = arith.addf %94, %95 : vector<32x32xf32>
    %cst_76 = arith.constant dense<0.000000e+00> : vector<32x32xf32>
    %97 = tpu.matmul %42, %62, %cst_76 {dimension_numbers = #tpu.dot_dimension_numbers<[1], [0], [0], [1], [0, 0, 1, 1], [], []>} : vector<32x8xf32>, vector<8x32xf32>, vector<32x32xf32> -> vector<32x32xf32>
    %98 = arith.addf %96, %97 : vector<32x32xf32>
    %cst_77 = arith.constant dense<0.000000e+00> : vector<32x32xf32>
    %99 = tpu.matmul %44, %66, %cst_77 {dimension_numbers = #tpu.dot_dimension_numbers<[1], [0], [0], [1], [0, 0, 1, 1], [], []>} : vector<32x4xf32>, vector<4x32xf32>, vector<32x32xf32> -> vector<32x32xf32>
    %100 = arith.addf %98, %99 : vector<32x32xf32>
    %cst_78 = arith.constant dense<0.000000e+00> : vector<32x32xf32>
    %101 = tpu.matmul %35, %59, %cst_78 {dimension_numbers = #tpu.dot_dimension_numbers<[1], [0], [0], [1], [0, 0, 1, 1], [], []>} : vector<32x8xf32>, vector<8x32xf32>, vector<32x32xf32> -> vector<32x32xf32>
    %102 = vector.broadcast %2 : vector<1x32xf32> to vector<32x32xf32>
    %103 = arith.addf %102, %101 : vector<32x32xf32>
    %cst_79 = arith.constant dense<0.000000e+00> : vector<32x32xf32>
    %104 = tpu.matmul %37, %63, %cst_79 {dimension_numbers = #tpu.dot_dimension_numbers<[1], [0], [0], [1], [0, 0, 1, 1], [], []>} : vector<32x4xf32>, vector<4x32xf32>, vector<32x32xf32> -> vector<32x32xf32>
    %105 = arith.addf %103, %104 : vector<32x32xf32>
    %cst_80 = arith.constant dense<0.000000e+00> : vector<32x32xf32>
    %106 = tpu.matmul %42, %60, %cst_80 {dimension_numbers = #tpu.dot_dimension_numbers<[1], [0], [0], [1], [0, 0, 1, 1], [], []>} : vector<32x8xf32>, vector<8x32xf32>, vector<32x32xf32> -> vector<32x32xf32>
    %107 = arith.addf %105, %106 : vector<32x32xf32>
    %cst_81 = arith.constant dense<0.000000e+00> : vector<32x32xf32>
    %108 = tpu.matmul %44, %64, %cst_81 {dimension_numbers = #tpu.dot_dimension_numbers<[1], [0], [0], [1], [0, 0, 1, 1], [], []>} : vector<32x4xf32>, vector<4x32xf32>, vector<32x32xf32> -> vector<32x32xf32>
    %109 = arith.addf %107, %108 : vector<32x32xf32>
    %cst_82 = arith.constant dense<0.000000e+00> : vector<32x32xf32>
    %110 = tpu.matmul %49, %61, %cst_82 {dimension_numbers = #tpu.dot_dimension_numbers<[1], [0], [0], [1], [0, 0, 1, 1], [], []>} : vector<32x8xf32>, vector<8x32xf32>, vector<32x32xf32> -> vector<32x32xf32>
    %111 = arith.addf %109, %110 : vector<32x32xf32>
    %cst_83 = arith.constant dense<0.000000e+00> : vector<32x32xf32>
    %112 = tpu.matmul %51, %65, %cst_83 {dimension_numbers = #tpu.dot_dimension_numbers<[1], [0], [0], [1], [0, 0, 1, 1], [], []>} : vector<32x4xf32>, vector<4x32xf32>, vector<32x32xf32> -> vector<32x32xf32>
    %113 = arith.addf %111, %112 : vector<32x32xf32>
    %cst_84 = arith.constant dense<0.000000e+00> : vector<32x32xf32>
    %114 = tpu.matmul %56, %62, %cst_84 {dimension_numbers = #tpu.dot_dimension_numbers<[1], [0], [0], [1], [0, 0, 1, 1], [], []>} : vector<32x8xf32>, vector<8x32xf32>, vector<32x32xf32> -> vector<32x32xf32>
    %115 = arith.addf %113, %114 : vector<32x32xf32>
    %cst_85 = arith.constant dense<0.000000e+00> : vector<32x32xf32>
    %116 = tpu.matmul %58, %66, %cst_85 {dimension_numbers = #tpu.dot_dimension_numbers<[1], [0], [0], [1], [0, 0, 1, 1], [], []>} : vector<32x4xf32>, vector<4x32xf32>, vector<32x32xf32> -> vector<32x32xf32>
    %117 = arith.addf %115, %116 : vector<32x32xf32>
    %c0_86 = arith.constant 0 : index
    %c0_87 = arith.constant 0 : index
    %c0_88 = arith.constant 0 : index
    %118 = vector.load %arg7[%c0_86, %c0_87, %c0_88] : memref<2x4x32xf32, #tpu.memory_space<vmem>>, vector<1x4x32xf32>
    %119 = vector.shape_cast %118 : vector<1x4x32xf32> to vector<4x32xf32>
    %c0_89 = arith.constant 0 : index
    %c0_90 = arith.constant 0 : index
    %c0_91 = arith.constant 0 : index
    %120 = vector.load %arg8[%c0_89, %c0_90, %c0_91] : memref<2x1x32xf32, #tpu.memory_space<vmem>>, vector<1x1x32xf32>
    %121 = vector.shape_cast %120 : vector<1x1x32xf32> to vector<1x32xf32>
    %c0_92 = arith.constant 0 : index
    %c0_93 = arith.constant 0 : index
    %c0_94 = arith.constant 0 : index
    %122 = vector.load %arg9[%c0_92, %c0_93, %c0_94] : memref<2x32x32xf32, #tpu.memory_space<vmem>>, vector<1x32x32xf32>
    %123 = vector.shape_cast %122 : vector<1x32x32xf32> to vector<32x32xf32>
    %c0_95 = arith.constant 0 : index
    %c0_96 = arith.constant 0 : index
    %c0_97 = arith.constant 0 : index
    %124 = vector.load %arg10[%c0_95, %c0_96, %c0_97] : memref<2x1x32xf32, #tpu.memory_space<vmem>>, vector<1x1x32xf32>
    %125 = vector.shape_cast %124 : vector<1x1x32xf32> to vector<1x32xf32>
    %126 = vector.extract_strided_slice %119 {offsets = [1, 0], sizes = [1, 32], strides = [1, 1]} : vector<4x32xf32> to vector<1x32xf32>
    %127 = vector.broadcast %126 : vector<1x32xf32> to vector<32x32xf32>
    %128 = arith.mulf %83, %127 : vector<32x32xf32>
    %129 = vector.broadcast %121 : vector<1x32xf32> to vector<32x32xf32>
    %130 = arith.addf %129, %128 : vector<32x32xf32>
    %131 = vector.extract_strided_slice %119 {offsets = [2, 0], sizes = [1, 32], strides = [1, 1]} : vector<4x32xf32> to vector<1x32xf32>
    %132 = vector.broadcast %131 : vector<1x32xf32> to vector<32x32xf32>
    %133 = arith.mulf %100, %132 : vector<32x32xf32>
    %134 = arith.addf %130, %133 : vector<32x32xf32>
    %135 = vector.extract_strided_slice %119 {offsets = [3, 0], sizes = [1, 32], strides = [1, 1]} : vector<4x32xf32> to vector<1x32xf32>
    %136 = vector.broadcast %135 : vector<1x32xf32> to vector<32x32xf32>
    %137 = arith.mulf %117, %136 : vector<32x32xf32>
    %138 = arith.addf %134, %137 : vector<32x32xf32>
    %139 = arith.mulf %138, %138 : vector<32x32xf32>
    %140 = arith.mulf %138, %139 : vector<32x32xf32>
    %cst_98 = arith.constant 4.471500e-02 : f32
    %141 = vector.broadcast %cst_98 : f32 to vector<32x32xf32>
    %142 = arith.mulf %141, %140 : vector<32x32xf32>
    %143 = arith.addf %138, %142 : vector<32x32xf32>
    %cst_99 = arith.constant 0.797884583 : f32
    %144 = vector.broadcast %cst_99 : f32 to vector<32x32xf32>
    %145 = arith.mulf %144, %143 : vector<32x32xf32>
    %146 = math.tanh %145 : vector<32x32xf32>
    %cst_100 = arith.constant 1.000000e+00 : f32
    %147 = vector.broadcast %cst_100 : f32 to vector<32x32xf32>
    %148 = arith.addf %147, %146 : vector<32x32xf32>
    %cst_101 = arith.constant 5.000000e-01 : f32
    %149 = vector.broadcast %cst_101 : f32 to vector<32x32xf32>
    %150 = arith.mulf %149, %148 : vector<32x32xf32>
    %151 = arith.mulf %138, %150 : vector<32x32xf32>
    %152 = vector.extract_strided_slice %119 {offsets = [0, 0], sizes = [1, 32], strides = [1, 1]} : vector<4x32xf32> to vector<1x32xf32>
    %153 = vector.broadcast %152 : vector<1x32xf32> to vector<32x32xf32>
    %154 = arith.mulf %83, %153 : vector<32x32xf32>
    %155 = vector.broadcast %121 : vector<1x32xf32> to vector<32x32xf32>
    %156 = arith.addf %155, %154 : vector<32x32xf32>
    %157 = vector.extract_strided_slice %119 {offsets = [1, 0], sizes = [1, 32], strides = [1, 1]} : vector<4x32xf32> to vector<1x32xf32>
    %158 = vector.broadcast %157 : vector<1x32xf32> to vector<32x32xf32>
    %159 = arith.mulf %100, %158 : vector<32x32xf32>
    %160 = arith.addf %156, %159 : vector<32x32xf32>
    %161 = vector.extract_strided_slice %119 {offsets = [2, 0], sizes = [1, 32], strides = [1, 1]} : vector<4x32xf32> to vector<1x32xf32>
    %162 = vector.broadcast %161 : vector<1x32xf32> to vector<32x32xf32>
    %163 = arith.mulf %117, %162 : vector<32x32xf32>
    %164 = arith.addf %160, %163 : vector<32x32xf32>
    %165 = arith.mulf %164, %164 : vector<32x32xf32>
    %166 = arith.mulf %164, %165 : vector<32x32xf32>
    %cst_102 = arith.constant 4.471500e-02 : f32
    %167 = vector.broadcast %cst_102 : f32 to vector<32x32xf32>
    %168 = arith.mulf %167, %166 : vector<32x32xf32>
    %169 = arith.addf %164, %168 : vector<32x32xf32>
    %cst_103 = arith.constant 0.797884583 : f32
    %170 = vector.broadcast %cst_103 : f32 to vector<32x32xf32>
    %171 = arith.mulf %170, %169 : vector<32x32xf32>
    %172 = math.tanh %171 : vector<32x32xf32>
    %cst_104 = arith.constant 1.000000e+00 : f32
    %173 = vector.broadcast %cst_104 : f32 to vector<32x32xf32>
    %174 = arith.addf %173, %172 : vector<32x32xf32>
    %cst_105 = arith.constant 5.000000e-01 : f32
    %175 = vector.broadcast %cst_105 : f32 to vector<32x32xf32>
    %176 = arith.mulf %175, %174 : vector<32x32xf32>
    %177 = arith.mulf %164, %176 : vector<32x32xf32>
    %178 = vector.extract_strided_slice %119 {offsets = [0, 0], sizes = [1, 32], strides = [1, 1]} : vector<4x32xf32> to vector<1x32xf32>
    %179 = vector.broadcast %178 : vector<1x32xf32> to vector<32x32xf32>
    %180 = arith.mulf %100, %179 : vector<32x32xf32>
    %181 = vector.broadcast %121 : vector<1x32xf32> to vector<32x32xf32>
    %182 = arith.addf %181, %180 : vector<32x32xf32>
    %183 = vector.extract_strided_slice %119 {offsets = [1, 0], sizes = [1, 32], strides = [1, 1]} : vector<4x32xf32> to vector<1x32xf32>
    %184 = vector.broadcast %183 : vector<1x32xf32> to vector<32x32xf32>
    %185 = arith.mulf %117, %184 : vector<32x32xf32>
    %186 = arith.addf %182, %185 : vector<32x32xf32>
    %187 = arith.mulf %186, %186 : vector<32x32xf32>
    %188 = arith.mulf %186, %187 : vector<32x32xf32>
    %cst_106 = arith.constant 4.471500e-02 : f32
    %189 = vector.broadcast %cst_106 : f32 to vector<32x32xf32>
    %190 = arith.mulf %189, %188 : vector<32x32xf32>
    %191 = arith.addf %186, %190 : vector<32x32xf32>
    %cst_107 = arith.constant 0.797884583 : f32
    %192 = vector.broadcast %cst_107 : f32 to vector<32x32xf32>
    %193 = arith.mulf %192, %191 : vector<32x32xf32>
    %194 = math.tanh %193 : vector<32x32xf32>
    %cst_108 = arith.constant 1.000000e+00 : f32
    %195 = vector.broadcast %cst_108 : f32 to vector<32x32xf32>
    %196 = arith.addf %195, %194 : vector<32x32xf32>
    %cst_109 = arith.constant 5.000000e-01 : f32
    %197 = vector.broadcast %cst_109 : f32 to vector<32x32xf32>
    %198 = arith.mulf %197, %196 : vector<32x32xf32>
    %199 = arith.mulf %186, %198 : vector<32x32xf32>
    %200 = arith.addf %83, %151 : vector<32x32xf32>
    %201 = arith.addf %100, %177 : vector<32x32xf32>
    %202 = arith.addf %117, %199 : vector<32x32xf32>
    %cst_110 = arith.constant dense<0.000000e+00> : vector<32x32xf32>
    %203 = tpu.matmul %200, %123, %cst_110 {dimension_numbers = #tpu.dot_dimension_numbers<[1], [0], [0], [1], [0, 0, 1, 1], [], []>} : vector<32x32xf32>, vector<32x32xf32>, vector<32x32xf32> -> vector<32x32xf32>
    %204 = vector.broadcast %125 : vector<1x32xf32> to vector<32x32xf32>
    %205 = arith.addf %203, %204 : vector<32x32xf32>
    %206 = arith.mulf %205, %205 : vector<32x32xf32>
    %207 = arith.mulf %205, %206 : vector<32x32xf32>
    %cst_111 = arith.constant 4.471500e-02 : f32
    %208 = vector.broadcast %cst_111 : f32 to vector<32x32xf32>
    %209 = arith.mulf %208, %207 : vector<32x32xf32>
    %210 = arith.addf %205, %209 : vector<32x32xf32>
    %cst_112 = arith.constant 0.797884583 : f32
    %211 = vector.broadcast %cst_112 : f32 to vector<32x32xf32>
    %212 = arith.mulf %211, %210 : vector<32x32xf32>
    %213 = math.tanh %212 : vector<32x32xf32>
    %cst_113 = arith.constant 1.000000e+00 : f32
    %214 = vector.broadcast %cst_113 : f32 to vector<32x32xf32>
    %215 = arith.addf %214, %213 : vector<32x32xf32>
    %cst_114 = arith.constant 5.000000e-01 : f32
    %216 = vector.broadcast %cst_114 : f32 to vector<32x32xf32>
    %217 = arith.mulf %216, %215 : vector<32x32xf32>
    %218 = arith.mulf %205, %217 : vector<32x32xf32>
    %219 = arith.addf %200, %218 : vector<32x32xf32>
    %cst_115 = arith.constant dense<0.000000e+00> : vector<32x32xf32>
    %220 = tpu.matmul %201, %123, %cst_115 {dimension_numbers = #tpu.dot_dimension_numbers<[1], [0], [0], [1], [0, 0, 1, 1], [], []>} : vector<32x32xf32>, vector<32x32xf32>, vector<32x32xf32> -> vector<32x32xf32>
    %221 = vector.broadcast %125 : vector<1x32xf32> to vector<32x32xf32>
    %222 = arith.addf %220, %221 : vector<32x32xf32>
    %223 = arith.mulf %222, %222 : vector<32x32xf32>
    %224 = arith.mulf %222, %223 : vector<32x32xf32>
    %cst_116 = arith.constant 4.471500e-02 : f32
    %225 = vector.broadcast %cst_116 : f32 to vector<32x32xf32>
    %226 = arith.mulf %225, %224 : vector<32x32xf32>
    %227 = arith.addf %222, %226 : vector<32x32xf32>
    %cst_117 = arith.constant 0.797884583 : f32
    %228 = vector.broadcast %cst_117 : f32 to vector<32x32xf32>
    %229 = arith.mulf %228, %227 : vector<32x32xf32>
    %230 = math.tanh %229 : vector<32x32xf32>
    %cst_118 = arith.constant 1.000000e+00 : f32
    %231 = vector.broadcast %cst_118 : f32 to vector<32x32xf32>
    %232 = arith.addf %231, %230 : vector<32x32xf32>
    %cst_119 = arith.constant 5.000000e-01 : f32
    %233 = vector.broadcast %cst_119 : f32 to vector<32x32xf32>
    %234 = arith.mulf %233, %232 : vector<32x32xf32>
    %235 = arith.mulf %222, %234 : vector<32x32xf32>
    %236 = arith.addf %201, %235 : vector<32x32xf32>
    %cst_120 = arith.constant dense<0.000000e+00> : vector<32x32xf32>
    %237 = tpu.matmul %202, %123, %cst_120 {dimension_numbers = #tpu.dot_dimension_numbers<[1], [0], [0], [1], [0, 0, 1, 1], [], []>} : vector<32x32xf32>, vector<32x32xf32>, vector<32x32xf32> -> vector<32x32xf32>
    %238 = vector.broadcast %125 : vector<1x32xf32> to vector<32x32xf32>
    %239 = arith.addf %237, %238 : vector<32x32xf32>
    %240 = arith.mulf %239, %239 : vector<32x32xf32>
    %241 = arith.mulf %239, %240 : vector<32x32xf32>
    %cst_121 = arith.constant 4.471500e-02 : f32
    %242 = vector.broadcast %cst_121 : f32 to vector<32x32xf32>
    %243 = arith.mulf %242, %241 : vector<32x32xf32>
    %244 = arith.addf %239, %243 : vector<32x32xf32>
    %cst_122 = arith.constant 0.797884583 : f32
    %245 = vector.broadcast %cst_122 : f32 to vector<32x32xf32>
    %246 = arith.mulf %245, %244 : vector<32x32xf32>
    %247 = math.tanh %246 : vector<32x32xf32>
    %cst_123 = arith.constant 1.000000e+00 : f32
    %248 = vector.broadcast %cst_123 : f32 to vector<32x32xf32>
    %249 = arith.addf %248, %247 : vector<32x32xf32>
    %cst_124 = arith.constant 5.000000e-01 : f32
    %250 = vector.broadcast %cst_124 : f32 to vector<32x32xf32>
    %251 = arith.mulf %250, %249 : vector<32x32xf32>
    %252 = arith.mulf %239, %251 : vector<32x32xf32>
    %253 = arith.addf %202, %252 : vector<32x32xf32>
    %c1_125 = arith.constant 1 : index
    %c0_126 = arith.constant 0 : index
    %c0_127 = arith.constant 0 : index
    %254 = vector.load %arg7[%c1_125, %c0_126, %c0_127] : memref<2x4x32xf32, #tpu.memory_space<vmem>>, vector<1x4x32xf32>
    %255 = vector.shape_cast %254 : vector<1x4x32xf32> to vector<4x32xf32>
    %c1_128 = arith.constant 1 : index
    %c0_129 = arith.constant 0 : index
    %c0_130 = arith.constant 0 : index
    %256 = vector.load %arg8[%c1_128, %c0_129, %c0_130] : memref<2x1x32xf32, #tpu.memory_space<vmem>>, vector<1x1x32xf32>
    %257 = vector.shape_cast %256 : vector<1x1x32xf32> to vector<1x32xf32>
    %c1_131 = arith.constant 1 : index
    %c0_132 = arith.constant 0 : index
    %c0_133 = arith.constant 0 : index
    %258 = vector.load %arg9[%c1_131, %c0_132, %c0_133] : memref<2x32x32xf32, #tpu.memory_space<vmem>>, vector<1x32x32xf32>
    %259 = vector.shape_cast %258 : vector<1x32x32xf32> to vector<32x32xf32>
    %c1_134 = arith.constant 1 : index
    %c0_135 = arith.constant 0 : index
    %c0_136 = arith.constant 0 : index
    %260 = vector.load %arg10[%c1_134, %c0_135, %c0_136] : memref<2x1x32xf32, #tpu.memory_space<vmem>>, vector<1x1x32xf32>
    %261 = vector.shape_cast %260 : vector<1x1x32xf32> to vector<1x32xf32>
    %262 = vector.extract_strided_slice %255 {offsets = [1, 0], sizes = [1, 32], strides = [1, 1]} : vector<4x32xf32> to vector<1x32xf32>
    %263 = vector.broadcast %262 : vector<1x32xf32> to vector<32x32xf32>
    %264 = arith.mulf %219, %263 : vector<32x32xf32>
    %265 = vector.broadcast %257 : vector<1x32xf32> to vector<32x32xf32>
    %266 = arith.addf %265, %264 : vector<32x32xf32>
    %267 = vector.extract_strided_slice %255 {offsets = [2, 0], sizes = [1, 32], strides = [1, 1]} : vector<4x32xf32> to vector<1x32xf32>
    %268 = vector.broadcast %267 : vector<1x32xf32> to vector<32x32xf32>
    %269 = arith.mulf %236, %268 : vector<32x32xf32>
    %270 = arith.addf %266, %269 : vector<32x32xf32>
    %271 = vector.extract_strided_slice %255 {offsets = [3, 0], sizes = [1, 32], strides = [1, 1]} : vector<4x32xf32> to vector<1x32xf32>
    %272 = vector.broadcast %271 : vector<1x32xf32> to vector<32x32xf32>
    %273 = arith.mulf %253, %272 : vector<32x32xf32>
    %274 = arith.addf %270, %273 : vector<32x32xf32>
    %275 = arith.mulf %274, %274 : vector<32x32xf32>
    %276 = arith.mulf %274, %275 : vector<32x32xf32>
    %cst_137 = arith.constant 4.471500e-02 : f32
    %277 = vector.broadcast %cst_137 : f32 to vector<32x32xf32>
    %278 = arith.mulf %277, %276 : vector<32x32xf32>
    %279 = arith.addf %274, %278 : vector<32x32xf32>
    %cst_138 = arith.constant 0.797884583 : f32
    %280 = vector.broadcast %cst_138 : f32 to vector<32x32xf32>
    %281 = arith.mulf %280, %279 : vector<32x32xf32>
    %282 = math.tanh %281 : vector<32x32xf32>
    %cst_139 = arith.constant 1.000000e+00 : f32
    %283 = vector.broadcast %cst_139 : f32 to vector<32x32xf32>
    %284 = arith.addf %283, %282 : vector<32x32xf32>
    %cst_140 = arith.constant 5.000000e-01 : f32
    %285 = vector.broadcast %cst_140 : f32 to vector<32x32xf32>
    %286 = arith.mulf %285, %284 : vector<32x32xf32>
    %287 = arith.mulf %274, %286 : vector<32x32xf32>
    %288 = vector.extract_strided_slice %255 {offsets = [0, 0], sizes = [1, 32], strides = [1, 1]} : vector<4x32xf32> to vector<1x32xf32>
    %289 = vector.broadcast %288 : vector<1x32xf32> to vector<32x32xf32>
    %290 = arith.mulf %219, %289 : vector<32x32xf32>
    %291 = vector.broadcast %257 : vector<1x32xf32> to vector<32x32xf32>
    %292 = arith.addf %291, %290 : vector<32x32xf32>
    %293 = vector.extract_strided_slice %255 {offsets = [1, 0], sizes = [1, 32], strides = [1, 1]} : vector<4x32xf32> to vector<1x32xf32>
    %294 = vector.broadcast %293 : vector<1x32xf32> to vector<32x32xf32>
    %295 = arith.mulf %236, %294 : vector<32x32xf32>
    %296 = arith.addf %292, %295 : vector<32x32xf32>
    %297 = vector.extract_strided_slice %255 {offsets = [2, 0], sizes = [1, 32], strides = [1, 1]} : vector<4x32xf32> to vector<1x32xf32>
    %298 = vector.broadcast %297 : vector<1x32xf32> to vector<32x32xf32>
    %299 = arith.mulf %253, %298 : vector<32x32xf32>
    %300 = arith.addf %296, %299 : vector<32x32xf32>
    %301 = arith.mulf %300, %300 : vector<32x32xf32>
    %302 = arith.mulf %300, %301 : vector<32x32xf32>
    %cst_141 = arith.constant 4.471500e-02 : f32
    %303 = vector.broadcast %cst_141 : f32 to vector<32x32xf32>
    %304 = arith.mulf %303, %302 : vector<32x32xf32>
    %305 = arith.addf %300, %304 : vector<32x32xf32>
    %cst_142 = arith.constant 0.797884583 : f32
    %306 = vector.broadcast %cst_142 : f32 to vector<32x32xf32>
    %307 = arith.mulf %306, %305 : vector<32x32xf32>
    %308 = math.tanh %307 : vector<32x32xf32>
    %cst_143 = arith.constant 1.000000e+00 : f32
    %309 = vector.broadcast %cst_143 : f32 to vector<32x32xf32>
    %310 = arith.addf %309, %308 : vector<32x32xf32>
    %cst_144 = arith.constant 5.000000e-01 : f32
    %311 = vector.broadcast %cst_144 : f32 to vector<32x32xf32>
    %312 = arith.mulf %311, %310 : vector<32x32xf32>
    %313 = arith.mulf %300, %312 : vector<32x32xf32>
    %314 = vector.extract_strided_slice %255 {offsets = [0, 0], sizes = [1, 32], strides = [1, 1]} : vector<4x32xf32> to vector<1x32xf32>
    %315 = vector.broadcast %314 : vector<1x32xf32> to vector<32x32xf32>
    %316 = arith.mulf %236, %315 : vector<32x32xf32>
    %317 = vector.broadcast %257 : vector<1x32xf32> to vector<32x32xf32>
    %318 = arith.addf %317, %316 : vector<32x32xf32>
    %319 = vector.extract_strided_slice %255 {offsets = [1, 0], sizes = [1, 32], strides = [1, 1]} : vector<4x32xf32> to vector<1x32xf32>
    %320 = vector.broadcast %319 : vector<1x32xf32> to vector<32x32xf32>
    %321 = arith.mulf %253, %320 : vector<32x32xf32>
    %322 = arith.addf %318, %321 : vector<32x32xf32>
    %323 = arith.mulf %322, %322 : vector<32x32xf32>
    %324 = arith.mulf %322, %323 : vector<32x32xf32>
    %cst_145 = arith.constant 4.471500e-02 : f32
    %325 = vector.broadcast %cst_145 : f32 to vector<32x32xf32>
    %326 = arith.mulf %325, %324 : vector<32x32xf32>
    %327 = arith.addf %322, %326 : vector<32x32xf32>
    %cst_146 = arith.constant 0.797884583 : f32
    %328 = vector.broadcast %cst_146 : f32 to vector<32x32xf32>
    %329 = arith.mulf %328, %327 : vector<32x32xf32>
    %330 = math.tanh %329 : vector<32x32xf32>
    %cst_147 = arith.constant 1.000000e+00 : f32
    %331 = vector.broadcast %cst_147 : f32 to vector<32x32xf32>
    %332 = arith.addf %331, %330 : vector<32x32xf32>
    %cst_148 = arith.constant 5.000000e-01 : f32
    %333 = vector.broadcast %cst_148 : f32 to vector<32x32xf32>
    %334 = arith.mulf %333, %332 : vector<32x32xf32>
    %335 = arith.mulf %322, %334 : vector<32x32xf32>
    %336 = arith.addf %219, %287 : vector<32x32xf32>
    %337 = arith.addf %236, %313 : vector<32x32xf32>
    %338 = arith.addf %253, %335 : vector<32x32xf32>
    %cst_149 = arith.constant dense<0.000000e+00> : vector<32x32xf32>
    %339 = tpu.matmul %336, %259, %cst_149 {dimension_numbers = #tpu.dot_dimension_numbers<[1], [0], [0], [1], [0, 0, 1, 1], [], []>} : vector<32x32xf32>, vector<32x32xf32>, vector<32x32xf32> -> vector<32x32xf32>
    %340 = vector.broadcast %261 : vector<1x32xf32> to vector<32x32xf32>
    %341 = arith.addf %339, %340 : vector<32x32xf32>
    %342 = arith.mulf %341, %341 : vector<32x32xf32>
    %343 = arith.mulf %341, %342 : vector<32x32xf32>
    %cst_150 = arith.constant 4.471500e-02 : f32
    %344 = vector.broadcast %cst_150 : f32 to vector<32x32xf32>
    %345 = arith.mulf %344, %343 : vector<32x32xf32>
    %346 = arith.addf %341, %345 : vector<32x32xf32>
    %cst_151 = arith.constant 0.797884583 : f32
    %347 = vector.broadcast %cst_151 : f32 to vector<32x32xf32>
    %348 = arith.mulf %347, %346 : vector<32x32xf32>
    %349 = math.tanh %348 : vector<32x32xf32>
    %cst_152 = arith.constant 1.000000e+00 : f32
    %350 = vector.broadcast %cst_152 : f32 to vector<32x32xf32>
    %351 = arith.addf %350, %349 : vector<32x32xf32>
    %cst_153 = arith.constant 5.000000e-01 : f32
    %352 = vector.broadcast %cst_153 : f32 to vector<32x32xf32>
    %353 = arith.mulf %352, %351 : vector<32x32xf32>
    %354 = arith.mulf %341, %353 : vector<32x32xf32>
    %355 = arith.addf %336, %354 : vector<32x32xf32>
    %cst_154 = arith.constant dense<0.000000e+00> : vector<32x32xf32>
    %356 = tpu.matmul %337, %259, %cst_154 {dimension_numbers = #tpu.dot_dimension_numbers<[1], [0], [0], [1], [0, 0, 1, 1], [], []>} : vector<32x32xf32>, vector<32x32xf32>, vector<32x32xf32> -> vector<32x32xf32>
    %357 = vector.broadcast %261 : vector<1x32xf32> to vector<32x32xf32>
    %358 = arith.addf %356, %357 : vector<32x32xf32>
    %359 = arith.mulf %358, %358 : vector<32x32xf32>
    %360 = arith.mulf %358, %359 : vector<32x32xf32>
    %cst_155 = arith.constant 4.471500e-02 : f32
    %361 = vector.broadcast %cst_155 : f32 to vector<32x32xf32>
    %362 = arith.mulf %361, %360 : vector<32x32xf32>
    %363 = arith.addf %358, %362 : vector<32x32xf32>
    %cst_156 = arith.constant 0.797884583 : f32
    %364 = vector.broadcast %cst_156 : f32 to vector<32x32xf32>
    %365 = arith.mulf %364, %363 : vector<32x32xf32>
    %366 = math.tanh %365 : vector<32x32xf32>
    %cst_157 = arith.constant 1.000000e+00 : f32
    %367 = vector.broadcast %cst_157 : f32 to vector<32x32xf32>
    %368 = arith.addf %367, %366 : vector<32x32xf32>
    %cst_158 = arith.constant 5.000000e-01 : f32
    %369 = vector.broadcast %cst_158 : f32 to vector<32x32xf32>
    %370 = arith.mulf %369, %368 : vector<32x32xf32>
    %371 = arith.mulf %358, %370 : vector<32x32xf32>
    %372 = arith.addf %337, %371 : vector<32x32xf32>
    %cst_159 = arith.constant dense<0.000000e+00> : vector<32x32xf32>
    %373 = tpu.matmul %338, %259, %cst_159 {dimension_numbers = #tpu.dot_dimension_numbers<[1], [0], [0], [1], [0, 0, 1, 1], [], []>} : vector<32x32xf32>, vector<32x32xf32>, vector<32x32xf32> -> vector<32x32xf32>
    %374 = vector.broadcast %261 : vector<1x32xf32> to vector<32x32xf32>
    %375 = arith.addf %373, %374 : vector<32x32xf32>
    %376 = arith.mulf %375, %375 : vector<32x32xf32>
    %377 = arith.mulf %375, %376 : vector<32x32xf32>
    %cst_160 = arith.constant 4.471500e-02 : f32
    %378 = vector.broadcast %cst_160 : f32 to vector<32x32xf32>
    %379 = arith.mulf %378, %377 : vector<32x32xf32>
    %380 = arith.addf %375, %379 : vector<32x32xf32>
    %cst_161 = arith.constant 0.797884583 : f32
    %381 = vector.broadcast %cst_161 : f32 to vector<32x32xf32>
    %382 = arith.mulf %381, %380 : vector<32x32xf32>
    %383 = math.tanh %382 : vector<32x32xf32>
    %cst_162 = arith.constant 1.000000e+00 : f32
    %384 = vector.broadcast %cst_162 : f32 to vector<32x32xf32>
    %385 = arith.addf %384, %383 : vector<32x32xf32>
    %cst_163 = arith.constant 5.000000e-01 : f32
    %386 = vector.broadcast %cst_163 : f32 to vector<32x32xf32>
    %387 = arith.mulf %386, %385 : vector<32x32xf32>
    %388 = arith.mulf %375, %387 : vector<32x32xf32>
    %389 = arith.addf %338, %388 : vector<32x32xf32>
    %390 = arith.addf %355, %372 : vector<32x32xf32>
    %391 = arith.addf %390, %389 : vector<32x32xf32>
    %cst_164 = arith.constant 0.333333343 : f32
    %392 = vector.broadcast %cst_164 : f32 to vector<32x32xf32>
    %393 = arith.mulf %391, %392 : vector<32x32xf32>
    %c0_165 = arith.constant 0 : index
    %c0_166 = arith.constant 0 : index
    %394 = vector.load %arg11[%c0_165, %c0_166] : memref<32x4xf32, #tpu.memory_space<vmem>>, vector<32x4xf32>
    %cst_167 = arith.constant dense<0.000000e+00> : vector<32x4xf32>
    %395 = tpu.matmul %393, %394, %cst_167 {dimension_numbers = #tpu.dot_dimension_numbers<[1], [0], [0], [1], [0, 0, 1, 1], [], []>} : vector<32x32xf32>, vector<32x4xf32>, vector<32x4xf32> -> vector<32x4xf32>
    %c0_168 = arith.constant 0 : index
    %c0_169 = arith.constant 0 : index
    %396 = vector.load %arg12[%c0_168, %c0_169] : memref<1x4xf32, #tpu.memory_space<vmem>>, vector<1x4xf32>
    %397 = vector.broadcast %396 : vector<1x4xf32> to vector<32x4xf32>
    %398 = arith.addf %395, %397 : vector<32x4xf32>
    %c0_170 = arith.constant 0 : index
    %c0_171 = arith.constant 0 : index
    %399 = vector.load %arg13[%c0_170, %c0_171] : memref<32x4xf32, #tpu.memory_space<vmem>>, vector<32x4xf32>
    tpu.vector_store %arg13[%c0_170, %c0_171], %398 {strides = array<i32>} : memref<32x4xf32, #tpu.memory_space<vmem>>, vector<32x4xf32>,
    return
  }
  func.func @transform_0(%arg0: i32) -> (i32, i32, i32) {
    %c0_i32 = arith.constant 0 : i32
    %c0_i32_0 = arith.constant 0 : i32
    %c0_i32_1 = arith.constant 0 : i32
    return %arg0, %c0_i32, %c0_i32_0 : i32, i32, i32
  }
  func.func @transform_1(%arg0: i32) -> (i32, i32, i32) {
    %c0_i32 = arith.constant 0 : i32
    %c0_i32_0 = arith.constant 0 : i32
    %c0_i32_1 = arith.constant 0 : i32
    return %arg0, %c0_i32, %c0_i32_0 : i32, i32, i32
  }
  func.func @transform_2(%arg0: i32) -> (i32, i32) {
    %c0_i32 = arith.constant 0 : i32
    %c0_i32_0 = arith.constant 0 : i32
    %c0_i32_1 = arith.constant 0 : i32
    return %c0_i32, %c0_i32_0 : i32, i32
  }
  func.func @transform_3(%arg0: i32) -> (i32, i32) {
    %c0_i32 = arith.constant 0 : i32
    %c0_i32_0 = arith.constant 0 : i32
    %c0_i32_1 = arith.constant 0 : i32
    return %c0_i32, %c0_i32_0 : i32, i32
  }
  func.func @transform_4(%arg0: i32) -> (i32, i32) {
    %c0_i32 = arith.constant 0 : i32
    %c0_i32_0 = arith.constant 0 : i32
    %c0_i32_1 = arith.constant 0 : i32
    return %c0_i32, %c0_i32_0 : i32, i32
  }
  func.func @transform_5(%arg0: i32) -> (i32, i32) {
    %c0_i32 = arith.constant 0 : i32
    %c0_i32_0 = arith.constant 0 : i32
    %c0_i32_1 = arith.constant 0 : i32
    return %c0_i32, %c0_i32_0 : i32, i32
  }
  func.func @transform_6(%arg0: i32) -> (i32, i32, i32) {
    %c0_i32 = arith.constant 0 : i32
    %c0_i32_0 = arith.constant 0 : i32
    %c0_i32_1 = arith.constant 0 : i32
    %c0_i32_2 = arith.constant 0 : i32
    return %c0_i32, %c0_i32_0, %c0_i32_1 : i32, i32, i32
  }
  func.func @transform_7(%arg0: i32) -> (i32, i32, i32) {
    %c0_i32 = arith.constant 0 : i32
    %c0_i32_0 = arith.constant 0 : i32
    %c0_i32_1 = arith.constant 0 : i32
    %c0_i32_2 = arith.constant 0 : i32
    return %c0_i32, %c0_i32_0, %c0_i32_1 : i32, i32, i32
  }
  func.func @transform_8(%arg0: i32) -> (i32, i32, i32) {
    %c0_i32 = arith.constant 0 : i32
    %c0_i32_0 = arith.constant 0 : i32
    %c0_i32_1 = arith.constant 0 : i32
    %c0_i32_2 = arith.constant 0 : i32
    return %c0_i32, %c0_i32_0, %c0_i32_1 : i32, i32, i32
  }
  func.func @transform_9(%arg0: i32) -> (i32, i32, i32) {
    %c0_i32 = arith.constant 0 : i32
    %c0_i32_0 = arith.constant 0 : i32
    %c0_i32_1 = arith.constant 0 : i32
    %c0_i32_2 = arith.constant 0 : i32
    return %c0_i32, %c0_i32_0, %c0_i32_1 : i32, i32, i32
  }
  func.func @transform_10(%arg0: i32) -> (i32, i32) {
    %c0_i32 = arith.constant 0 : i32
    %c0_i32_0 = arith.constant 0 : i32
    %c0_i32_1 = arith.constant 0 : i32
    return %c0_i32, %c0_i32_0 : i32, i32
  }
  func.func @transform_11(%arg0: i32) -> (i32, i32) {
    %c0_i32 = arith.constant 0 : i32
    %c0_i32_0 = arith.constant 0 : i32
    %c0_i32_1 = arith.constant 0 : i32
    return %c0_i32, %c0_i32_0 : i32, i32
  }
  func.func @transform_12(%arg0: i32) -> (i32, i32) {
    %c0_i32 = arith.constant 0 : i32
    %c0_i32_0 = arith.constant 0 : i32
    return %arg0, %c0_i32 : i32, i32
  }
}

</mosaic_0001>

<bundles_post_ra>
// kernel: madgcn_forward.1
= control target key start
LH: loop header
LB: loop body
LE: loop exit
PB: predicated region body
PF: predicated region fallthrough
CT: control target
= control target key end

     0   :  { %vm187_vm0 = vcmask 1043456   ;;  %vm116_vm1 = vcmask 1041409   ;;  %vm119_vm2 = vcmask 1042434   ;;  %vm7532_vm3 = vmmov 1   ;;  %s11066_s2 = inlined_call_operand.vmem [shape: f32[12,8], index: 2, kind: input, shape index: {}]   ;;  %s11067_s0 = inlined_call_operand.vmem [shape: f32[32,8,12], index: 0, kind: input, shape index: {}]   ;;  %s11068_s4 = inlined_call_operand.vmem [shape: f32[48,32], index: 4, kind: input, shape index: {}]   ;;  %s11069_s1 = inlined_call_operand.vmem [shape: f32[32,8,4], index: 1, kind: input, shape index: {}]   ;;  %s11070_s3 = inlined_call_operand.vmem [shape: f32[1,8], index: 3, kind: input, shape index: {}]   ;;  %s11071_s8 = inlined_call_operand.vmem [shape: f32[2,32,32], index: 8, kind: input, shape index: {}]   ;;  %s11072_s5 = inlined_call_operand.vmem [shape: f32[1,32], index: 5, kind: input, shape index: {}]   ;;  %s11073_s6 = inlined_call_operand.vmem [shape: f32[2,4,32], index: 6, kind: input, shape index: {}]   ;;  %s11074_s7 = inlined_call_operand.vmem [shape: f32[2,1,32], index: 7, kind: input, shape index: {}]   ;;  %s11075_s9 = inlined_call_operand.vmem [shape: f32[2,1,32], index: 9, kind: input, shape index: {}]   ;;  %s11076_s10 = inlined_call_operand.vmem [shape: f32[32,4], index: 10, kind: input, shape index: {}]   ;;  %s11077_s11 = inlined_call_operand.vmem [shape: f32[1,4], index: 11, kind: input, shape index: {}]   ;;  %s11078_s12 = inlined_call_operand.vmem [shape: f32[32,4], index: 12, kind: output, shape index: {}]  }
   0x1   :  { %v41_v0 = vld [vmem:[%s11066_s2] sm:$0xff]  ;;  %v42_v1 = vld [vmem:[%s11066_s2 + $0x8] sm:$0xf]  ;;  %vm7605_vm4 = vmpackc.low %vm187_vm0, %vm7532_vm3  ;;  %vm122_vm5 = vcmask 1043459   ;;  %vm125_vm6 = vcmask 1044484   ;;  %vm128_vm7 = vcmask 1045509  }
   0x2   :  { %v7609_v3 = vpack.c.bf16 %v42_v1, %v41_v0  ;;  %v45_v4 = vld [vmem:[%s11067_s0] sm:$0x1]  ;;  %v46_v5 = vld [vmem:[%s11067_s0 + $0x8] sm:$0x1]  ;;  %v47_v6 = vld [vmem:[%s11067_s0 + $0x10] sm:$0x1] }
   0x3   :  { %v48_v7 = vld [vmem:[%s11067_s0 + $0x18] sm:$0x1]  ;;  %v49_v8 = vld [vmem:[%s11067_s0 + $0x20] sm:$0x1]  ;;  %v50_v9 = vld [vmem:[%s11067_s0 + $0x28] sm:$0x1] }
   0x4   :  { %7230 = vmatprep.subr.msk.bf16.mxu0 %vm7605_vm4, %v7609_v3  ;;  %7332 = vmatprep.subr.msk.bf16.mxu1 %vm7605_vm4, %v7609_v3  ;;  %v51_v10 = vld [vmem:[%s11067_s0 + $0x30] sm:$0x1]  ;;  %v52_v11 = vld [vmem:[%s11067_s0 + $0x38] sm:$0x1]  ;;  %v115_v12 = vrot.slane %v46_v5, 7  ;;  %v118_v13 = vrot.slane %v47_v6, 6 }
   0x5   :  { %7233 = vmatpush3.bf16.msk.msra.mxu0 %vm7605_vm4, %v7609_v3  ;;  %v121_v14 = vrot.slane %v48_v7, 5  ;;  %v124_v15 = vrot.slane %v49_v8, 4  ;;  %v127_v16 = vrot.slane %v50_v9, 3  ;;  %v130_v17 = vrot.slane %v51_v10, 2  ;;  %7333 = vmatpush3.bf16.msk.msra.mxu1 %vm7605_vm4, %v7609_v3  ;;  %v53_v18 = vld [vmem:[%s11067_s0 + $0x40] sm:$0x1] }
   0x6   :  { %v117_v19 = vsel %vm116_vm1, %v115_v12, %v45_v4  ;;  %vm131_vm8 = vcmask 1046534   ;;  %v133_v20 = vrot.slane %v52_v11, 1  ;;  %vm134_vm9 = vcmask 1047559   ;;  %v54_v21 = vld [vmem:[%s11067_s0 + $0x48] sm:$0x1]  ;;  %7242 = vmatprep.subr.msk.bf16.mxu0 %vm7605_vm4, %v7609_v3  ;;  %7236 = vmatprep.subr.msk.bf16.mxu1 %vm7605_vm4, %v7609_v3 }
   0x7   :  { %v120_v22 = vsel %vm119_vm2, %v118_v13, %v117_v19  ;;  %vm178_vm10 = vcmask 97280   ;;  %v55_v23 = vld [vmem:[%s11067_s0 + $0x50] sm:$0x1]  ;;  %v56_v24 = vld [vmem:[%s11067_s0 + $0x58] sm:$0x1]  ;;  %v136_v25 = vrot.slane %v54_v21, 7 }
   0x8   :  { %v123_v26 = vsel %vm122_vm5, %v121_v14, %v120_v22  ;;  %v57_v27 = vld [vmem:[%s11067_s0 + $0x60] sm:$0x1]  ;;  %v58_v28 = vld [vmem:[%s11067_s0 + $0x68] sm:$0x1]  ;;  %v59_v29 = vld [vmem:[%s11067_s0 + $0x70] sm:$0x1] }
   0x9   :  { %v126_v30 = vsel %vm125_vm6, %v124_v15, %v123_v26  ;;  %v60_v31 = vld [vmem:[%s11067_s0 + $0x78] sm:$0x1]  ;;  %v137_v32 = vsel %vm116_vm1, %v136_v25, %v53_v18  ;;  %v138_v33 = vrot.slane %v55_v23, 6  ;;  %v140_v34 = vrot.slane %v56_v24, 5  ;;  %v61_v35 = vld [vmem:[%s11067_s0 + $0x80] sm:$0x1] }
   0xa   :  { %v129_v36 = vsel %vm128_vm7, %v127_v16, %v126_v30  ;;  %v142_v37 = vrot.slane %v57_v27, 4  ;;  %v144_v38 = vrot.slane %v58_v28, 3  ;;  %v146_v39 = vrot.slane %v59_v29, 2  ;;  %v62_v40 = vld [vmem:[%s11067_s0 + $0x88] sm:$0x1] }
   0xb   :  { %v132_v41 = vsel %vm131_vm8, %v130_v17, %v129_v36  ;;  %v139_v42 = vsel %vm119_vm2, %v138_v33, %v137_v32  ;;  %v148_v43 = vrot.slane %v60_v31, 1  ;;  %v63_v44 = vld [vmem:[%s11067_s0 + $0x90] sm:$0x1]  ;;  %v64_v45 = vld [vmem:[%s11067_s0 + $0x98] sm:$0x1]  ;;  %v150_v46 = vrot.slane %v62_v40, 7 }
   0xc   :  { %v135_v47 = vsel %vm134_vm9, %v133_v20, %v132_v41  ;;  %v141_v48 = vsel %vm122_vm5, %v140_v34, %v139_v42  ;;  %v65_v49 = vld [vmem:[%s11067_s0 + $0xa0] sm:$0x1]  ;;  %v66_v50 = vld [vmem:[%s11067_s0 + $0xa8] sm:$0x1]  ;;  %v67_v51 = vld [vmem:[%s11067_s0 + $0xb0] sm:$0x1] }
   0xd   :  { %6862 = vmatprep.mubr.msk.f32.mxu0 %vm178_vm10, %v135_v47  ;;  %v143_v52 = vsel %vm125_vm6, %v142_v37, %v141_v48  ;;  %v68_v53 = vld [vmem:[%s11067_s0 + $0xb8] sm:$0x1]  ;;  %v151_v54 = vsel %vm116_vm1, %v150_v46, %v61_v35  ;;  %v152_v55 = vrot.slane %v63_v44, 6  ;;  %v154_v56 = vrot.slane %v64_v45, 5  ;;  %v69_v57 = vld [vmem:[%s11067_s0 + $0xc0] sm:$0x1] }
   0xe   :  { %v145_v58 = vsel %vm128_vm7, %v144_v38, %v143_v52  ;;  %v156_v59 = vrot.slane %v65_v49, 4  ;;  %v158_v60 = vrot.slane %v66_v50, 3  ;;  %v160_v61 = vrot.slane %v67_v51, 2  ;;  %v70_v62 = vld [vmem:[%s11067_s0 + $0xc8] sm:$0x1] }
   0xf   :  { %v147_v63 = vsel %vm131_vm8, %v146_v39, %v145_v58  ;;  %v153_v0 = vsel %vm119_vm2, %v152_v55, %v151_v54  ;;  %v162_v1 = vrot.slane %v68_v53, 1  ;;  %v71_v4 = vld [vmem:[%s11067_s0 + $0xd0] sm:$0x1]  ;;  %v72_v5 = vld [vmem:[%s11067_s0 + $0xd8] sm:$0x1]  ;;  %v164_v6 = vrot.slane %v70_v62, 7 }
  0x10   :  { %v149_v7 = vsel %vm134_vm9, %v148_v43, %v147_v63  ;;  %v155_v8 = vsel %vm122_vm5, %v154_v56, %v153_v0  ;;  %v73_v9 = vld [vmem:[%s11067_s0 + $0xe0] sm:$0x1]  ;;  %v74_v10 = vld [vmem:[%s11067_s0 + $0xe8] sm:$0x1]  ;;  %v75_v11 = vld [vmem:[%s11067_s0 + $0xf0] sm:$0x1] }
  0x11   :  { %6863 = vmatmul.mubr.msk.f32.vlgmr.msra.gmra.mrb[0].mxu0 %vm178_vm10, %v149_v7  ;;  %v157_v12 = vsel %vm125_vm6, %v156_v59, %v155_v8  ;;  %v76_v13 = vld [vmem:[%s11067_s0 + $0xf8] sm:$0x1]  ;;  %v165_v14 = vsel %vm116_vm1, %v164_v6, %v69_v57  ;;  %v166_v15 = vrot.slane %v71_v4, 6  ;;  %v168_v16 = vrot.slane %v72_v5, 5  ;;  %v553_v17 = vld [vmem:[%s11067_s0 + $0x2] sm:$0x1] }
  0x12   :  { %7245 = vmatpush3.bf16.msk.msra.mxu0 %vm7605_vm4, %v7609_v3  ;;  %v159_v18 = vsel %vm128_vm7, %v158_v60, %v157_v12  ;;  %v170_v19 = vrot.slane %v73_v9, 4  ;;  %v172_v20 = vrot.slane %v74_v10, 3  ;;  %v174_v21 = vrot.slane %v75_v11, 2  ;;  %v554_v22 = vld [vmem:[%s11067_s0 + $0xa] sm:$0x1] }
  0x13   :  { %v161_v23 = vsel %vm131_vm8, %v160_v61, %v159_v18  ;;  %v167_v24 = vsel %vm119_vm2, %v166_v15, %v165_v14  ;;  %v176_v25 = vrot.slane %v76_v13, 1  ;;  %v555_v26 = vld [vmem:[%s11067_s0 + $0x12] sm:$0x1]  ;;  %v556_v27 = vld [vmem:[%s11067_s0 + $0x1a] sm:$0x1]  ;;  %v617_v28 = vrot.slane %v554_v22, 7  ;;  %7254 = vmatprep.subr.msk.bf16.mxu0 %vm7605_vm4, %v7609_v3 }
  0x14   :  { %v163_v29 = vsel %vm134_vm9, %v162_v1, %v161_v23  ;;  %v169_v30 = vsel %vm122_vm5, %v168_v16, %v167_v24  ;;  %v557_v31 = vld [vmem:[%s11067_s0 + $0x22] sm:$0x1]  ;;  %v558_v32 = vld [vmem:[%s11067_s0 + $0x2a] sm:$0x1]  ;;  %v559_v33 = vld [vmem:[%s11067_s0 + $0x32] sm:$0x1] }
  0x15   :  { %6865 = vmatprep.mubr.msk.f32.mxu1 %vm178_vm10, %v163_v29  ;;  %v171_v34 = vsel %vm125_vm6, %v170_v19, %v169_v30  ;;  %v560_v35 = vld [vmem:[%s11067_s0 + $0x3a] sm:$0x1]  ;;  %v618_v36 = vsel %vm116_vm1, %v617_v28, %v553_v17  ;;  %v619_v37 = vrot.slane %v555_v26, 6  ;;  %v621_v38 = vrot.slane %v556_v27, 5  ;;  %v561_v39 = vld [vmem:[%s11067_s0 + $0x42] sm:$0x1] }
  0x16   :  { %v173_v40 = vsel %vm128_vm7, %v172_v20, %v171_v34  ;;  %v623_v41 = vrot.slane %v557_v31, 4  ;;  %v625_v42 = vrot.slane %v558_v32, 3  ;;  %v627_v43 = vrot.slane %v559_v33, 2  ;;  %v562_v44 = vld [vmem:[%s11067_s0 + $0x4a] sm:$0x1] }
  0x17   :  { %v175_v45 = vsel %vm131_vm8, %v174_v21, %v173_v40  ;;  %v620_v46 = vsel %vm119_vm2, %v619_v37, %v618_v36  ;;  %v629_v47 = vrot.slane %v560_v35, 1  ;;  %v563_v48 = vld [vmem:[%s11067_s0 + $0x52] sm:$0x1]  ;;  %v564_v49 = vld [vmem:[%s11067_s0 + $0x5a] sm:$0x1]  ;;  %v631_v50 = vrot.slane %v562_v44, 7 }
  0x18   :  { %v177_v51 = vsel %vm134_vm9, %v176_v25, %v175_v45  ;;  %v622_v52 = vsel %vm122_vm5, %v621_v38, %v620_v46  ;;  %v565_v53 = vld [vmem:[%s11067_s0 + $0x62] sm:$0x1]  ;;  %v566_v54 = vld [vmem:[%s11067_s0 + $0x6a] sm:$0x1]  ;;  %v567_v55 = vld [vmem:[%s11067_s0 + $0x72] sm:$0x1] }
  0x19   :  { %6866 = vmatmul.mubr.msk.f32.vlgmr.msra.gmra.mrb[0].mxu1 %vm178_vm10, %v177_v51  ;;  %v624_v56 = vsel %vm125_vm6, %v623_v41, %v622_v52  ;;  %v568_v57 = vld [vmem:[%s11067_s0 + $0x7a] sm:$0x1]  ;;  %v632_v58 = vsel %vm116_vm1, %v631_v50, %v561_v39  ;;  %v633_v59 = vrot.slane %v563_v48, 6  ;;  %v635_v60 = vrot.slane %v564_v49, 5  ;;  %v569_v61 = vld [vmem:[%s11067_s0 + $0x82] sm:$0x1] }
  0x1a   :  { %v626_v62 = vsel %vm128_vm7, %v625_v42, %v624_v56  ;;  %v637_v63 = vrot.slane %v565_v53, 4  ;;  %v639_v0 = vrot.slane %v566_v54, 3  ;;  %v641_v1 = vrot.slane %v567_v55, 2  ;;  %v570_v4 = vld [vmem:[%s11067_s0 + $0x8a] sm:$0x1]  ;;  %7239 = vmatpush3.bf16.msk.msra.mxu1 %vm7605_vm4, %v7609_v3 }
  0x1b   :  { %v628_v5 = vsel %vm131_vm8, %v627_v43, %v626_v62  ;;  %v634_v6 = vsel %vm119_vm2, %v633_v59, %v632_v58  ;;  %v643_v7 = vrot.slane %v568_v57, 1  ;;  %v571_v8 = vld [vmem:[%s11067_s0 + $0x92] sm:$0x1]  ;;  %v572_v9 = vld [vmem:[%s11067_s0 + $0x9a] sm:$0x1]  ;;  %v645_v10 = vrot.slane %v570_v4, 7  ;;  %7248 = vmatprep.subr.msk.bf16.mxu1 %vm7605_vm4, %v7609_v3 }
  0x1c   :  { %v630_v11 = vsel %vm134_vm9, %v629_v47, %v628_v5  ;;  %v636_v12 = vsel %vm122_vm5, %v635_v60, %v634_v6  ;;  %v573_v13 = vld [vmem:[%s11067_s0 + $0xa2] sm:$0x1]  ;;  %v574_v14 = vld [vmem:[%s11067_s0 + $0xaa] sm:$0x1]  ;;  %v575_v15 = vld [vmem:[%s11067_s0 + $0xb2] sm:$0x1] }
  0x1d   :  { %6882 = vmatprep.mubr.msk.f32.mxu0 %vm178_vm10, %v630_v11  ;;  %v638_v16 = vsel %vm125_vm6, %v637_v63, %v636_v12  ;;  %v576_v17 = vld [vmem:[%s11067_s0 + $0xba] sm:$0x1]  ;;  %v646_v18 = vsel %vm116_vm1, %v645_v10, %v569_v61  ;;  %v647_v19 = vrot.slane %v571_v8, 6  ;;  %v649_v20 = vrot.slane %v572_v9, 5  ;;  %v577_v21 = vld [vmem:[%s11067_s0 + $0xc2] sm:$0x1] }
  0x1e   :  { %v640_v22 = vsel %vm128_vm7, %v639_v0, %v638_v16  ;;  %v651_v23 = vrot.slane %v573_v13, 4  ;;  %v653_v24 = vrot.slane %v574_v14, 3  ;;  %v655_v25 = vrot.slane %v575_v15, 2  ;;  %v578_v26 = vld [vmem:[%s11067_s0 + $0xca] sm:$0x1] }
  0x1f   :  { %v642_v27 = vsel %vm131_vm8, %v641_v1, %v640_v22  ;;  %v648_v28 = vsel %vm119_vm2, %v647_v19, %v646_v18  ;;  %v657_v29 = vrot.slane %v576_v17, 1  ;;  %v579_v30 = vld [vmem:[%s11067_s0 + $0xd2] sm:$0x1]  ;;  %v580_v31 = vld [vmem:[%s11067_s0 + $0xda] sm:$0x1]  ;;  %v659_v32 = vrot.slane %v578_v26, 7 }
  0x20   :  { %v644_v33 = vsel %vm134_vm9, %v643_v7, %v642_v27  ;;  %v650_v34 = vsel %vm122_vm5, %v649_v20, %v648_v28  ;;  %v581_v35 = vld [vmem:[%s11067_s0 + $0xe2] sm:$0x1]  ;;  %v582_v36 = vld [vmem:[%s11067_s0 + $0xea] sm:$0x1]  ;;  %v583_v37 = vld [vmem:[%s11067_s0 + $0xf2] sm:$0x1] }
  0x21   :  { %6883 = vmatmul.mubr.msk.f32.vlgmr.msra.gmra.mrb[2].mxu0 %vm178_vm10, %v644_v33  ;;  %v652_v38 = vsel %vm125_vm6, %v651_v23, %v650_v34  ;;  %v584_v39 = vld [vmem:[%s11067_s0 + $0xfa] sm:$0x1]  ;;  %v660_v40 = vsel %vm116_vm1, %v659_v32, %v577_v21  ;;  %v661_v41 = vrot.slane %v579_v30, 6  ;;  %v663_v42 = vrot.slane %v580_v31, 5  ;;  %v308_v43 = vld [vmem:[%s11067_s0 + $0x1] sm:$0x1] }
  0x22   :  { %v654_v44 = vsel %vm128_vm7, %v653_v24, %v652_v38  ;;  %v665_v45 = vrot.slane %v581_v35, 4  ;;  %v667_v46 = vrot.slane %v582_v36, 3  ;;  %v669_v47 = vrot.slane %v583_v37, 2  ;;  %v309_v48 = vld [vmem:[%s11067_s0 + $0x9] sm:$0x1]  ;;  %7257 = vmatpush3.bf16.msk.msra.mxu0 %vm7605_vm4, %v7609_v3 }
  0x23   :  { %v656_v49 = vsel %vm131_vm8, %v655_v25, %v654_v44  ;;  %v662_v50 = vsel %vm119_vm2, %v661_v41, %v660_v40  ;;  %v671_v51 = vrot.slane %v584_v39, 1  ;;  %v310_v52 = vld [vmem:[%s11067_s0 + $0x11] sm:$0x1]  ;;  %v311_v53 = vld [vmem:[%s11067_s0 + $0x19] sm:$0x1]  ;;  %v372_v54 = vrot.slane %v309_v48, 7  ;;  %7266 = vmatprep.subr.msk.bf16.mxu0 %vm7605_vm4, %v7609_v3 }
  0x24   :  { %v658_v55 = vsel %vm134_vm9, %v657_v29, %v656_v49  ;;  %v664_v56 = vsel %vm122_vm5, %v663_v42, %v662_v50  ;;  %v312_v57 = vld [vmem:[%s11067_s0 + $0x21] sm:$0x1]  ;;  %v313_v58 = vld [vmem:[%s11067_s0 + $0x29] sm:$0x1]  ;;  %v314_v59 = vld [vmem:[%s11067_s0 + $0x31] sm:$0x1] }
  0x25   :  { %6885 = vmatprep.mubr.msk.f32.mxu0 %vm178_vm10, %v658_v55  ;;  %v666_v60 = vsel %vm125_vm6, %v665_v45, %v664_v56  ;;  %v315_v61 = vld [vmem:[%s11067_s0 + $0x39] sm:$0x1]  ;;  %v373_v62 = vsel %vm116_vm1, %v372_v54, %v308_v43  ;;  %v374_v63 = vrot.slane %v310_v52, 6  ;;  %v376_v0 = vrot.slane %v311_v53, 5  ;;  %v316_v1 = vld [vmem:[%s11067_s0 + $0x41] sm:$0x1] }
  0x26   :  { %v668_v4 = vsel %vm128_vm7, %v667_v46, %v666_v60  ;;  %v378_v5 = vrot.slane %v312_v57, 4  ;;  %v380_v6 = vrot.slane %v313_v58, 3  ;;  %v382_v7 = vrot.slane %v314_v59, 2  ;;  %v317_v8 = vld [vmem:[%s11067_s0 + $0x49] sm:$0x1] }
  0x27   :  { %v670_v9 = vsel %vm131_vm8, %v669_v47, %v668_v4  ;;  %v375_v10 = vsel %vm119_vm2, %v374_v63, %v373_v62  ;;  %v384_v11 = vrot.slane %v315_v61, 1  ;;  %v318_v12 = vld [vmem:[%s11067_s0 + $0x51] sm:$0x1]  ;;  %v319_v13 = vld [vmem:[%s11067_s0 + $0x59] sm:$0x1]  ;;  %v386_v14 = vrot.slane %v317_v8, 7 }
  0x28   :  { %v672_v15 = vsel %vm134_vm9, %v671_v51, %v670_v9  ;;  %v377_v16 = vsel %vm122_vm5, %v376_v0, %v375_v10  ;;  %v320_v17 = vld [vmem:[%s11067_s0 + $0x61] sm:$0x1]  ;;  %v321_v18 = vld [vmem:[%s11067_s0 + $0x69] sm:$0x1]  ;;  %v322_v19 = vld [vmem:[%s11067_s0 + $0x71] sm:$0x1] }
  0x29   :  { %6886 = vmatmul.mubr.msk.f32.gmra.mrb[4].mxu0 %vm178_vm10, %v672_v15  ;;  %v379_v20 = vsel %vm125_vm6, %v378_v5, %v377_v16  ;;  %v323_v21 = vld [vmem:[%s11067_s0 + $0x79] sm:$0x1]  ;;  %v387_v22 = vsel %vm116_vm1, %v386_v14, %v316_v1  ;;  %v388_v23 = vrot.slane %v318_v12, 6  ;;  %v390_v24 = vrot.slane %v319_v13, 5  ;;  %v324_v25 = vld [vmem:[%s11067_s0 + $0x81] sm:$0x1] }
  0x2a   :  { %v381_v26 = vsel %vm128_vm7, %v380_v6, %v379_v20  ;;  %v392_v27 = vrot.slane %v320_v17, 4  ;;  %v394_v28 = vrot.slane %v321_v18, 3  ;;  %v396_v29 = vrot.slane %v322_v19, 2  ;;  %v325_v30 = vld [vmem:[%s11067_s0 + $0x89] sm:$0x1] }
  0x2b   :  { %v383_v31 = vsel %vm131_vm8, %v382_v7, %v381_v26  ;;  %v389_v32 = vsel %vm119_vm2, %v388_v23, %v387_v22  ;;  %v398_v33 = vrot.slane %v323_v21, 1  ;;  %v326_v34 = vld [vmem:[%s11067_s0 + $0x91] sm:$0x1]  ;;  %v327_v35 = vld [vmem:[%s11067_s0 + $0x99] sm:$0x1]  ;;  %v400_v36 = vrot.slane %v325_v30, 7 }
  0x2c   :  { %v385_v37 = vsel %vm134_vm9, %v384_v11, %v383_v31  ;;  %v391_v38 = vsel %vm122_vm5, %v390_v24, %v389_v32  ;;  %v328_v39 = vld [vmem:[%s11067_s0 + $0xa1] sm:$0x1]  ;;  %v329_v40 = vld [vmem:[%s11067_s0 + $0xa9] sm:$0x1]  ;;  %v330_v41 = vld [vmem:[%s11067_s0 + $0xb1] sm:$0x1] }
  0x2d   :  { %6872 = vmatprep.mubr.msk.f32.mxu1 %vm178_vm10, %v385_v37  ;;  %v393_v42 = vsel %vm125_vm6, %v392_v27, %v391_v38  ;;  %v331_v43 = vld [vmem:[%s11067_s0 + $0xb9] sm:$0x1]  ;;  %v401_v44 = vsel %vm116_vm1, %v400_v36, %v324_v25  ;;  %v402_v45 = vrot.slane %v326_v34, 6  ;;  %v404_v46 = vrot.slane %v327_v35, 5  ;;  %v332_v47 = vld [vmem:[%s11067_s0 + $0xc1] sm:$0x1] }
  0x2e   :  { %v395_v48 = vsel %vm128_vm7, %v394_v28, %v393_v42  ;;  %v406_v49 = vrot.slane %v328_v39, 4  ;;  %v408_v50 = vrot.slane %v329_v40, 3  ;;  %v410_v51 = vrot.slane %v330_v41, 2  ;;  %v333_v52 = vld [vmem:[%s11067_s0 + $0xc9] sm:$0x1] }
  0x2f   :  { %v397_v53 = vsel %vm131_vm8, %v396_v29, %v395_v48  ;;  %v403_v54 = vsel %vm119_vm2, %v402_v45, %v401_v44  ;;  %v412_v55 = vrot.slane %v331_v43, 1  ;;  %v334_v56 = vld [vmem:[%s11067_s0 + $0xd1] sm:$0x1]  ;;  %v335_v57 = vld [vmem:[%s11067_s0 + $0xd9] sm:$0x1]  ;;  %v414_v58 = vrot.slane %v333_v52, 7 }
  0x30   :  { %v399_v59 = vsel %vm134_vm9, %v398_v33, %v397_v53  ;;  %v405_v60 = vsel %vm122_vm5, %v404_v46, %v403_v54  ;;  %v336_v61 = vld [vmem:[%s11067_s0 + $0xe1] sm:$0x1]  ;;  %v337_v62 = vld [vmem:[%s11067_s0 + $0xe9] sm:$0x1]  ;;  %v338_v63 = vld [vmem:[%s11067_s0 + $0xf1] sm:$0x1] }
  0x31   :  { %6873 = vmatmul.mubr.msk.f32.vlgmr.msra.gmra.mrb[2].mxu1 %vm178_vm10, %v399_v59  ;;  %v407_v0 = vsel %vm125_vm6, %v406_v49, %v405_v60  ;;  %v339_v1 = vld [vmem:[%s11067_s0 + $0xf9] sm:$0x1]  ;;  %v415_v4 = vsel %vm116_vm1, %v414_v58, %v332_v47  ;;  %v416_v5 = vrot.slane %v334_v56, 6  ;;  %v418_v6 = vrot.slane %v335_v57, 5  ;;  %v798_v7 = vld [vmem:[%s11067_s0 + $0x3] sm:$0x1] }
  0x32   :  { %v409_v8 = vsel %vm128_vm7, %v408_v50, %v407_v0  ;;  %v420_v9 = vrot.slane %v336_v61, 4  ;;  %v422_v10 = vrot.slane %v337_v62, 3  ;;  %v424_v11 = vrot.slane %v338_v63, 2  ;;  %7251 = vmatpush3.bf16.msk.msra.mxu1 %vm7605_vm4, %v7609_v3  ;;  %v799_v12 = vld [vmem:[%s11067_s0 + $0xb] sm:$0x1] }
  0x33   :  { %v411_v13 = vsel %vm131_vm8, %v410_v51, %v409_v8  ;;  %v417_v14 = vsel %vm119_vm2, %v416_v5, %v415_v4  ;;  %v426_v15 = vrot.slane %v339_v1, 1  ;;  %v800_v16 = vld [vmem:[%s11067_s0 + $0x13] sm:$0x1]  ;;  %v801_v17 = vld [vmem:[%s11067_s0 + $0x1b] sm:$0x1]  ;;  %v862_v18 = vrot.slane %v799_v12, 7  ;;  %7260 = vmatprep.subr.msk.bf16.mxu1 %vm7605_vm4, %v7609_v3 }
  0x34   :  { %v413_v19 = vsel %vm134_vm9, %v412_v55, %v411_v13  ;;  %v419_v20 = vsel %vm122_vm5, %v418_v6, %v417_v14  ;;  %v802_v21 = vld [vmem:[%s11067_s0 + $0x23] sm:$0x1]  ;;  %v803_v22 = vld [vmem:[%s11067_s0 + $0x2b] sm:$0x1]  ;;  %v804_v23 = vld [vmem:[%s11067_s0 + $0x33] sm:$0x1] }
  0x35   :  { %6875 = vmatprep.mubr.msk.f32.mxu1 %vm178_vm10, %v413_v19  ;;  %v421_v24 = vsel %vm125_vm6, %v420_v9, %v419_v20  ;;  %v805_v25 = vld [vmem:[%s11067_s0 + $0x3b] sm:$0x1]  ;;  %v863_v26 = vsel %vm116_vm1, %v862_v18, %v798_v7  ;;  %v864_v27 = vrot.slane %v800_v16, 6  ;;  %v866_v28 = vrot.slane %v801_v17, 5  ;;  %v806_v29 = vld [vmem:[%s11067_s0 + $0x43] sm:$0x1] }
  0x36   :  { %v423_v30 = vsel %vm128_vm7, %v422_v10, %v421_v24  ;;  %v868_v31 = vrot.slane %v802_v21, 4  ;;  %v870_v32 = vrot.slane %v803_v22, 3  ;;  %v872_v33 = vrot.slane %v804_v23, 2  ;;  %v807_v34 = vld [vmem:[%s11067_s0 + $0x4b] sm:$0x1] }
  0x37   :  { %v425_v35 = vsel %vm131_vm8, %v424_v11, %v423_v30  ;;  %v865_v36 = vsel %vm119_vm2, %v864_v27, %v863_v26  ;;  %v874_v37 = vrot.slane %v805_v25, 1  ;;  %v808_v38 = vld [vmem:[%s11067_s0 + $0x53] sm:$0x1]  ;;  %v809_v39 = vld [vmem:[%s11067_s0 + $0x5b] sm:$0x1]  ;;  %v876_v40 = vrot.slane %v807_v34, 7 }
  0x38   :  { %v427_v41 = vsel %vm134_vm9, %v426_v15, %v425_v35  ;;  %v867_v42 = vsel %vm122_vm5, %v866_v28, %v865_v36  ;;  %v810_v43 = vld [vmem:[%s11067_s0 + $0x63] sm:$0x1]  ;;  %v811_v44 = vld [vmem:[%s11067_s0 + $0x6b] sm:$0x1]  ;;  %v812_v45 = vld [vmem:[%s11067_s0 + $0x73] sm:$0x1] }
  0x39   :  { %6876 = vmatmul.mubr.msk.f32.gmra.mrb[4].mxu1 %vm178_vm10, %v427_v41  ;;  %v869_v46 = vsel %vm125_vm6, %v868_v31, %v867_v42  ;;  %v813_v47 = vld [vmem:[%s11067_s0 + $0x7b] sm:$0x1]  ;;  %v877_v48 = vsel %vm116_vm1, %v876_v40, %v806_v29  ;;  %v878_v49 = vrot.slane %v808_v38, 6  ;;  %v880_v50 = vrot.slane %v809_v39, 5  ;;  %v814_v51 = vld [vmem:[%s11067_s0 + $0x83] sm:$0x1] }
  0x3a   :  { %v871_v52 = vsel %vm128_vm7, %v870_v32, %v869_v46  ;;  %v882_v53 = vrot.slane %v810_v43, 4  ;;  %v884_v54 = vrot.slane %v811_v44, 3  ;;  %v886_v55 = vrot.slane %v812_v45, 2  ;;  %v815_v56 = vld [vmem:[%s11067_s0 + $0x8b] sm:$0x1] }
  0x3b   :  { %v873_v57 = vsel %vm131_vm8, %v872_v33, %v871_v52  ;;  %v879_v58 = vsel %vm119_vm2, %v878_v49, %v877_v48  ;;  %v888_v59 = vrot.slane %v813_v47, 1  ;;  %v816_v60 = vld [vmem:[%s11067_s0 + $0x93] sm:$0x1]  ;;  %v817_v61 = vld [vmem:[%s11067_s0 + $0x9b] sm:$0x1]  ;;  %v890_v62 = vrot.slane %v815_v56, 7 }
  0x3c   :  { %v875_v63 = vsel %vm134_vm9, %v874_v37, %v873_v57  ;;  %v881_v0 = vsel %vm122_vm5, %v880_v50, %v879_v58  ;;  %v818_v1 = vld [vmem:[%s11067_s0 + $0xa3] sm:$0x1]  ;;  %v819_v4 = vld [vmem:[%s11067_s0 + $0xab] sm:$0x1]  ;;  %v820_v5 = vld [vmem:[%s11067_s0 + $0xb3] sm:$0x1] }
  0x3d   :  { %6892 = vmatprep.mubr.msk.f32.mxu1 %vm178_vm10, %v875_v63  ;;  %v883_v6 = vsel %vm125_vm6, %v882_v53, %v881_v0  ;;  %v821_v7 = vld [vmem:[%s11067_s0 + $0xbb] sm:$0x1]  ;;  %v891_v8 = vsel %vm116_vm1, %v890_v62, %v814_v51  ;;  %v892_v9 = vrot.slane %v816_v60, 6  ;;  %v894_v10 = vrot.slane %v817_v61, 5  ;;  %v822_v11 = vld [vmem:[%s11067_s0 + $0xc3] sm:$0x1] }
  0x3e   :  { %v885_v12 = vsel %vm128_vm7, %v884_v54, %v883_v6  ;;  %v896_v13 = vrot.slane %v818_v1, 4  ;;  %v898_v14 = vrot.slane %v819_v4, 3  ;;  %v900_v15 = vrot.slane %v820_v5, 2  ;;  %v823_v16 = vld [vmem:[%s11067_s0 + $0xcb] sm:$0x1] }
  0x3f   :  { %v887_v17 = vsel %vm131_vm8, %v886_v55, %v885_v12  ;;  %v893_v18 = vsel %vm119_vm2, %v892_v9, %v891_v8  ;;  %v902_v19 = vrot.slane %v821_v7, 1  ;;  %v824_v20 = vld [vmem:[%s11067_s0 + $0xd3] sm:$0x1]  ;;  %v825_v21 = vld [vmem:[%s11067_s0 + $0xdb] sm:$0x1]  ;;  %v904_v22 = vrot.slane %v823_v16, 7 }
  0x40   :  { %v889_v23 = vsel %vm134_vm9, %v888_v59, %v887_v17  ;;  %v895_v24 = vsel %vm122_vm5, %v894_v10, %v893_v18  ;;  %v826_v25 = vld [vmem:[%s11067_s0 + $0xe3] sm:$0x1]  ;;  %v827_v26 = vld [vmem:[%s11067_s0 + $0xeb] sm:$0x1]  ;;  %v828_v27 = vld [vmem:[%s11067_s0 + $0xf3] sm:$0x1] }
  0x41   :  { %6893 = vmatmul.mubr.msk.f32.vlgmr.msra.gmra.mrb[6].mxu1 %vm178_vm10, %v889_v23  ;;  %v897_v28 = vsel %vm125_vm6, %v896_v13, %v895_v24  ;;  %v829_v29 = vld [vmem:[%s11067_s0 + $0xfb] sm:$0x1]  ;;  %v905_v30 = vsel %vm116_vm1, %v904_v22, %v822_v11  ;;  %v906_v31 = vrot.slane %v824_v20, 6  ;;  %v908_v32 = vrot.slane %v825_v21, 5  ;;  %v1043_v33 = vld [vmem:[%s11067_s0 + $0x4] sm:$0x1] }
  0x42   :  { %v899_v34 = vsel %vm128_vm7, %v898_v14, %v897_v28  ;;  %v910_v35 = vrot.slane %v826_v25, 4  ;;  %v912_v36 = vrot.slane %v827_v26, 3  ;;  %v914_v37 = vrot.slane %v828_v27, 2  ;;  %v1044_v38 = vld [vmem:[%s11067_s0 + $0xc] sm:$0x1]  ;;  %7263 = vmatpush3.bf16.msk.msra.mxu1 %vm7605_vm4, %v7609_v3 }
  0x43   :  { %v901_v39 = vsel %vm131_vm8, %v900_v15, %v899_v34  ;;  %v907_v40 = vsel %vm119_vm2, %v906_v31, %v905_v30  ;;  %v916_v41 = vrot.slane %v829_v29, 1  ;;  %v1045_v42 = vld [vmem:[%s11067_s0 + $0x14] sm:$0x1]  ;;  %v1046_v43 = vld [vmem:[%s11067_s0 + $0x1c] sm:$0x1]  ;;  %v1107_v44 = vrot.slane %v1044_v38, 7  ;;  %7272 = vmatprep.subr.msk.bf16.mxu1 %vm7605_vm4, %v7609_v3 }
  0x44   :  { %v903_v45 = vsel %vm134_vm9, %v902_v19, %v901_v39  ;;  %v909_v46 = vsel %vm122_vm5, %v908_v32, %v907_v40  ;;  %v1047_v47 = vld [vmem:[%s11067_s0 + $0x24] sm:$0x1]  ;;  %v1048_v48 = vld [vmem:[%s11067_s0 + $0x2c] sm:$0x1]  ;;  %v1049_v49 = vld [vmem:[%s11067_s0 + $0x34] sm:$0x1] }
  0x45   :  { %6895 = vmatprep.mubr.msk.f32.mxu1 %vm178_vm10, %v903_v45  ;;  %v911_v50 = vsel %vm125_vm6, %v910_v35, %v909_v46  ;;  %v1050_v51 = vld [vmem:[%s11067_s0 + $0x3c] sm:$0x1]  ;;  %v1108_v52 = vsel %vm116_vm1, %v1107_v44, %v1043_v33  ;;  %v1109_v53 = vrot.slane %v1045_v42, 6  ;;  %v1111_v54 = vrot.slane %v1046_v43, 5  ;;  %v1051_v55 = vld [vmem:[%s11067_s0 + $0x44] sm:$0x1] }
  0x46   :  { %v913_v56 = vsel %vm128_vm7, %v912_v36, %v911_v50  ;;  %v1113_v57 = vrot.slane %v1047_v47, 4  ;;  %v1115_v58 = vrot.slane %v1048_v48, 3  ;;  %v1117_v59 = vrot.slane %v1049_v49, 2  ;;  %v1052_v60 = vld [vmem:[%s11067_s0 + $0x4c] sm:$0x1]  ;;  %v8266_v43 = vld [vmem:[%s11068_s4] sm:$0xff] }
  0x47   :  { %v915_v61 = vsel %vm131_vm8, %v914_v37, %v913_v56  ;;  %v1110_v62 = vsel %vm119_vm2, %v1109_v53, %v1108_v52  ;;  %v1119_v63 = vrot.slane %v1050_v51, 1  ;;  %v1053_v0 = vld [vmem:[%s11067_s0 + $0x54] sm:$0x1]  ;;  %v1054_v1 = vld [vmem:[%s11067_s0 + $0x5c] sm:$0x1]  ;;  %v1121_v4 = vrot.slane %v1052_v60, 7 }
  0x48   :  { %v917_v5 = vsel %vm134_vm9, %v916_v41, %v915_v61  ;;  %v1112_v6 = vsel %vm122_vm5, %v1111_v54, %v1110_v62  ;;  %v1055_v7 = vld [vmem:[%s11067_s0 + $0x64] sm:$0x1]  ;;  %v1056_v8 = vld [vmem:[%s11067_s0 + $0x6c] sm:$0x1]  ;;  %v1057_v9 = vld [vmem:[%s11067_s0 + $0x74] sm:$0x1] }
  0x49   :  { %6896 = vmatmul.mubr.msk.f32.gmra.mrb[8].mxu1 %vm178_vm10, %v917_v5  ;;  %v1114_v10 = vsel %vm125_vm6, %v1113_v57, %v1112_v6  ;;  %v1058_v11 = vld [vmem:[%s11067_s0 + $0x7c] sm:$0x1]  ;;  %v1122_v12 = vsel %vm116_vm1, %v1121_v4, %v1051_v55  ;;  %v1123_v13 = vrot.slane %v1053_v0, 6  ;;  %v1125_v14 = vrot.slane %v1054_v1, 5  ;;  %v1059_v15 = vld [vmem:[%s11067_s0 + $0x84] sm:$0x1] }
  0x4a   :  { %v1116_v16 = vsel %vm128_vm7, %v1115_v58, %v1114_v10  ;;  %v1127_v17 = vrot.slane %v1055_v7, 4  ;;  %v1129_v18 = vrot.slane %v1056_v8, 3  ;;  %v1131_v19 = vrot.slane %v1057_v9, 2  ;;  %v1060_v20 = vld [vmem:[%s11067_s0 + $0x8c] sm:$0x1] }
  0x4b   :  { %v1118_v21 = vsel %vm131_vm8, %v1117_v59, %v1116_v16  ;;  %v1124_v22 = vsel %vm119_vm2, %v1123_v13, %v1122_v12  ;;  %v1133_v23 = vrot.slane %v1058_v11, 1  ;;  %v1061_v24 = vld [vmem:[%s11067_s0 + $0x94] sm:$0x1]  ;;  %v1062_v25 = vld [vmem:[%s11067_s0 + $0x9c] sm:$0x1]  ;;  %v1135_v26 = vrot.slane %v1060_v20, 7 }
  0x4c   :  { %v1120_v27 = vsel %vm134_vm9, %v1119_v63, %v1118_v21  ;;  %v1126_v28 = vsel %vm122_vm5, %v1125_v14, %v1124_v22  ;;  %v1063_v29 = vld [vmem:[%s11067_s0 + $0xa4] sm:$0x1]  ;;  %v1064_v30 = vld [vmem:[%s11067_s0 + $0xac] sm:$0x1]  ;;  %v1065_v31 = vld [vmem:[%s11067_s0 + $0xb4] sm:$0x1] }
  0x4d   :  { %6902 = vmatprep.mubr.msk.f32.mxu0 %vm178_vm10, %v1120_v27  ;;  %v1128_v32 = vsel %vm125_vm6, %v1127_v17, %v1126_v28  ;;  %v1066_v33 = vld [vmem:[%s11067_s0 + $0xbc] sm:$0x1]  ;;  %v1136_v34 = vsel %vm116_vm1, %v1135_v26, %v1059_v15  ;;  %v1137_v35 = vrot.slane %v1061_v24, 6  ;;  %v1139_v36 = vrot.slane %v1062_v25, 5  ;;  %v1067_v37 = vld [vmem:[%s11067_s0 + $0xc4] sm:$0x1] }
  0x4e   :  { %v1130_v38 = vsel %vm128_vm7, %v1129_v18, %v1128_v32  ;;  %v1141_v39 = vrot.slane %v1063_v29, 4  ;;  %v1143_v40 = vrot.slane %v1064_v30, 3  ;;  %v1145_v41 = vrot.slane %v1065_v31, 2  ;;  %v1068_v42 = vld [vmem:[%s11067_s0 + $0xcc] sm:$0x1] }
  0x4f   :  { %v1132_v44 = vsel %vm131_vm8, %v1131_v19, %v1130_v38  ;;  %v1138_v45 = vsel %vm119_vm2, %v1137_v35, %v1136_v34  ;;  %v1147_v46 = vrot.slane %v1066_v33, 1  ;;  %v1069_v47 = vld [vmem:[%s11067_s0 + $0xd4] sm:$0x1]  ;;  %v1070_v48 = vld [vmem:[%s11067_s0 + $0xdc] sm:$0x1]  ;;  %v1149_v49 = vrot.slane %v1068_v42, 7 }
  0x50   :  { %v1134_v50 = vsel %vm134_vm9, %v1133_v23, %v1132_v44  ;;  %v1140_v51 = vsel %vm122_vm5, %v1139_v36, %v1138_v45  ;;  %v1071_v52 = vld [vmem:[%s11067_s0 + $0xe4] sm:$0x1]  ;;  %v1072_v53 = vld [vmem:[%s11067_s0 + $0xec] sm:$0x1]  ;;  %v1073_v54 = vld [vmem:[%s11067_s0 + $0xf4] sm:$0x1] }
  0x51   :  { %6903 = vmatmul.mubr.msk.f32.vlgmr.msra.gmra.mrb[6].mxu0 %vm178_vm10, %v1134_v50  ;;  %v1142_v55 = vsel %vm125_vm6, %v1141_v39, %v1140_v51  ;;  %v1074_v56 = vld [vmem:[%s11067_s0 + $0xfc] sm:$0x1]  ;;  %v1150_v57 = vsel %vm116_vm1, %v1149_v49, %v1067_v37  ;;  %v1151_v58 = vrot.slane %v1069_v47, 6  ;;  %v1153_v59 = vrot.slane %v1070_v48, 5  ;;  %v1288_v60 = vld [vmem:[%s11067_s0 + $0x5] sm:$0x1] }
  0x52   :  { %v1144_v61 = vsel %vm128_vm7, %v1143_v40, %v1142_v55  ;;  %v1155_v62 = vrot.slane %v1071_v52, 4  ;;  %v1157_v63 = vrot.slane %v1072_v53, 3  ;;  %v1159_v0 = vrot.slane %v1073_v54, 2  ;;  %v1289_v1 = vld [vmem:[%s11067_s0 + $0xd] sm:$0x1]  ;;  %7269 = vmatpush3.bf16.msk.msra.mxu0 %vm7605_vm4, %v7609_v3 }
  0x53   :  { %v1146_v4 = vsel %vm131_vm8, %v1145_v41, %v1144_v61  ;;  %v1152_v5 = vsel %vm119_vm2, %v1151_v58, %v1150_v57  ;;  %v1161_v6 = vrot.slane %v1074_v56, 1  ;;  %v1290_v7 = vld [vmem:[%s11067_s0 + $0x15] sm:$0x1]  ;;  %v1291_v8 = vld [vmem:[%s11067_s0 + $0x1d] sm:$0x1]  ;;  %v1352_v9 = vrot.slane %v1289_v1, 7  ;;  %6938 = vmatprep.subr.mxu0 %v8266_v43 }
  0x54   :  { %v1148_v10 = vsel %vm134_vm9, %v1147_v46, %v1146_v4  ;;  %v1154_v11 = vsel %vm122_vm5, %v1153_v59, %v1152_v5  ;;  %v1292_v12 = vld [vmem:[%s11067_s0 + $0x25] sm:$0x1]  ;;  %v1293_v13 = vld [vmem:[%s11067_s0 + $0x2d] sm:$0x1]  ;;  %v1294_v14 = vld [vmem:[%s11067_s0 + $0x35] sm:$0x1] }
  0x55   :  { %6905 = vmatprep.mubr.msk.f32.mxu0 %vm178_vm10, %v1148_v10  ;;  %v1156_v15 = vsel %vm125_vm6, %v1155_v62, %v1154_v11  ;;  %v1295_v16 = vld [vmem:[%s11067_s0 + $0x3d] sm:$0x1]  ;;  %v1353_v17 = vsel %vm116_vm1, %v1352_v9, %v1288_v60  ;;  %v1354_v18 = vrot.slane %v1290_v7, 6  ;;  %v1356_v19 = vrot.slane %v1291_v8, 5  ;;  %v1296_v20 = vld [vmem:[%s11067_s0 + $0x45] sm:$0x1] }
  0x56   :  { %v1158_v21 = vsel %vm128_vm7, %v1157_v63, %v1156_v15  ;;  %v1358_v22 = vrot.slane %v1292_v12, 4  ;;  %v1360_v23 = vrot.slane %v1293_v13, 3  ;;  %v1362_v24 = vrot.slane %v1294_v14, 2  ;;  %v1297_v25 = vld [vmem:[%s11067_s0 + $0x4d] sm:$0x1] }
  0x57   :  { %v1160_v26 = vsel %vm131_vm8, %v1159_v0, %v1158_v21  ;;  %v1355_v27 = vsel %vm119_vm2, %v1354_v18, %v1353_v17  ;;  %v1364_v28 = vrot.slane %v1295_v16, 1  ;;  %v1298_v29 = vld [vmem:[%s11067_s0 + $0x55] sm:$0x1]  ;;  %v1299_v30 = vld [vmem:[%s11067_s0 + $0x5d] sm:$0x1]  ;;  %v1366_v31 = vrot.slane %v1297_v25, 7 }
  0x58   :  { %v1162_v32 = vsel %vm134_vm9, %v1161_v6, %v1160_v26  ;;  %v1357_v33 = vsel %vm122_vm5, %v1356_v19, %v1355_v27  ;;  %v1300_v34 = vld [vmem:[%s11067_s0 + $0x65] sm:$0x1]  ;;  %v1301_v35 = vld [vmem:[%s11067_s0 + $0x6d] sm:$0x1]  ;;  %v1302_v36 = vld [vmem:[%s11067_s0 + $0x75] sm:$0x1] }
  0x59   :  { %6906 = vmatmul.mubr.msk.f32.gmra.mrb[8].mxu0 %vm178_vm10, %v1162_v32  ;;  %v1359_v37 = vsel %vm125_vm6, %v1358_v22, %v1357_v33  ;;  %v1303_v38 = vld [vmem:[%s11067_s0 + $0x7d] sm:$0x1]  ;;  %v1367_v39 = vsel %vm116_vm1, %v1366_v31, %v1296_v20  ;;  %v1368_v40 = vrot.slane %v1298_v29, 6  ;;  %v1370_v41 = vrot.slane %v1299_v30, 5  ;;  %v1304_v42 = vld [vmem:[%s11067_s0 + $0x85] sm:$0x1] }
  0x5a   :  { %v1361_v44 = vsel %vm128_vm7, %v1360_v23, %v1359_v37  ;;  %v1372_v45 = vrot.slane %v1300_v34, 4  ;;  %v1374_v46 = vrot.slane %v1301_v35, 3  ;;  %v1376_v47 = vrot.slane %v1302_v36, 2  ;;  %v1305_v48 = vld [vmem:[%s11067_s0 + $0x8d] sm:$0x1] }
  0x5b   :  { %v1363_v49 = vsel %vm131_vm8, %v1362_v24, %v1361_v44  ;;  %v1369_v50 = vsel %vm119_vm2, %v1368_v40, %v1367_v39  ;;  %v1378_v51 = vrot.slane %v1303_v38, 1  ;;  %v1306_v52 = vld [vmem:[%s11067_s0 + $0x95] sm:$0x1]  ;;  %v1307_v53 = vld [vmem:[%s11067_s0 + $0x9d] sm:$0x1]  ;;  %v1380_v54 = vrot.slane %v1305_v48, 7 }
  0x5c   :  { %v1365_v55 = vsel %vm134_vm9, %v1364_v28, %v1363_v49  ;;  %v1371_v56 = vsel %vm122_vm5, %v1370_v41, %v1369_v50  ;;  %v1308_v57 = vld [vmem:[%s11067_s0 + $0xa5] sm:$0x1]  ;;  %v1309_v58 = vld [vmem:[%s11067_s0 + $0xad] sm:$0x1]  ;;  %v1310_v59 = vld [vmem:[%s11067_s0 + $0xb5] sm:$0x1] }
  0x5d   :  { %6912 = vmatprep.mubr.msk.f32.mxu1 %vm178_vm10, %v1365_v55  ;;  %v1373_v60 = vsel %vm125_vm6, %v1372_v45, %v1371_v56  ;;  %v1311_v61 = vld [vmem:[%s11067_s0 + $0xbd] sm:$0x1]  ;;  %v1381_v62 = vsel %vm116_vm1, %v1380_v54, %v1304_v42  ;;  %v1382_v63 = vrot.slane %v1306_v52, 6  ;;  %v1384_v0 = vrot.slane %v1307_v53, 5  ;;  %v1312_v1 = vld [vmem:[%s11067_s0 + $0xc5] sm:$0x1] }
  0x5e   :  { %v1375_v4 = vsel %vm128_vm7, %v1374_v46, %v1373_v60  ;;  %v1386_v5 = vrot.slane %v1308_v57, 4  ;;  %v1388_v6 = vrot.slane %v1309_v58, 3  ;;  %v1390_v7 = vrot.slane %v1310_v59, 2  ;;  %v1313_v8 = vld [vmem:[%s11067_s0 + $0xcd] sm:$0x1] }
  0x5f   :  { %v1377_v9 = vsel %vm131_vm8, %v1376_v47, %v1375_v4  ;;  %v1383_v10 = vsel %vm119_vm2, %v1382_v63, %v1381_v62  ;;  %v1392_v11 = vrot.slane %v1311_v61, 1  ;;  %v1314_v12 = vld [vmem:[%s11067_s0 + $0xd5] sm:$0x1]  ;;  %v1315_v13 = vld [vmem:[%s11067_s0 + $0xdd] sm:$0x1]  ;;  %v1394_v14 = vrot.slane %v1313_v8, 7 }
  0x60   :  { %v1379_v15 = vsel %vm134_vm9, %v1378_v51, %v1377_v9  ;;  %v1385_v16 = vsel %vm122_vm5, %v1384_v0, %v1383_v10  ;;  %v1316_v17 = vld [vmem:[%s11067_s0 + $0xe5] sm:$0x1]  ;;  %v1317_v18 = vld [vmem:[%s11067_s0 + $0xed] sm:$0x1]  ;;  %v1318_v19 = vld [vmem:[%s11067_s0 + $0xf5] sm:$0x1] }
  0x61   :  { %6913 = vmatmul.mubr.msk.f32.vlgmr.msra.gmra.mrb[10].mxu1 %vm178_vm10, %v1379_v15  ;;  %v1387_v20 = vsel %vm125_vm6, %v1386_v5, %v1385_v16  ;;  %v1319_v21 = vld [vmem:[%s11067_s0 + $0xfd] sm:$0x1]  ;;  %v1395_v22 = vsel %vm116_vm1, %v1394_v14, %v1312_v1  ;;  %v1396_v23 = vrot.slane %v1314_v12, 6  ;;  %v1398_v24 = vrot.slane %v1315_v13, 5  ;;  %v1533_v25 = vld [vmem:[%s11067_s0 + $0x6] sm:$0x1] }
  0x62   :  { %v1389_v26 = vsel %vm128_vm7, %v1388_v6, %v1387_v20  ;;  %v1400_v27 = vrot.slane %v1316_v17, 4  ;;  %v1402_v28 = vrot.slane %v1317_v18, 3  ;;  %v1404_v29 = vrot.slane %v1318_v19, 2  ;;  %v1534_v30 = vld [vmem:[%s11067_s0 + $0xe] sm:$0x1]  ;;  %7275 = vmatpush3.bf16.msk.msra.mxu1 %vm7605_vm4, %v7609_v3 }
  0x63   :  { %v1391_v31 = vsel %vm131_vm8, %v1390_v7, %v1389_v26  ;;  %v1397_v32 = vsel %vm119_vm2, %v1396_v23, %v1395_v22  ;;  %v1406_v33 = vrot.slane %v1319_v21, 1  ;;  %v1535_v34 = vld [vmem:[%s11067_s0 + $0x16] sm:$0x1]  ;;  %v1536_v35 = vld [vmem:[%s11067_s0 + $0x1e] sm:$0x1]  ;;  %v1597_v36 = vrot.slane %v1534_v30, 7  ;;  %7002 = vmatprep.subr.mxu1 %v8266_v43 }
  0x64   :  { %v1393_v37 = vsel %vm134_vm9, %v1392_v11, %v1391_v31  ;;  %v1399_v2 = vsel %vm122_vm5, %v1398_v24, %v1397_v32  ;;  %v1537_v3 = vld [vmem:[%s11067_s0 + $0x26] sm:$0x1]  ;;  %v1538_v38 = vld [vmem:[%s11067_s0 + $0x2e] sm:$0x1]  ;;  %v1539_v39 = vld [vmem:[%s11067_s0 + $0x36] sm:$0x1] }
  0x65   :  { %6915 = vmatprep.mubr.msk.f32.mxu1 %vm178_vm10, %v1393_v37  ;;  %v1401_v40 = vsel %vm125_vm6, %v1400_v27, %v1399_v2  ;;  %v1540_v41 = vld [vmem:[%s11067_s0 + $0x3e] sm:$0x1]  ;;  %v1598_v42 = vsel %vm116_vm1, %v1597_v36, %v1533_v25  ;;  %v1599_v44 = vrot.slane %v1535_v34, 6  ;;  %v1601_v45 = vrot.slane %v1536_v35, 5  ;;  %v1541_v46 = vld [vmem:[%s11067_s0 + $0x46] sm:$0x1] }
  0x66   :  { %v1403_v47 = vsel %vm128_vm7, %v1402_v28, %v1401_v40  ;;  %v1603_v48 = vrot.slane %v1537_v3, 4  ;;  %v1605_v49 = vrot.slane %v1538_v38, 3  ;;  %v1607_v50 = vrot.slane %v1539_v39, 2  ;;  %v1542_v51 = vld [vmem:[%s11067_s0 + $0x4e] sm:$0x1] }
  0x67   :  { %v1405_v52 = vsel %vm131_vm8, %v1404_v29, %v1403_v47  ;;  %v1600_v53 = vsel %vm119_vm2, %v1599_v44, %v1598_v42  ;;  %v1609_v54 = vrot.slane %v1540_v41, 1  ;;  %v1543_v55 = vld [vmem:[%s11067_s0 + $0x56] sm:$0x1]  ;;  %v1544_v56 = vld [vmem:[%s11067_s0 + $0x5e] sm:$0x1]  ;;  %v1611_v57 = vrot.slane %v1542_v51, 7 }
  0x68   :  { %v1407_v58 = vsel %vm134_vm9, %v1406_v33, %v1405_v52  ;;  %v1602_v59 = vsel %vm122_vm5, %v1601_v45, %v1600_v53  ;;  %v1545_v60 = vld [vmem:[%s11067_s0 + $0x66] sm:$0x1]  ;;  %v1546_v61 = vld [vmem:[%s11067_s0 + $0x6e] sm:$0x1]  ;;  %v1547_v62 = vld [vmem:[%s11067_s0 + $0x76] sm:$0x1] }
  0x69   :  { %6916 = vmatmul.mubr.msk.f32.gmra.mrb[12].mxu1 %vm178_vm10, %v1407_v58  ;;  %v1604_v63 = vsel %vm125_vm6, %v1603_v48, %v1602_v59  ;;  %v1548_v0 = vld [vmem:[%s11067_s0 + $0x7e] sm:$0x1]  ;;  %v1612_v1 = vsel %vm116_vm1, %v1611_v57, %v1541_v46  ;;  %v1613_v4 = vrot.slane %v1543_v55, 6  ;;  %v1615_v5 = vrot.slane %v1544_v56, 5  ;;  %v1549_v6 = vld [vmem:[%s11067_s0 + $0x86] sm:$0x1] }
  0x6a   :  { %v1606_v7 = vsel %vm128_vm7, %v1605_v49, %v1604_v63  ;;  %v1617_v8 = vrot.slane %v1545_v60, 4  ;;  %v1619_v9 = vrot.slane %v1546_v61, 3  ;;  %v1621_v10 = vrot.slane %v1547_v62, 2  ;;  %v1550_v11 = vld [vmem:[%s11067_s0 + $0x8e] sm:$0x1] }
  0x6b   :  { %v1608_v12 = vsel %vm131_vm8, %v1607_v50, %v1606_v7  ;;  %v1614_v13 = vsel %vm119_vm2, %v1613_v4, %v1612_v1  ;;  %v1623_v14 = vrot.slane %v1548_v0, 1  ;;  %v1551_v15 = vld [vmem:[%s11067_s0 + $0x96] sm:$0x1]  ;;  %v1552_v16 = vld [vmem:[%s11067_s0 + $0x9e] sm:$0x1]  ;;  %v1625_v17 = vrot.slane %v1550_v11, 7 }
  0x6c   :  { %v1610_v18 = vsel %vm134_vm9, %v1609_v54, %v1608_v12  ;;  %v1616_v19 = vsel %vm122_vm5, %v1615_v5, %v1614_v13  ;;  %v1553_v20 = vld [vmem:[%s11067_s0 + $0xa6] sm:$0x1]  ;;  %v1554_v21 = vld [vmem:[%s11067_s0 + $0xae] sm:$0x1]  ;;  %v1555_v22 = vld [vmem:[%s11067_s0 + $0xb6] sm:$0x1] }
  0x6d   :  { %6922 = vmatprep.mubr.msk.f32.mxu0 %vm178_vm10, %v1610_v18  ;;  %v1618_v23 = vsel %vm125_vm6, %v1617_v8, %v1616_v19  ;;  %v1556_v24 = vld [vmem:[%s11067_s0 + $0xbe] sm:$0x1]  ;;  %v1626_v25 = vsel %vm116_vm1, %v1625_v17, %v1549_v6  ;;  %v1627_v26 = vrot.slane %v1551_v15, 6  ;;  %v1629_v27 = vrot.slane %v1552_v16, 5  ;;  %v1557_v28 = vld [vmem:[%s11067_s0 + $0xc6] sm:$0x1] }
  0x6e   :  { %v1620_v29 = vsel %vm128_vm7, %v1619_v9, %v1618_v23  ;;  %v1631_v30 = vrot.slane %v1553_v20, 4  ;;  %v1633_v31 = vrot.slane %v1554_v21, 3  ;;  %v1635_v32 = vrot.slane %v1555_v22, 2  ;;  %v1558_v33 = vld [vmem:[%s11067_s0 + $0xce] sm:$0x1] }
  0x6f   :  { %v1622_v34 = vsel %vm131_vm8, %v1621_v10, %v1620_v29  ;;  %v1628_v35 = vsel %vm119_vm2, %v1627_v26, %v1626_v25  ;;  %v1637_v36 = vrot.slane %v1556_v24, 1  ;;  %v1559_v37 = vld [vmem:[%s11067_s0 + $0xd6] sm:$0x1]  ;;  %v1560_v2 = vld [vmem:[%s11067_s0 + $0xde] sm:$0x1]  ;;  %v1639_v3 = vrot.slane %v1558_v33, 7 }
  0x70   :  { %v1624_v38 = vsel %vm134_vm9, %v1623_v14, %v1622_v34  ;;  %v1630_v39 = vsel %vm122_vm5, %v1629_v27, %v1628_v35  ;;  %v1561_v40 = vld [vmem:[%s11067_s0 + $0xe6] sm:$0x1]  ;;  %v1562_v41 = vld [vmem:[%s11067_s0 + $0xee] sm:$0x1]  ;;  %v1563_v42 = vld [vmem:[%s11067_s0 + $0xf6] sm:$0x1] }
  0x71   :  { %6923 = vmatmul.mubr.msk.f32.vlgmr.msra.gmra.mrb[10].mxu0 %vm178_vm10, %v1624_v38  ;;  %v1632_v44 = vsel %vm125_vm6, %v1631_v30, %v1630_v39  ;;  %v1564_v45 = vld [vmem:[%s11067_s0 + $0xfe] sm:$0x1]  ;;  %v1640_v46 = vsel %vm116_vm1, %v1639_v3, %v1557_v28  ;;  %v1641_v47 = vrot.slane %v1559_v37, 6  ;;  %v1643_v48 = vrot.slane %v1560_v2, 5  ;;  %v1778_v49 = vld [vmem:[%s11067_s0 + $0x7] sm:$0x1] }
  0x72   :  { %v1634_v50 = vsel %vm128_vm7, %v1633_v31, %v1632_v44  ;;  %v1645_v51 = vrot.slane %v1561_v40, 4  ;;  %v1647_v52 = vrot.slane %v1562_v41, 3  ;;  %v1649_v53 = vrot.slane %v1563_v42, 2  ;;  %v1779_v54 = vld [vmem:[%s11067_s0 + $0xf] sm:$0x1]  ;;  %6939 = vmatpush3.msra.mxu0 %v8266_v43 }
  0x73   :  { %v1636_v55 = vsel %vm131_vm8, %v1635_v32, %v1634_v50  ;;  %v1642_v56 = vsel %vm119_vm2, %v1641_v47, %v1640_v46  ;;  %v1651_v57 = vrot.slane %v1564_v45, 1  ;;  %v1780_v58 = vld [vmem:[%s11067_s0 + $0x17] sm:$0x1]  ;;  %v1781_v59 = vld [vmem:[%s11067_s0 + $0x1f] sm:$0x1]  ;;  %v1842_v60 = vrot.slane %v1779_v54, 7 }
  0x74   :  { %v1638_v61 = vsel %vm134_vm9, %v1637_v36, %v1636_v55  ;;  %v1644_v62 = vsel %vm122_vm5, %v1643_v48, %v1642_v56  ;;  %v1782_v63 = vld [vmem:[%s11067_s0 + $0x27] sm:$0x1]  ;;  %v1783_v0 = vld [vmem:[%s11067_s0 + $0x2f] sm:$0x1]  ;;  %v1784_v1 = vld [vmem:[%s11067_s0 + $0x37] sm:$0x1] }
  0x75   :  { %6925 = vmatprep.mubr.msk.f32.mxu0 %vm178_vm10, %v1638_v61  ;;  %v1646_v4 = vsel %vm125_vm6, %v1645_v51, %v1644_v62  ;;  %v1785_v5 = vld [vmem:[%s11067_s0 + $0x3f] sm:$0x1]  ;;  %v1843_v6 = vsel %vm116_vm1, %v1842_v60, %v1778_v49  ;;  %v1844_v7 = vrot.slane %v1780_v58, 6  ;;  %v1846_v8 = vrot.slane %v1781_v59, 5  ;;  %v1786_v9 = vld [vmem:[%s11067_s0 + $0x47] sm:$0x1] }
  0x76   :  { %v1648_v10 = vsel %vm128_vm7, %v1647_v52, %v1646_v4  ;;  %v1848_v11 = vrot.slane %v1782_v63, 4  ;;  %v1850_v12 = vrot.slane %v1783_v0, 3  ;;  %v1852_v13 = vrot.slane %v1784_v1, 2  ;;  %v1787_v14 = vld [vmem:[%s11067_s0 + $0x4f] sm:$0x1] }
  0x77   :  { %v1650_v15 = vsel %vm131_vm8, %v1649_v53, %v1648_v10  ;;  %v1845_v16 = vsel %vm119_vm2, %v1844_v7, %v1843_v6  ;;  %v1854_v17 = vrot.slane %v1785_v5, 1  ;;  %v1788_v18 = vld [vmem:[%s11067_s0 + $0x57] sm:$0x1]  ;;  %v1789_v19 = vld [vmem:[%s11067_s0 + $0x5f] sm:$0x1]  ;;  %v1856_v20 = vrot.slane %v1787_v14, 7 }
  0x78   :  { %v1652_v21 = vsel %vm134_vm9, %v1651_v57, %v1650_v15  ;;  %v1847_v22 = vsel %vm122_vm5, %v1846_v8, %v1845_v16  ;;  %v1790_v23 = vld [vmem:[%s11067_s0 + $0x67] sm:$0x1]  ;;  %v1791_v24 = vld [vmem:[%s11067_s0 + $0x6f] sm:$0x1]  ;;  %v1792_v25 = vld [vmem:[%s11067_s0 + $0x77] sm:$0x1] }
  0x79   :  { %6926 = vmatmul.mubr.msk.f32.gmra.mrb[12].mxu0 %vm178_vm10, %v1652_v21  ;;  %v1849_v26 = vsel %vm125_vm6, %v1848_v11, %v1847_v22  ;;  %v1793_v27 = vld [vmem:[%s11067_s0 + $0x7f] sm:$0x1]  ;;  %v1857_v28 = vsel %vm116_vm1, %v1856_v20, %v1786_v9  ;;  %v1858_v29 = vrot.slane %v1788_v18, 6  ;;  %v1860_v30 = vrot.slane %v1789_v19, 5  ;;  %v1794_v31 = vld [vmem:[%s11067_s0 + $0x87] sm:$0x1] }
  0x7a   :  { %v1851_v32 = vsel %vm128_vm7, %v1850_v12, %v1849_v26  ;;  %v1862_v33 = vrot.slane %v1790_v23, 4  ;;  %v1864_v34 = vrot.slane %v1791_v24, 3  ;;  %v1866_v35 = vrot.slane %v1792_v25, 2  ;;  %v1795_v36 = vld [vmem:[%s11067_s0 + $0x8f] sm:$0x1] }
  0x7b   :  { %v1853_v37 = vsel %vm131_vm8, %v1852_v13, %v1851_v32  ;;  %v1859_v2 = vsel %vm119_vm2, %v1858_v29, %v1857_v28  ;;  %v1868_v3 = vrot.slane %v1793_v27, 1  ;;  %v1796_v38 = vld [vmem:[%s11067_s0 + $0x97] sm:$0x1]  ;;  %v1797_v39 = vld [vmem:[%s11067_s0 + $0x9f] sm:$0x1]  ;;  %v1870_v40 = vrot.slane %v1795_v36, 7 }
  0x7c   :  { %v1855_v41 = vsel %vm134_vm9, %v1854_v17, %v1853_v37  ;;  %v1861_v42 = vsel %vm122_vm5, %v1860_v30, %v1859_v2  ;;  %v1798_v44 = vld [vmem:[%s11067_s0 + $0xa7] sm:$0x1]  ;;  %v1799_v45 = vld [vmem:[%s11067_s0 + $0xaf] sm:$0x1]  ;;  %v1800_v46 = vld [vmem:[%s11067_s0 + $0xb7] sm:$0x1] }
  0x7d   :  { %6932 = vmatprep.mubr.msk.f32.mxu1 %vm178_vm10, %v1855_v41  ;;  %v1863_v47 = vsel %vm125_vm6, %v1862_v33, %v1861_v42  ;;  %v1801_v48 = vld [vmem:[%s11067_s0 + $0xbf] sm:$0x1]  ;;  %v1871_v49 = vsel %vm116_vm1, %v1870_v40, %v1794_v31  ;;  %v1872_v50 = vrot.slane %v1796_v38, 6  ;;  %v1874_v51 = vrot.slane %v1797_v39, 5  ;;  %v1802_v52 = vld [vmem:[%s11067_s0 + $0xc7] sm:$0x1] }
  0x7e   :  { %v1865_v53 = vsel %vm128_vm7, %v1864_v34, %v1863_v47  ;;  %v1876_v54 = vrot.slane %v1798_v44, 4  ;;  %v1878_v55 = vrot.slane %v1799_v45, 3  ;;  %v1880_v56 = vrot.slane %v1800_v46, 2  ;;  %v1803_v57 = vld [vmem:[%s11067_s0 + $0xcf] sm:$0x1] }
  0x7f   :  { %v1867_v58 = vsel %vm131_vm8, %v1866_v35, %v1865_v53  ;;  %v1873_v59 = vsel %vm119_vm2, %v1872_v50, %v1871_v49  ;;  %v1882_v60 = vrot.slane %v1801_v48, 1  ;;  %v1804_v61 = vld [vmem:[%s11067_s0 + $0xd7] sm:$0x1]  ;;  %v1805_v62 = vld [vmem:[%s11067_s0 + $0xdf] sm:$0x1]  ;;  %v1884_v63 = vrot.slane %v1803_v57, 7 }
  0x80   :  { %v1869_v0 = vsel %vm134_vm9, %v1868_v3, %v1867_v58  ;;  %v1875_v1 = vsel %vm122_vm5, %v1874_v51, %v1873_v59  ;;  %v1806_v4 = vld [vmem:[%s11067_s0 + $0xe7] sm:$0x1]  ;;  %v1807_v5 = vld [vmem:[%s11067_s0 + $0xef] sm:$0x1]  ;;  %v1808_v6 = vld [vmem:[%s11067_s0 + $0xf7] sm:$0x1] }
  0x81   :  { %6933 = vmatmul.mubr.msk.f32.vlgmr.msra.gmra.mrb[14].mxu1 %vm178_vm10, %v1869_v0  ;;  %v1877_v7 = vsel %vm125_vm6, %v1876_v54, %v1875_v1  ;;  %v1809_v8 = vld [vmem:[%s11067_s0 + $0xff] sm:$0x1]  ;;  %v1885_v9 = vsel %vm116_vm1, %v1884_v63, %v1802_v52  ;;  %v1886_v10 = vrot.slane %v1804_v61, 6  ;;  %v1888_v11 = vrot.slane %v1805_v62, 5  ;;  %v8690_v15 = vld [vmem:[%s11068_s4 + $0x8] sm:$0xf] }
  0x82   :  { %v1879_v12 = vsel %vm128_vm7, %v1878_v55, %v1877_v7  ;;  %v1890_v13 = vrot.slane %v1806_v4, 4  ;;  %v1892_v14 = vrot.slane %v1807_v5, 3  ;;  %7003 = vmatpush3.msra.mxu1 %v8266_v43  ;;  %v1894_v18 = vrot.slane %v1808_v6, 2  ;;  %6946 = vmatprep.subr.msk.mxu0 %vm187_vm0, %v8690_v15  ;;  %v277_v25 = vld [vmem:[%s11069_s1 + $0x8] sm:$0x1] }
  0x83   :  { %v1881_v16 = vsel %vm131_vm8, %v1880_v56, %v1879_v12  ;;  %v1887_v17 = vsel %vm119_vm2, %v1886_v10, %v1885_v9  ;;  %7010 = vmatprep.subr.msk.mxu1 %vm187_vm0, %v8690_v15  ;;  %v1896_v21 = vrot.slane %v1809_v8, 1  ;;  %v278_v26 = vld [vmem:[%s11069_s1 + $0x10] sm:$0x1]  ;;  %v2171_v27 = vrot.slane %v277_v25, 7  ;;  %v276_v28 = vld [vmem:[%s11069_s1] sm:$0x1] }
  0x84   :  { %v1883_v19 = vsel %vm134_vm9, %v1882_v60, %v1881_v16  ;;  %v1889_v20 = vsel %vm122_vm5, %v1888_v11, %v1887_v17  ;;  %v285_v29 = vld [vmem:[%s11069_s1 + $0x48] sm:$0x1]  ;;  %v279_v30 = vld [vmem:[%s11069_s1 + $0x18] sm:$0x1]  ;;  %v2173_v31 = vrot.slane %v278_v26, 6  ;;  %vm2031_vm11 = vcmask 64512  }
  0x85   :  { %6935 = vmatprep.mubr.msk.f32.mxu1 %vm178_vm10, %v1883_v19  ;;  %v1891_v43 = vsel %vm125_vm6, %v1890_v13, %v1889_v20  ;;  %v2172_v32 = vsel %vm116_vm1, %v2171_v27, %v276_v28  ;;  %v286_v33 = vld [vmem:[%s11069_s1 + $0x50] sm:$0x1]  ;;  %v2185_v34 = vrot.slane %v285_v29, 7  ;;  %v284_v35 = vld [vmem:[%s11069_s1 + $0x40] sm:$0x1]  ;;  %v2175_v2 = vrot.slane %v279_v30, 5 }
  0x86   :  { %v1893_v22 = vsel %vm128_vm7, %v1892_v14, %v1891_v43  ;;  %v293_v36 = vld [vmem:[%s11069_s1 + $0x88] sm:$0x1]  ;;  %v280_v37 = vld [vmem:[%s11069_s1 + $0x20] sm:$0x1]  ;;  %v8741_v38 = vld [vmem:[%s11069_s1 + $0x30] sm:$0x1]  ;;  %v2174_v39 = vsel %vm119_vm2, %v2173_v31, %v2172_v32 }
  0x87   :  { %v1895_v23 = vsel %vm131_vm8, %v1894_v18, %v1893_v22  ;;  %v281_v3 = vld [vmem:[%s11069_s1 + $0x28] sm:$0x1]  ;;  %v287_v40 = vld [vmem:[%s11069_s1 + $0x58] sm:$0x1]  ;;  %v2187_v41 = vrot.slane %v286_v33, 6  ;;  %v2186_v45 = vsel %vm116_vm1, %v2185_v34, %v284_v35  ;;  %v2199_v47 = vrot.slane %v293_v36, 7 }
  0x88   :  { %v1897_v24 = vsel %vm134_vm9, %v1896_v21, %v1895_v23  ;;  %v301_v42 = vld [vmem:[%s11069_s1 + $0xc8] sm:$0x1]  ;;  %v8753_v44 = vld [vmem:[%s11069_s1 + $0x38] sm:$0x1]  ;;  %v294_v46 = vld [vmem:[%s11069_s1 + $0x90] sm:$0x1]  ;;  %v2176_v51 = vsel %vm122_vm5, %v2175_v2, %v2174_v39 }
  0x89   :  { %6936 = vmatmul.mubr.msk.f32.gmra.mrb[16].mxu1 %vm178_vm10, %v1897_v24  ;;  %v2177_v48 = vrot.slane %v280_v37, 4  ;;  %v288_v49 = vld [vmem:[%s11069_s1 + $0x60] sm:$0x1]  ;;  %v289_v52 = vld [vmem:[%s11069_s1 + $0x68] sm:$0x1]  ;;  %v2189_v53 = vrot.slane %v287_v40, 5  ;;  %v2188_v56 = vsel %vm119_vm2, %v2187_v41, %v2186_v45 }
  0x8a   :  { %v292_v50 = vld [vmem:[%s11069_s1 + $0x80] sm:$0x1]  ;;  %v302_v54 = vld [vmem:[%s11069_s1 + $0xd0] sm:$0x1]  ;;  %v2213_v55 = vrot.slane %v301_v42, 7  ;;  %v2201_v58 = vrot.slane %v294_v46, 6 }
  0x8b   :  { %v295_v57 = vld [vmem:[%s11069_s1 + $0x98] sm:$0x1]  ;;  %v300_v59 = vld [vmem:[%s11069_s1 + $0xc0] sm:$0x1]  ;;  %v2179_v61 = vrot.slane %v281_v3, 3  ;;  %v2181_v62 = vrot.slane %v8741_v38, 2  ;;  %v2200_v0 = vsel %vm116_vm1, %v2199_v47, %v292_v50  ;;  %v2178_v4 = vsel %vm125_vm6, %v2177_v48, %v2176_v51 }
  0x8c   :  { %v8782_v60 = vld [vmem:[%s11070_s3] ss:$0 sm:$0xff]  ;;  %v2183_v63 = vrot.slane %v8753_v44, 1  ;;  %v767_v1 = vld [vmem:[%s11069_s1 + $0xa] sm:$0x1]  ;;  %v2191_v6 = vrot.slane %v288_v49, 4  ;;  %v2190_v10 = vsel %vm122_vm5, %v2189_v53, %v2188_v56  ;;  %v2214_v14 = vsel %vm116_vm1, %v2213_v55, %v300_v59 }
  0x8d   :  { %v8794_v5 = vld [vmem:[%s11069_s1 + $0x70] sm:$0x1]  ;;  %v303_v7 = vld [vmem:[%s11069_s1 + $0xd8] sm:$0x1]  ;;  %v2215_v8 = vrot.slane %v302_v54, 6  ;;  %v2193_v11 = vrot.slane %v289_v52, 3  ;;  %v2202_v18 = vsel %vm119_vm2, %v2201_v58, %v2200_v0  ;;  %v2180_v43 = vsel %vm128_vm7, %v2179_v61, %v2178_v4 }
  0x8e   :  { %v8802_v9 = vld [vmem:[%s11069_s1 + $0x78] sm:$0x1]  ;;  %v296_v12 = vld [vmem:[%s11069_s1 + $0xa0] sm:$0x1]  ;;  %v2203_v13 = vrot.slane %v295_v57, 5  ;;  %v2750_v20 = vrot.slane %v767_v1, 7  ;;  %v2192_v27 = vsel %vm125_vm6, %v2191_v6, %v2190_v10  ;;  %v2182_v2 = vsel %vm131_vm8, %v2181_v62, %v2180_v43 }
  0x8f   :  { %v297_v17 = vld [vmem:[%s11069_s1 + $0xa8] sm:$0x1]  ;;  %v768_v19 = vld [vmem:[%s11069_s1 + $0x12] sm:$0x1]  ;;  %v766_v22 = vld [vmem:[%s11069_s1 + $0x2] sm:$0x1]  ;;  %v2216_v30 = vsel %vm119_vm2, %v2215_v8, %v2214_v14  ;;  %v2194_v42 = vsel %vm128_vm7, %v2193_v11, %v2192_v27  ;;  %v2184_v62 = vsel %vm134_vm9, %v2183_v63, %v2182_v2 }
  0x90   :  { %v304_v23 = vld [vmem:[%s11069_s1 + $0xe0] sm:$0x1]  ;;  %v2217_v24 = vrot.slane %v303_v7, 5  ;;  %v8827_v26 = vld [vmem:[%s11068_s4 + $0xc] sm:$0xff]  ;;  %v2205_v29 = vrot.slane %v296_v12, 4  ;;  %vm2227_vm12 = vcmask 31744   ;;  %v2204_v35 = vsel %vm122_vm5, %v2203_v13, %v2202_v18 }
  0x91   :  { %v8833_v28 = vld [vmem:[%s11069_s1 + $0xb0] sm:$0x1]  ;;  %v775_v31 = vld [vmem:[%s11069_s1 + $0x4a] sm:$0x1]  ;;  %v2195_v33 = vrot.slane %v8794_v5, 2  ;;  %v2752_v37 = vrot.slane %v768_v19, 6  ;;  %v2751_v39 = vsel %vm116_vm1, %v2750_v20, %v766_v22 }
  0x92   :  { %v8844_v34 = vld [vmem:[%s11069_s1 + $0xb8] sm:$0x1]  ;;  %v769_v36 = vld [vmem:[%s11069_s1 + $0x1a] sm:$0x1]  ;;  %v2197_v3 = vrot.slane %v8802_v9, 1  ;;  %v2219_v41 = vrot.slane %v304_v23, 4  ;;  %v2218_v47 = vsel %vm122_vm5, %v2217_v24, %v2216_v30  ;;  %v2206_v50 = vsel %vm125_vm6, %v2205_v29, %v2204_v35 }
  0x93   :  { %v770_v38 = vld [vmem:[%s11069_s1 + $0x22] sm:$0x1]  ;;  %v305_v40 = vld [vmem:[%s11069_s1 + $0xe8] sm:$0x1]  ;;  %v2207_v45 = vrot.slane %v297_v17, 3  ;;  %v2764_v49 = vrot.slane %v775_v31, 7  ;;  %v2753_v57 = vsel %vm119_vm2, %v2752_v37, %v2751_v39  ;;  %v2196_v0 = vsel %vm131_vm8, %v2195_v33, %v2194_v42 }
  0x94   :  { %v8865_v46 = vld [vmem:[%s11069_s1 + $0x2a] sm:$0x1]  ;;  %v776_v48 = vld [vmem:[%s11069_s1 + $0x52] sm:$0x1]  ;;  %v2209_v51 = vrot.slane %v8833_v28, 2  ;;  %v2754_v52 = vrot.slane %v769_v36, 5  ;;  %v2220_v4 = vsel %vm125_vm6, %v2219_v41, %v2218_v47  ;;  %v2198_v37 = vsel %vm134_vm9, %v2197_v3, %v2196_v0 }
  0x95   :  { %v774_v53 = vld [vmem:[%s11069_s1 + $0x42] sm:$0x1]  ;;  %v783_v54 = vld [vmem:[%s11069_s1 + $0x8a] sm:$0x1]  ;;  %v2211_v55 = vrot.slane %v8844_v34, 1  ;;  %v2221_v59 = vrot.slane %v305_v40, 3  ;;  %v2208_v63 = vsel %vm128_vm7, %v2207_v45, %v2206_v50 }
  0x96   :  { %v8886_v56 = vld [vmem:[%s11069_s1 + $0x32] sm:$0x1]  ;;  %v306_v58 = vld [vmem:[%s11069_s1 + $0xf0] sm:$0x1]  ;;  %v8899_v1 = vld [vmem:[%s11069_s1 + $0x3a] sm:$0x1]  ;;  %v2765_v10 = vsel %vm116_vm1, %v2764_v49, %v774_v53  ;;  %v2755_v14 = vsel %vm122_vm5, %v2754_v52, %v2753_v57 }
  0x97   :  { %v777_v5 = vld [vmem:[%s11069_s1 + $0x5a] sm:$0x1]  ;;  %v2766_v6 = vrot.slane %v776_v48, 6  ;;  %v791_v44 = vld [vmem:[%s11069_s1 + $0xca] sm:$0x1]  ;;  %v2756_v8 = vrot.slane %v770_v38, 4 }
  0x98   :  { %v784_v11 = vld [vmem:[%s11069_s1 + $0x92] sm:$0x1]  ;;  %v2778_v12 = vrot.slane %v783_v54, 7  ;;  %v307_v17 = vld [vmem:[%s11069_s1 + $0xf8] sm:$0x1]  ;;  %v2223_v18 = vrot.slane %v306_v58, 2 }
  0x99   :  { %v782_v19 = vld [vmem:[%s11069_s1 + $0x82] sm:$0x1]  ;;  %v2768_v22 = vrot.slane %v777_v5, 5  ;;  %v792_v23 = vld [vmem:[%s11069_s1 + $0xd2] sm:$0x1]  ;;  %v2792_v24 = vrot.slane %v791_v44, 7  ;;  %v2767_v28 = vsel %vm119_vm2, %v2766_v6, %v2765_v10 }
  0x9a   :  { %v778_v43 = vld [vmem:[%s11069_s1 + $0x62] sm:$0x1]  ;;  %v2760_v27 = vrot.slane %v8886_v56, 2  ;;  %v785_v29 = vld [vmem:[%s11069_s1 + $0x9a] sm:$0x1]  ;;  %v2780_v30 = vrot.slane %v784_v11, 6  ;;  %v2779_v36 = vsel %vm116_vm1, %v2778_v12, %v782_v19 }
  0x9b   :  { %v790_v31 = vld [vmem:[%s11069_s1 + $0xc2] sm:$0x1]  ;;  %v2762_v33 = vrot.slane %v8899_v1, 1  ;;  %v2225_v34 = vrot.slane %v307_v17, 1  ;;  %v779_v35 = vld [vmem:[%s11069_s1 + $0x6a] sm:$0x1]  ;;  %v2769_v45 = vsel %vm122_vm5, %v2768_v22, %v2767_v28 }
  0x9c   :  { %v8955_v38 = vld [vmem:[%s11069_s1 + $0x72] sm:$0x1]  ;;  %v2770_v39 = vrot.slane %v778_v43, 4  ;;  %v793_v40 = vld [vmem:[%s11069_s1 + $0xda] sm:$0x1]  ;;  %v2794_v41 = vrot.slane %v792_v23, 6  ;;  %v2793_v48 = vsel %vm116_vm1, %v2792_v24, %v790_v31  ;;  %v2781_v53 = vsel %vm119_vm2, %v2780_v30, %v2779_v36 }
  0x9d   :  { %v522_v42 = vld [vmem:[%s11069_s1 + $0x9] sm:$0x1]  ;;  %v8967_v3 = vld [vmem:[%s11069_s1 + $0x7a] sm:$0x1]  ;;  %v2782_v47 = vrot.slane %v785_v29, 5  ;;  %v2796_v58 = vrot.slane %v793_v40, 5 }
  0x9e   :  { %v8978_v52 = vld [vmem:[%s11068_s4 + $0x14] sm:$0xf]  ;;  %v794_v54 = vld [vmem:[%s11069_s1 + $0xe2] sm:$0x1]  ;;  %v2771_v0 = vsel %vm125_vm6, %v2770_v39, %v2769_v45  ;;  %v2795_v6 = vsel %vm119_vm2, %v2794_v41, %v2793_v48  ;;  %v521_v44 = vld [vmem:[%s11069_s1 + $0x1] sm:$0x1] }
  0x9f   :  { %v2783_v10 = vsel %vm122_vm5, %v2782_v47, %v2781_v53  ;;  %v530_v11 = vld [vmem:[%s11069_s1 + $0x49] sm:$0x1]  ;;  %v9032_v19 = vld [vmem:[%s11069_s1 + $0xba] sm:$0x1]  ;;  %v2797_v43 = vsel %vm122_vm5, %v2796_v58, %v2795_v6  ;;  %v525_v31 = vld [vmem:[%s11069_s1 + $0x21] sm:$0x1] }
  0xa0   :  { %v2475_v28 = vrot.slane %v530_v11, 7  ;;  %v538_v29 = vld [vmem:[%s11069_s1 + $0x89] sm:$0x1]  ;;  %v2790_v1 = vrot.slane %v9032_v19, 1  ;;  %v532_v39 = vld [vmem:[%s11069_s1 + $0x59] sm:$0x1] }
  0xa1   :  { %v546_v40 = vld [vmem:[%s11069_s1 + $0xc9] sm:$0x1]  ;;  %v539_v45 = vld [vmem:[%s11069_s1 + $0x91] sm:$0x1]  ;;  %v537_v53 = vld [vmem:[%s11069_s1 + $0x81] sm:$0x1] }
  0xa2   :  { %v533_v58 = vld [vmem:[%s11069_s1 + $0x61] sm:$0x1]  ;;  %v540_v6 = vld [vmem:[%s11069_s1 + $0x99] sm:$0x1]  ;;  %vm5270_vm13 = vcmask 261120  }
  0xe4   :  { %v6864_v16 = vpop.f32.mrb[0].mxu0 }
  0xe5   :  { %v257_v21 = vpop.f32.mrb[1].mxu0  ;;  %v263_v32 = vadd.f32 %v6864_v16, %v8782_v60  ;;  %v2758_v16 = vrot.slane %v8865_v46, 3  ;;  %v786_v46 = vld [vmem:[%s11069_s1 + $0xa2] sm:$0x1] }
  0xe6   :  { %v258_v25 = vadd.f32 %v8782_v60, %v257_v21  ;;  %v2222_v21 = vsel %vm128_vm7, %v2221_v59, %v2220_v4  ;;  %v523_v59 = vld [vmem:[%s11069_s1 + $0x11] sm:$0x1]  ;;  %v787_v4 = vld [vmem:[%s11069_s1 + $0xaa] sm:$0x1]  ;;  %v2784_v5 = vrot.slane %v786_v46, 4  ;;  %v2489_v46 = vrot.slane %v538_v29, 7 }
  0xe7   :  { %v2224_v2 = vsel %vm131_vm8, %v2223_v18, %v2222_v21  ;;  %v2463_v17 = vrot.slane %v523_v59, 6  ;;  %v796_v21 = vld [vmem:[%s11069_s1 + $0xf2] sm:$0x1]  ;;  %v547_v59 = vld [vmem:[%s11069_s1 + $0xd1] sm:$0x1] }
  0xe8   :  { %6940 = vmatprep.mubr.msk.f32.mxu0 %vm2031_vm11, %v258_v25  ;;  %v2210_v25 = vsel %vm131_vm8, %v2209_v51, %v2208_v63  ;;  %v2772_v51 = vrot.slane %v779_v35, 3  ;;  %v2226_v57 = vsel %vm134_vm9, %v2225_v34, %v2224_v2  ;;  %v2776_v63 = vrot.slane %v8967_v3, 1  ;;  %v529_v34 = vld [vmem:[%s11069_s1 + $0x41] sm:$0x1]  ;;  %v9074_v2 = vld [vmem:[%s11069_s1 + $0x31] sm:$0x1] }
  0xe9   :  { %6941 = vmatmul.mubr.msk.f32.vlgmr.msra.gmra.mrb[14].mxu0 %vm2031_vm11, %v263_v32  ;;  %v2757_v32 = vsel %vm125_vm6, %v2756_v8, %v2755_v14  ;;  %v2212_v9 = vsel %vm134_vm9, %v2211_v55, %v2210_v25  ;;  %v788_v8 = vld [vmem:[%s11069_s1 + $0xb2] sm:$0x1]  ;;  %v2798_v14 = vrot.slane %v794_v54, 4  ;;  %v2785_v23 = vsel %vm125_vm6, %v2784_v5, %v2783_v10  ;;  %v9045_v25 = vld [vmem:[%s11069_s1 + $0xfa] sm:$0x1] }
  0xea   :  { %6947 = vmatpush3.msk.msra.mxu0 %vm187_vm0, %v8690_v15  ;;  %v2759_v50 = vsel %vm128_vm7, %v2758_v16, %v2757_v32  ;;  %v524_v16 = vld [vmem:[%s11069_s1 + $0x19] sm:$0x1]  ;;  %v2773_v18 = vsel %vm128_vm7, %v2772_v51, %v2771_v0  ;;  %v2788_v24 = vrot.slane %v788_v8, 2  ;;  %v2802_v48 = vrot.slane %v796_v21, 2  ;;  %v9148_v21 = vld [vmem:[%s11069_s1 + $0x71] sm:$0x1] }
  0xeb   :  { %6954 = vmatprep.subr.mxu0 %v8827_v26  ;;  %v2761_v12 = vsel %vm131_vm8, %v2760_v27, %v2759_v50  ;;  %v531_v27 = vld [vmem:[%s11069_s1 + $0x51] sm:$0x1]  ;;  %v2465_v32 = vrot.slane %v524_v16, 5  ;;  %v2467_v50 = vrot.slane %v525_v31, 4  ;;  %v2476_v51 = vsel %vm116_vm1, %v2475_v28, %v529_v34  ;;  %v9158_v28 = vld [vmem:[%s11069_s1 + $0xa9] sm:$0x1] }
  0xec   :  { %v6867_v61 = vpop.f32.mrb[0].mxu1  ;;  %v2477_v3 = vrot.slane %v531_v27, 6  ;;  %v2479_v5 = vrot.slane %v532_v39, 5  ;;  %v2471_v10 = vrot.slane %v9074_v2, 2  ;;  %v2490_v11 = vsel %vm116_vm1, %v2489_v46, %v537_v53  ;;  %v9188_v39 = vld [vmem:[%s11069_s1 + $0xb1] sm:$0x1] }
  0xed   :  { %v267_v7 = vpop.f32.mrb[1].mxu1  ;;  %v273_v20 = vadd.f32 %v6867_v61, %v8782_v60  ;;  %v2461_v61 = vrot.slane %v522_v42, 7  ;;  %v2505_v19 = vrot.slane %v547_v59, 6  ;;  %v9206_v46 = vld [vmem:[%s11069_s1 + $0xb9] sm:$0x1]  ;;  %v2485_v53 = vrot.slane %v9148_v21, 2 }
  0xee   :  { %v268_v13 = vadd.f32 %v8782_v60, %v267_v7  ;;  %v2774_v7 = vrot.slane %v8955_v38, 2  ;;  %v2497_v59 = vrot.slane %v9158_v28, 3 }
  0xef   :  { %v2462_v22 = vsel %vm116_vm1, %v2461_v61, %v521_v44  ;;  %v2503_v61 = vrot.slane %v546_v40, 7  ;;  %v2491_v44 = vrot.slane %v539_v45, 6  ;;  %v9198_v45 = vld [vmem:[%s11068_s4 + $0x18] sm:$0xff] }
  0xf0   :  { %6943 = vmatprep.mubr.msk.f32.mxu0 %vm2031_vm11, %v268_v13  ;;  %v795_v13 = vld [vmem:[%s11069_s1 + $0xea] sm:$0x1]  ;;  %v2775_v36 = vsel %vm131_vm8, %v2774_v7, %v2773_v18  ;;  %v2464_v38 = vsel %vm119_vm2, %v2463_v17, %v2462_v22  ;;  %v545_v7 = vld [vmem:[%s11069_s1 + $0xc1] sm:$0x1]  ;;  %v534_v17 = vld [vmem:[%s11069_s1 + $0x69] sm:$0x1] }
  0xf1   :  { %6944 = vmatmul.mubr.msk.f32.gmra.mrb[16].mxu0 %vm2031_vm11, %v273_v20  ;;  %v2786_v20 = vrot.slane %v787_v4, 3  ;;  %v2800_v30 = vrot.slane %v795_v13, 3  ;;  %v9114_v0 = vsel %vm134_vm9, %v2776_v63, %v2775_v36  ;;  %v2478_v63 = vsel %vm119_vm2, %v2477_v3, %v2476_v51  ;;  %v548_v18 = vld [vmem:[%s11069_s1 + $0xd9] sm:$0x1]  ;;  %v541_v22 = vld [vmem:[%s11069_s1 + $0xa1] sm:$0x1] }
  0xf2   :  { %6948 = vmatprep.mubr.msk.f32.mxu0 %vm2227_vm12, %v2184_v62  ;;  %v2480_v27 = vsel %vm122_vm5, %v2479_v5, %v2478_v63  ;;  %v2492_v29 = vsel %vm119_vm2, %v2491_v44, %v2490_v11  ;;  %v9173_v36 = vld [vmem:[%s11069_s1 + $0x79] sm:$0x1]  ;;  %v2495_v40 = vrot.slane %v541_v22, 4  ;;  %v1019_v11 = vld [vmem:[%s11069_s1 + $0x43] sm:$0x1] }
  0xf4   :  { %v6884_v49 = vpop.f32.mrb[2].mxu0 }
  0xf5   :  { %v8985_v55 = vadd.f32 %v6884_v49, %v8782_v60  ;;  %v747_v56 = vpop.f32.mrb[3].mxu0  ;;  %6949 = vmatmul.mubr.msk.f32.vlgmr.msra.gmra.mrb[14].mxu0 %vm2227_vm12, %v2198_v37  ;;  %v526_v37 = vld [vmem:[%s11069_s1 + $0x29] sm:$0x1]  ;;  %v9096_v49 = vld [vmem:[%s11069_s1 + $0x39] sm:$0x1] }
  0xf6   :  { %v8993_v62 = vadd.f32 %v8782_v60, %v747_v56  ;;  %6955 = vmatpush3.msra.mxu0 %v8827_v26  ;;  %6951 = vmatprep.mubr.msk.f32.mxu0 %vm2227_vm12, %v2212_v9  ;;  %v2787_v9 = vsel %vm128_vm7, %v2786_v20, %v2785_v23  ;;  %v2804_v56 = vrot.slane %v9045_v25, 1  ;;  %v2469_v8 = vrot.slane %v526_v37, 3 }
  0xf7   :  { %6962 = vmatprep.subr.msk.mxu0 %vm187_vm0, %v8978_v52  ;;  %v2789_v4 = vsel %vm131_vm8, %v2788_v24, %v2787_v9  ;;  %v2473_v16 = vrot.slane %v9096_v49, 1  ;;  %v2493_v23 = vrot.slane %v540_v6, 5  ;;  %v2504_v24 = vsel %vm116_vm1, %v2503_v61, %v545_v7  ;;  %v1020_v9 = vld [vmem:[%s11069_s1 + $0x4b] sm:$0x1]  ;;  %v1014_v49 = vld [vmem:[%s11069_s1 + $0x1b] sm:$0x1] }
  0xf8   :  { %7004 = vmatprep.mubr.msk.f32.mxu1 %vm2031_vm11, %v8993_v62  ;;  %v9143_v20 = vsel %vm134_vm9, %v2790_v1, %v2789_v4  ;;  %v1011_v1 = vld [vmem:[%s11069_s1 + $0x3] sm:$0x1]  ;;  %v2507_v37 = vrot.slane %v548_v18, 5  ;;  %v1021_v4 = vld [vmem:[%s11069_s1 + $0x53] sm:$0x1]  ;;  %v3053_v5 = vrot.slane %v1020_v9, 7 }
  0xf9   :  { %7005 = vmatmul.mubr.msk.f32.vlgmr.msra.gmra.mrb[18].mxu1 %vm2031_vm11, %v8985_v55  ;;  %6952 = vmatmul.mubr.msk.f32.gmra.mrb[16].mxu0 %vm2227_vm12, %v2226_v57  ;;  %v2466_v57 = vsel %vm122_vm5, %v2465_v32, %v2464_v38  ;;  %v2483_v38 = vrot.slane %v534_v17, 3  ;;  %v1028_v6 = vld [vmem:[%s11069_s1 + $0x8b] sm:$0x1]  ;;  %v2487_v7 = vrot.slane %v9173_v36, 1  ;;  %v3043_v63 = vrot.slane %v1014_v49, 5 }
  0xfa   :  { %7011 = vmatpush3.msk.msra.mxu1 %vm187_vm0, %v8690_v15  ;;  %v9056_v15 = vsel %vm134_vm9, %v2762_v33, %v2761_v12  ;;  %v2799_v33 = vsel %vm125_vm6, %v2798_v14, %v2797_v43  ;;  %v1012_v12 = vld [vmem:[%s11069_s1 + $0xb] sm:$0x1]  ;;  %v2468_v14 = vsel %vm125_vm6, %v2467_v50, %v2466_v57  ;;  %v2481_v43 = vrot.slane %v533_v58, 4  ;;  %v550_v57 = vld [vmem:[%s11069_s1 + $0xe9] sm:$0x1] }
  0xfb   :  { %7018 = vmatprep.subr.mxu1 %v8827_v26  ;;  %v2801_v54 = vsel %vm128_vm7, %v2800_v30, %v2799_v33  ;;  %v1013_v30 = vld [vmem:[%s11069_s1 + $0x13] sm:$0x1]  ;;  %v3039_v31 = vrot.slane %v1012_v12, 7  ;;  %v549_v33 = vld [vmem:[%s11069_s1 + $0xe1] sm:$0x1]  ;;  %v2511_v18 = vrot.slane %v550_v57, 3 }
  0xfc   :  { %v6887_v35 = vpop.f32.mrb[4].mxu0  ;;  %v2803_v13 = vsel %vm131_vm8, %v2802_v48, %v2801_v54  ;;  %v2494_v48 = vsel %vm122_vm5, %v2493_v23, %v2492_v29  ;;  %v3041_v50 = vrot.slane %v1013_v30, 6  ;;  %v1015_v54 = vld [vmem:[%s11069_s1 + $0x23] sm:$0x1]  ;;  %v2509_v58 = vrot.slane %v549_v33, 4 }
  0xfd   :  { %v9084_v41 = vadd.f32 %v6887_v35, %v8782_v60  ;;  %v757_v42 = vpop.f32.mrb[5].mxu0  ;;  %v9167_v34 = vsel %vm134_vm9, %v2804_v56, %v2803_v13  ;;  %v2470_v35 = vsel %vm128_vm7, %v2469_v8, %v2468_v14  ;;  %v3040_v56 = vsel %vm116_vm1, %v3039_v31, %v1011_v1  ;;  %v551_v17 = vld [vmem:[%s11069_s1 + $0xf1] sm:$0x1]  ;;  %v1029_v23 = vld [vmem:[%s11069_s1 + $0x93] sm:$0x1] }
  0xfe   :  { %v9091_v47 = vadd.f32 %v8782_v60, %v757_v42  ;;  %v2506_v42 = vsel %vm119_vm2, %v2505_v19, %v2504_v24  ;;  %v2472_v51 = vsel %vm131_vm8, %v2471_v10, %v2470_v35  ;;  %v2496_v8 = vsel %vm125_vm6, %v2495_v40, %v2494_v48  ;;  %v1016_v10 = vld [vmem:[%s11069_s1 + $0x2b] sm:$0x1]  ;;  %v1022_v19 = vld [vmem:[%s11069_s1 + $0x5b] sm:$0x1]  ;;  %v1027_v31 = vld [vmem:[%s11069_s1 + $0x83] sm:$0x1] }
  0xff   :  { %v2508_v61 = vsel %vm122_vm5, %v2507_v37, %v2506_v42  ;;  %v2474_v12 = vsel %vm134_vm9, %v2473_v16, %v2472_v51  ;;  %v2499_v13 = vrot.slane %v9188_v39, 2  ;;  %v3042_v14 = vsel %vm119_vm2, %v3041_v50, %v3040_v56  ;;  %v552_v33 = vld [vmem:[%s11069_s1 + $0xf9] sm:$0x1]  ;;  %v1023_v39 = vld [vmem:[%s11069_s1 + $0x63] sm:$0x1] }
 0x100   :  { %7007 = vmatprep.mubr.msk.f32.mxu1 %vm2031_vm11, %v9091_v47  ;;  %v2510_v16 = vsel %vm125_vm6, %v2509_v58, %v2508_v61  ;;  %v3055_v22 = vrot.slane %v1021_v4, 6  ;;  %v3067_v24 = vrot.slane %v1028_v6, 7  ;;  %v2498_v28 = vsel %vm128_vm7, %v2497_v59, %v2496_v8  ;;  %v1030_v42 = vld [vmem:[%s11069_s1 + $0x9b] sm:$0x1]  ;;  %v1037_v48 = vld [vmem:[%s11069_s1 + $0xd3] sm:$0x1] }
 0x101   :  { %7008 = vmatmul.mubr.msk.f32.gmra.mrb[20].mxu1 %vm2031_vm11, %v9084_v41  ;;  %v3045_v29 = vrot.slane %v1015_v54, 4  ;;  %v3054_v30 = vsel %vm116_vm1, %v3053_v5, %v1019_v11  ;;  %v3044_v36 = vsel %vm122_vm5, %v3043_v63, %v3042_v14  ;;  %v3047_v1 = vrot.slane %v1016_v10, 3  ;;  %v1017_v50 = vld [vmem:[%s11069_s1 + $0x33] sm:$0x1]  ;;  %v1035_v54 = vld [vmem:[%s11069_s1 + $0xc3] sm:$0x1] }
 0x102   :  { %7012 = vmatprep.mubr.msk.f32.mxu1 %vm2227_vm12, %v9056_v15  ;;  %v2513_v37 = vrot.slane %v551_v17, 2  ;;  %v3057_v40 = vrot.slane %v1022_v19, 5  ;;  %v3069_v9 = vrot.slane %v1029_v23, 6  ;;  %v9301_v57 = vld [vmem:[%s11069_s1 + $0x3b] sm:$0x1]  ;;  %v3059_v61 = vrot.slane %v1023_v39, 4 }
 0x103   :  { %v3046_v51 = vsel %vm125_vm6, %v3045_v29, %v3044_v36  ;;  %v1024_v59 = vld [vmem:[%s11069_s1 + $0x6b] sm:$0x1]  ;;  %v1031_v4 = vld [vmem:[%s11069_s1 + $0xa3] sm:$0x1]  ;;  %v3071_v5 = vrot.slane %v1030_v42, 5  ;;  %v3083_v63 = vrot.slane %v1037_v48, 6 }
 0x104   :  { %v6874_v25 = vpop.f32.mrb[2].mxu1  ;;  %v1038_v10 = vld [vmem:[%s11069_s1 + $0xdb] sm:$0x1]  ;;  %v9325_v14 = vld [vmem:[%s11068_s4 + $0x20] sm:$0xf]  ;;  %v3073_v23 = vrot.slane %v1031_v4, 4 }
 0x105   :  { %v502_v32 = vpop.f32.mrb[3].mxu1  ;;  %7013 = vmatmul.mubr.msk.f32.vlgmr.msra.gmra.mrb[18].mxu1 %vm2227_vm12, %v9114_v0  ;;  %v508_v3 = vadd.f32 %v6874_v25, %v8782_v60  ;;  %v1039_v29 = vld [vmem:[%s11069_s1 + $0xe3] sm:$0x1]  ;;  %v1258_v36 = vld [vmem:[%s11069_s1 + $0x14] sm:$0x1] }
 0x106   :  { %v503_v2 = vadd.f32 %v8782_v60, %v502_v32  ;;  %7015 = vmatprep.mubr.msk.f32.mxu1 %vm2227_vm12, %v9143_v20  ;;  %7019 = vmatpush3.msra.mxu1 %v8827_v26  ;;  %v2482_v26 = vsel %vm125_vm6, %v2481_v43, %v2480_v27  ;;  %v2501_v43 = vrot.slane %v9206_v46, 1  ;;  %v1036_v32 = vld [vmem:[%s11069_s1 + $0xcb] sm:$0x1]  ;;  %v3068_v46 = vsel %vm116_vm1, %v3067_v24, %v1027_v31  ;;  %v9381_v42 = vld [vmem:[%s11069_s1 + $0xbb] sm:$0x1] }
 0x107   :  { %7026 = vmatprep.subr.msk.mxu1 %vm187_vm0, %v8978_v52  ;;  %v2484_v44 = vsel %vm128_vm7, %v2483_v38, %v2482_v26  ;;  %v2512_v38 = vsel %vm128_vm7, %v2511_v18, %v2510_v16  ;;  %v3056_v26 = vsel %vm119_vm2, %v3055_v22, %v3054_v30  ;;  %v3081_v49 = vrot.slane %v1036_v32, 7  ;;  %v1257_v18 = vld [vmem:[%s11069_s1 + $0xc] sm:$0x1]  ;;  %v1032_v22 = vld [vmem:[%s11069_s1 + $0xab] sm:$0x1] }
 0x108   :  { %6956 = vmatprep.mubr.msk.f32.mxu0 %vm2031_vm11, %v503_v2  ;;  %v2486_v27 = vsel %vm131_vm8, %v2485_v53, %v2484_v44  ;;  %v2515_v53 = vrot.slane %v552_v33, 1  ;;  %v2514_v58 = vsel %vm131_vm8, %v2513_v37, %v2512_v38  ;;  %v9314_v44 = vld [vmem:[%s11069_s1 + $0x73] sm:$0x1]  ;;  %v3070_v8 = vsel %vm119_vm2, %v3069_v9, %v3068_v46  ;;  %v1265_v38 = vld [vmem:[%s11069_s1 + $0x4c] sm:$0x1] }
 0x109   :  { %6957 = vmatmul.mubr.msk.f32.vlgmr.msra.gmra.mrb[14].mxu0 %vm2031_vm11, %v508_v3  ;;  %7016 = vmatmul.mubr.msk.f32.gmra.mrb[20].mxu1 %vm2227_vm12, %v9167_v34  ;;  %v2500_v3 = vsel %vm131_vm8, %v2499_v13, %v2498_v28  ;;  %v2488_v56 = vsel %vm134_vm9, %v2487_v7, %v2486_v27  ;;  %v3058_v7 = vsel %vm122_vm5, %v3057_v40, %v3056_v26  ;;  %v3049_v13 = vrot.slane %v1017_v50, 2  ;;  %v1033_v32 = vld [vmem:[%s11069_s1 + $0xb3] sm:$0x1]  ;;  %v9401_v50 = vld [vmem:[%s11068_s4 + $0x24] sm:$0xff] }
 0x10a   :  { %6963 = vmatpush3.msk.msra.mxu0 %vm187_vm0, %v8978_v52  ;;  %v2502_v6 = vsel %vm134_vm9, %v2501_v43, %v2500_v3  ;;  %v3082_v17 = vsel %vm116_vm1, %v3081_v49, %v1035_v54  ;;  %v2516_v43 = vsel %vm134_vm9, %v2515_v53, %v2514_v58  ;;  %v3061_v16 = vrot.slane %v1024_v59, 3  ;;  %v1040_v3 = vld [vmem:[%s11069_s1 + $0xeb] sm:$0x1]  ;;  %v9395_v48 = vld [vmem:[%s11069_s1 + $0xf3] sm:$0x1] }
 0x10b   :  { %6970 = vmatprep.subr.mxu0 %v9198_v45  ;;  %v3060_v27 = vsel %vm125_vm6, %v3059_v61, %v3058_v7  ;;  %v3072_v28 = vsel %vm122_vm5, %v3071_v5, %v3070_v8  ;;  %v3085_v30 = vrot.slane %v1038_v10, 5  ;;  %v3051_v31 = vrot.slane %v9301_v57, 1  ;;  %v9413_v54 = vld [vmem:[%s11069_s1 + $0x24] sm:$0x1]  ;;  %v1266_v57 = vld [vmem:[%s11069_s1 + $0x54] sm:$0x1] }
 0x10c   :  { %v6877_v21 = vpop.f32.mrb[4].mxu1  ;;  %v3063_v33 = vrot.slane %v9314_v44, 2  ;;  %v3075_v37 = vrot.slane %v1032_v22, 3  ;;  %v3062_v40 = vsel %vm128_vm7, %v3061_v16, %v3060_v27  ;;  %v3074_v9 = vsel %vm125_vm6, %v3073_v23, %v3072_v28  ;;  %v1264_v7 = vld [vmem:[%s11069_s1 + $0x44] sm:$0x1] }
 0x10d   :  { %v512_v25 = vpop.f32.mrb[5].mxu1  ;;  %v518_v2 = vadd.f32 %v6877_v21, %v8782_v60  ;;  %v3087_v26 = vrot.slane %v1039_v29, 4  ;;  %v3077_v53 = vrot.slane %v1033_v32, 2  ;;  %v3698_v58 = vrot.slane %v1265_v38, 7  ;;  %v1281_v8 = vld [vmem:[%s11069_s1 + $0xcc] sm:$0x1] }
 0x10e   :  { %v513_v35 = vadd.f32 %v8782_v60, %v512_v25  ;;  %v9347_v25 = vld [vmem:[%s11069_s1 + $0x7b] sm:$0x1]  ;;  %v3064_v4 = vsel %vm131_vm8, %v3063_v33, %v3062_v40  ;;  %v3076_v5 = vsel %vm128_vm7, %v3075_v37, %v3074_v9  ;;  %v3089_v44 = vrot.slane %v1040_v3, 3  ;;  %v1267_v16 = vld [vmem:[%s11069_s1 + $0x5c] sm:$0x1] }
 0x10f   :  { %v3065_v46 = vrot.slane %v9347_v25, 1  ;;  %v3700_v22 = vrot.slane %v1266_v57, 6  ;;  %v1272_v23 = vld [vmem:[%s11069_s1 + $0x84] sm:$0x1]  ;;  %v3078_v25 = vsel %vm131_vm8, %v3077_v53, %v3076_v5  ;;  %v3091_v27 = vrot.slane %v9395_v48, 2 }
 0x110   :  { %6959 = vmatprep.mubr.msk.f32.mxu0 %vm2031_vm11, %v513_v35  ;;  %v3084_v35 = vsel %vm119_vm2, %v3083_v63, %v3082_v17  ;;  %v1274_v17 = vld [vmem:[%s11069_s1 + $0x94] sm:$0x1]  ;;  %v3699_v28 = vsel %vm116_vm1, %v3698_v58, %v1264_v7  ;;  %v1280_v33 = vld [vmem:[%s11069_s1 + $0xc4] sm:$0x1]  ;;  %v1283_v3 = vld [vmem:[%s11069_s1 + $0xdc] sm:$0x1] }
 0x111   :  { %6960 = vmatmul.mubr.msk.f32.gmra.mrb[16].mxu0 %vm2031_vm11, %v518_v2  ;;  %v1256_v2 = vld [vmem:[%s11069_s1 + $0x4] sm:$0x1]  ;;  %v3086_v49 = vsel %vm122_vm5, %v3085_v30, %v3084_v35  ;;  %v1282_v29 = vld [vmem:[%s11069_s1 + $0xd4] sm:$0x1]  ;;  %v3726_v30 = vrot.slane %v1281_v8, 7  ;;  %v3690_v35 = vrot.slane %v9413_v54, 4  ;;  %v3701_v9 = vsel %vm119_vm2, %v3700_v22, %v3699_v28 }
 0x112   :  { %6964 = vmatprep.mubr.msk.f32.mxu0 %vm2227_vm12, %v2474_v12  ;;  %v3048_v12 = vsel %vm128_vm7, %v3047_v1, %v3046_v51  ;;  %v3684_v1 = vrot.slane %v1257_v18, 7  ;;  %v3686_v51 = vrot.slane %v1258_v36, 6  ;;  %v1275_v36 = vld [vmem:[%s11069_s1 + $0x9c] sm:$0x1]  ;;  %v1268_v38 = vld [vmem:[%s11069_s1 + $0x64] sm:$0x1] }
 0x113   :  { %v3050_v39 = vsel %vm131_vm8, %v3049_v13, %v3048_v12  ;;  %v9444_v12 = vld [vmem:[%s11069_s1 + $0x2c] sm:$0x1]  ;;  %v9515_v48 = vld [vmem:[%s11069_s1 + $0x3c] sm:$0x1]  ;;  %v1284_v5 = vld [vmem:[%s11069_s1 + $0xe4] sm:$0x1] }
 0x114   :  { %v6894_v11 = vpop.f32.mrb[6].mxu1  ;;  %v9420_v61 = vsel %vm134_vm9, %v3051_v31, %v3050_v39  ;;  %v9479_v31 = vsel %vm134_vm9, %v3065_v46, %v3064_v4  ;;  %v3702_v39 = vrot.slane %v1267_v16, 5  ;;  %v1269_v54 = vld [vmem:[%s11069_s1 + $0x6c] sm:$0x1] }
 0x115   :  { %v9332_v19 = vadd.f32 %v6894_v11, %v8782_v60  ;;  %v992_v21 = vpop.f32.mrb[7].mxu1  ;;  %6965 = vmatmul.mubr.msk.f32.vlgmr.msra.gmra.mrb[14].mxu0 %vm2227_vm12, %v2488_v56  ;;  %v3685_v56 = vsel %vm116_vm1, %v3684_v1, %v1256_v2  ;;  %v3088_v11 = vsel %vm125_vm6, %v3087_v26, %v3086_v49  ;;  %v3714_v1 = vrot.slane %v1274_v17, 6  ;;  %v9529_v57 = vld [vmem:[%s11068_s4 + $0x2c] sm:$0xf] }
 0x116   :  { %v9340_v24 = vadd.f32 %v8782_v60, %v992_v21  ;;  %6971 = vmatpush3.msra.mxu0 %v9198_v45  ;;  %6967 = vmatprep.mubr.msk.f32.mxu0 %vm2227_vm12, %v2502_v6  ;;  %v9427_v6 = vld [vmem:[%s11069_s1 + $0xfb] sm:$0x1]  ;;  %v3090_v32 = vsel %vm128_vm7, %v3089_v44, %v3088_v11  ;;  %v3728_v26 = vrot.slane %v1282_v29, 6  ;;  %v3703_v4 = vsel %vm122_vm5, %v3702_v39, %v3701_v9  ;;  %v1502_v44 = vld [vmem:[%s11069_s1 + $0xd] sm:$0x1] }
 0x117   :  { %6978 = vmatprep.subr.msk.mxu0 %vm187_vm0, %v9325_v14  ;;  %v3093_v37 = vrot.slane %v9427_v6, 1  ;;  %v3092_v46 = vsel %vm131_vm8, %v3091_v27, %v3090_v32  ;;  %v3730_v6 = vrot.slane %v1283_v3, 5  ;;  %v3696_v17 = vrot.slane %v9515_v48, 1  ;;  %v1503_v27 = vld [vmem:[%s11069_s1 + $0x15] sm:$0x1] }
 0x118   :  { %7020 = vmatprep.mubr.msk.f32.mxu1 %vm2031_vm11, %v9340_v24  ;;  %v1501_v32 = vld [vmem:[%s11069_s1 + $0x5] sm:$0x1]  ;;  %v1286_v39 = vld [vmem:[%s11069_s1 + $0xf4] sm:$0x1]  ;;  %v9626_v3 = vld [vmem:[%s11069_s1 + $0xfc] sm:$0x1] }
 0x119   :  { %7021 = vmatmul.mubr.msk.f32.vlgmr.msra.gmra.mrb[18].mxu1 %vm2031_vm11, %v9332_v19  ;;  %6968 = vmatmul.mubr.msk.f32.gmra.mrb[16].mxu0 %vm2227_vm12, %v2516_v43  ;;  %v3079_v43 = vrot.slane %v9381_v42, 1  ;;  %v9549_v8 = vsel %vm134_vm9, %v3093_v37, %v3092_v46  ;;  %v1509_v48 = vld [vmem:[%s11069_s1 + $0x45] sm:$0x1] }
 0x11a   :  { %7027 = vmatpush3.msk.msra.mxu1 %vm187_vm0, %v8978_v52  ;;  %6972 = vmatprep.mubr.msk.f32.mxu0 %vm2031_vm11, %v8993_v62  ;;  %v1259_v52 = vld [vmem:[%s11069_s1 + $0x1c] sm:$0x1]  ;;  %v1273_v62 = vld [vmem:[%s11069_s1 + $0x8c] sm:$0x1] }
 0x11b   :  { %7034 = vmatprep.subr.mxu1 %v9198_v45  ;;  %v3688_v13 = vrot.slane %v1259_v52, 5  ;;  %v3712_v18 = vrot.slane %v1273_v62, 7  ;;  %v9502_v42 = vsel %vm134_vm9, %v3079_v43, %v3078_v25  ;;  %v3716_v52 = vrot.slane %v1275_v36, 5 }
 0x11c   :  { %v6897_v59 = vpop.f32.mrb[8].mxu1  ;;  %v3706_v43 = vrot.slane %v1269_v54, 3  ;;  %v3732_v25 = vrot.slane %v1284_v5, 4  ;;  %v1519_v54 = vld [vmem:[%s11069_s1 + $0x95] sm:$0x1] }
 0x11d   :  { %v9436_v10 = vadd.f32 %v6897_v59, %v8782_v60  ;;  %v1002_v63 = vpop.f32.mrb[9].mxu1  ;;  %6973 = vmatmul.mubr.msk.f32.vlgmr.msra.gmra.mrb[14].mxu0 %vm2031_vm11, %v8985_v55  ;;  %v3687_v55 = vsel %vm119_vm2, %v3686_v51, %v3685_v56  ;;  %v3713_v40 = vsel %vm116_vm1, %v3712_v18, %v1272_v23  ;;  %v3727_v51 = vsel %vm116_vm1, %v3726_v30, %v1280_v33  ;;  %v9567_v18 = vld [vmem:[%s11069_s1 + $0x7c] sm:$0x1]  ;;  %v1285_v23 = vld [vmem:[%s11069_s1 + $0xec] sm:$0x1] }
 0x11e   :  { %v9450_v21 = vadd.f32 %v8782_v60, %v1002_v63  ;;  %6979 = vmatpush3.msk.msra.mxu0 %vm187_vm0, %v9325_v14  ;;  %6975 = vmatprep.mubr.msk.f32.mxu0 %vm2031_vm11, %v9091_v47  ;;  %v9470_v47 = vld [vmem:[%s11069_s1 + $0x34] sm:$0x1]  ;;  %v3689_v2 = vsel %vm122_vm5, %v3688_v13, %v3687_v55  ;;  %v3704_v56 = vrot.slane %v1268_v38, 4  ;;  %v3715_v58 = vsel %vm119_vm2, %v3714_v1, %v3713_v40  ;;  %v1277_v63 = vld [vmem:[%s11069_s1 + $0xac] sm:$0x1] }
 0x11f   :  { %6986 = vmatprep.subr.mxu0 %v9401_v50  ;;  %v3694_v49 = vrot.slane %v9470_v47, 2  ;;  %v3691_v53 = vsel %vm125_vm6, %v3690_v35, %v3689_v2  ;;  %v9572_v55 = vld [vmem:[%s11069_s1 + $0xb4] sm:$0x1]  ;;  %v3717_v16 = vsel %vm122_vm5, %v3716_v52, %v3715_v58  ;;  %v3970_v47 = vrot.slane %v1502_v44, 7  ;;  %v1510_v35 = vld [vmem:[%s11069_s1 + $0x4d] sm:$0x1] }
 0x120   :  { %7023 = vmatprep.mubr.msk.f32.mxu1 %vm2031_vm11, %v9450_v21  ;;  %v3705_v22 = vsel %vm125_vm6, %v3704_v56, %v3703_v4  ;;  %v3720_v29 = vrot.slane %v1277_v63, 3  ;;  %v3710_v1 = vrot.slane %v9567_v18, 1  ;;  %v3722_v37 = vrot.slane %v9572_v55, 2  ;;  %v1518_v2 = vld [vmem:[%s11069_s1 + $0x8d] sm:$0x1]  ;;  %v7528_v18 = vld [vmem:[%s11068_s4] sm:$0xff] }
 0x121   :  { %7024 = vmatmul.mubr.msk.f32.gmra.mrb[20].mxu1 %vm2031_vm11, %v9436_v10  ;;  %6976 = vmatmul.mubr.msk.f32.gmra.mrb[16].mxu0 %vm2031_vm11, %v9084_v41  ;;  %v3692_v41 = vrot.slane %v9444_v12, 3  ;;  %v3729_v12 = vsel %vm119_vm2, %v3728_v26, %v3727_v51  ;;  %v3707_v38 = vsel %vm128_vm7, %v3706_v43, %v3705_v22  ;;  %v1504_v40 = vld [vmem:[%s11069_s1 + $0x1d] sm:$0x1]  ;;  %v3971_v46 = vsel %vm116_vm1, %v3970_v47, %v1501_v32  ;;  %v9656_v58 = vld [vmem:[%s11070_s3] ss:$0 sm:$0xff] }
 0x122   :  { %7028 = vmatprep.mubr.msk.f32.mxu1 %vm2227_vm12, %v9420_v61  ;;  %6980 = vmatprep.mubr.msk.f32.mxu0 %vm2227_vm12, %v9056_v15  ;;  %v1276_v15 = vld [vmem:[%s11069_s1 + $0xa4] sm:$0x1]  ;;  %v3731_v30 = vsel %vm122_vm5, %v3730_v6, %v3729_v12  ;;  %v3998_v56 = vrot.slane %v1518_v2, 7  ;;  %v3736_v4 = vrot.slane %v1286_v39, 2  ;;  %v1505_v5 = vld [vmem:[%s11069_s1 + $0x25] sm:$0x1] }
 0x123   :  { %v3718_v11 = vrot.slane %v1276_v15, 4  ;;  %v3693_v13 = vsel %vm128_vm7, %v3692_v41, %v3691_v53  ;;  %v3972_v41 = vrot.slane %v1503_v27, 6  ;;  %v3733_v26 = vsel %vm125_vm6, %v3732_v25, %v3731_v30  ;;  %v1517_v44 = vld [vmem:[%s11069_s1 + $0x85] sm:$0x1]  ;;  %v1512_v12 = vld [vmem:[%s11069_s1 + $0x5d] sm:$0x1] }
 0x124   :  { %v6904_v62 = vpop.f32.mrb[6].mxu0  ;;  %v3695_v36 = vsel %vm131_vm8, %v3694_v49, %v3693_v13  ;;  %v1511_v49 = vld [vmem:[%s11069_s1 + $0x55] sm:$0x1]  ;;  %v3984_v15 = vrot.slane %v1510_v35, 7  ;;  %v3974_v6 = vrot.slane %v1504_v40, 5  ;;  %v4000_v55 = vrot.slane %v1519_v54, 6 }
 0x125   :  { %7029 = vmatmul.mubr.msk.f32.vlgmr.msra.gmra.mrb[18].mxu1 %vm2227_vm12, %v9479_v31  ;;  %v1237_v59 = vpop.f32.mrb[7].mxu0  ;;  %6981 = vmatmul.mubr.msk.f32.vlgmr.msra.gmra.mrb[14].mxu0 %vm2227_vm12, %v9114_v0  ;;  %v1270_v0 = vld [vmem:[%s11069_s1 + $0x74] sm:$0x1]  ;;  %v9587_v28 = vadd.f32 %v6904_v62, %v8782_v60  ;;  %v3719_v33 = vsel %vm125_vm6, %v3718_v11, %v3717_v16  ;;  %v9642_v62 = vsel %vm134_vm9, %v3696_v17, %v3695_v36  ;;  %v3986_v13 = vrot.slane %v1511_v49, 6  ;;  %v1520_v43 = vld [vmem:[%s11069_s1 + $0x9d] sm:$0x1] }
 0x126   :  { %7031 = vmatprep.mubr.msk.f32.mxu1 %vm2227_vm12, %v9502_v42  ;;  %v9546_v7 = vadd.f32 %v8782_v60, %v1237_v59  ;;  %7035 = vmatpush3.msra.mxu1 %v9198_v45  ;;  %v3721_v53 = vsel %vm128_vm7, %v3720_v29, %v3719_v33  ;;  %v3973_v11 = vsel %vm119_vm2, %v3972_v41, %v3971_v46  ;;  %v1527_v16 = vld [vmem:[%s11069_s1 + $0xd5] sm:$0x1]  ;;  %v1506_v25 = vld [vmem:[%s11069_s1 + $0x2d] sm:$0x1]  ;;  %v3976_v27 = vrot.slane %v1505_v5, 4 }
 0x127   :  { %6987 = vmatpush3.msra.mxu0 %v9401_v50  ;;  %7042 = vmatprep.subr.msk.mxu1 %vm187_vm0, %v9325_v14  ;;  %v3723_v17 = vsel %vm131_vm8, %v3722_v37, %v3721_v53  ;;  %v3999_v47 = vsel %vm116_vm1, %v3998_v56, %v1517_v44  ;;  %v1513_v32 = vld [vmem:[%s11069_s1 + $0x65] sm:$0x1]  ;;  %v3988_v35 = vrot.slane %v1512_v12, 5  ;;  %v4002_v33 = vrot.slane %v1520_v43, 5  ;;  %v1522_v49 = vld [vmem:[%s11069_s1 + $0xad] sm:$0x1] }
 0x128   :  { %6983 = vmatprep.mubr.msk.f32.mxu0 %vm2227_vm12, %v9143_v20  ;;  %6994 = vmatprep.subr.msk.mxu0 %vm187_vm0, %v9529_v57  ;;  %v3708_v20 = vrot.slane %v1270_v0, 2  ;;  %v4014_v37 = vrot.slane %v1527_v16, 6  ;;  %v4001_v39 = vsel %vm119_vm2, %v4000_v55, %v3999_v47  ;;  %v3990_v46 = vrot.slane %v1513_v32, 4  ;;  %v1515_v5 = vld [vmem:[%s11069_s1 + $0x75] sm:$0x1] }
 0x129   :  { %7032 = vmatmul.mubr.msk.f32.gmra.mrb[20].mxu1 %vm2227_vm12, %v9549_v8  ;;  %6984 = vmatmul.mubr.msk.f32.gmra.mrb[16].mxu0 %vm2227_vm12, %v9167_v34  ;;  %v9609_v34 = vld [vmem:[%s11069_s1 + $0xbc] sm:$0x1]  ;;  %v4003_v54 = vsel %vm122_vm5, %v4002_v33, %v4001_v39  ;;  %v7529_v44 = vld [vmem:[%s11068_s4 + $0x8] sm:$0xf]  ;;  %v1530_v12 = vld [vmem:[%s11069_s1 + $0xed] sm:$0x1] }
 0x12a   :  { %7036 = vmatprep.mubr.msk.f32.mxu1 %vm2031_vm11, %v9546_v7  ;;  %6988 = vmatprep.mubr.msk.f32.mxu0 %vm2031_vm11, %v9340_v24  ;;  %v3734_v24 = vrot.slane %v1285_v23, 3  ;;  %v3724_v0 = vrot.slane %v9609_v34, 1  ;;  %v3738_v23 = vrot.slane %v9626_v3, 1  ;;  %v3994_v43 = vrot.slane %v1515_v5, 2  ;;  %v1524_v55 = vld [vmem:[%s11069_s1 + $0xbd] sm:$0x1] }
 0x12b   :  { %v4010_v33 = vrot.slane %v1524_v55, 1 }
 0x12c   :  { %v6907_v9 = vpop.f32.mrb[8].mxu0  ;;  %v3735_v63 = vsel %vm128_vm7, %v3734_v24, %v3733_v26  ;;  %v9719_v36 = vsel %vm134_vm9, %v3724_v0, %v3723_v17  ;;  %v1514_v26 = vld [vmem:[%s11069_s1 + $0x6d] sm:$0x1] }
 0x12d   :  { %v9637_v52 = vadd.f32 %v6907_v9, %v8782_v60  ;;  %v1247_v51 = vpop.f32.mrb[9].mxu0  ;;  %7037 = vmatmul.mubr.msk.f32.vlgmr.msra.gmra.mrb[18].mxu1 %vm2031_vm11, %v9587_v28  ;;  %6989 = vmatmul.mubr.msk.f32.vlgmr.msra.gmra.mrb[14].mxu0 %vm2031_vm11, %v9332_v19  ;;  %v1526_v60 = vld [vmem:[%s11069_s1 + $0xcd] sm:$0x1]  ;;  %v3709_v19 = vsel %vm131_vm8, %v3708_v20, %v3707_v38  ;;  %v1525_v20 = vld [vmem:[%s11069_s1 + $0xc5] sm:$0x1]  ;;  %v3737_v30 = vsel %vm131_vm8, %v3736_v4, %v3735_v63  ;;  %v3978_v38 = vrot.slane %v1506_v25, 3 }
 0x12e   :  { %v9659_v59 = vadd.f32 %v9656_v58, %v1247_v51  ;;  %7043 = vmatpush3.msk.msra.mxu1 %vm187_vm0, %v9325_v14  ;;  %6995 = vmatpush3.msk.msra.mxu0 %vm187_vm0, %v9529_v57  ;;  %v4012_v22 = vrot.slane %v1526_v60, 7  ;;  %v9709_v29 = vsel %vm134_vm9, %v3710_v1, %v3709_v19  ;;  %v1521_v1 = vld [vmem:[%s11069_s1 + $0xa5] sm:$0x1]  ;;  %v9733_v41 = vsel %vm134_vm9, %v3738_v23, %v3737_v30  ;;  %v1507_v9 = vld [vmem:[%s11069_s1 + $0x35] sm:$0x1] }
 0x12f   :  { %6991 = vmatprep.mubr.msk.f32.mxu0 %vm2031_vm11, %v9450_v21  ;;  %7050 = vmatprep.subr.mxu1 %v9401_v50  ;;  %v3985_v21 = vsel %vm116_vm1, %v3984_v15, %v1509_v48  ;;  %v4004_v15 = vrot.slane %v1521_v1, 4  ;;  %v1529_v51 = vld [vmem:[%s11069_s1 + $0xe5] sm:$0x1]  ;;  %v1508_v60 = vld [vmem:[%s11069_s1 + $0x3d] sm:$0x1]  ;;  %v3980_v4 = vrot.slane %v1507_v9, 2 }
 0x130   :  { %7039 = vmatprep.mubr.msk.f32.mxu1 %vm2031_vm11, %v9659_v59  ;;  %7066 = vmatprep.subr.mxu0 %v7528_v18  ;;  %v3987_v34 = vsel %vm119_vm2, %v3986_v13, %v3985_v21  ;;  %v4013_v24 = vsel %vm116_vm1, %v4012_v22, %v1525_v20  ;;  %v1523_v63 = vld [vmem:[%s11069_s1 + $0xb5] sm:$0x1]  ;;  %v4018_v13 = vrot.slane %v1529_v51, 4  ;;  %v1516_v21 = vld [vmem:[%s11069_s1 + $0x7d] sm:$0x1] }
 0x131   :  { %7040 = vmatmul.mubr.msk.f32.gmra.mrb[20].mxu1 %vm2031_vm11, %v9637_v52  ;;  %6992 = vmatmul.mubr.msk.f32.gmra.mrb[16].mxu0 %vm2031_vm11, %v9436_v10  ;;  %v3975_v10 = vsel %vm122_vm5, %v3974_v6, %v3973_v11  ;;  %v4015_v56 = vsel %vm119_vm2, %v4014_v37, %v4013_v24  ;;  %v3992_v6 = vrot.slane %v1514_v26, 3  ;;  %v4006_v11 = vrot.slane %v1522_v49, 3  ;;  %v1531_v25 = vld [vmem:[%s11069_s1 + $0xf5] sm:$0x1]  ;;  %v1747_v9 = vld [vmem:[%s11069_s1 + $0xe] sm:$0x1] }
 0x132   :  { %7044 = vmatprep.mubr.msk.f32.mxu1 %vm2227_vm12, %v9642_v62  ;;  %6996 = vmatprep.mubr.msk.f32.mxu0 %vm2227_vm12, %v9420_v61  ;;  %v1528_v61 = vld [vmem:[%s11069_s1 + $0xdd] sm:$0x1]  ;;  %v3977_v3 = vsel %vm125_vm6, %v3976_v27, %v3975_v10  ;;  %v4020_v27 = vrot.slane %v1530_v12, 3  ;;  %v4022_v37 = vrot.slane %v1531_v25, 2  ;;  %v1748_v26 = vld [vmem:[%s11069_s1 + $0x16] sm:$0x1] }
 0x133   :  { %v4016_v53 = vrot.slane %v1528_v61, 5  ;;  %v3979_v19 = vsel %vm128_vm7, %v3978_v38, %v3977_v3  ;;  %v1532_v61 = vld [vmem:[%s11069_s1 + $0xfd] sm:$0x1]  ;;  %v1755_v49 = vld [vmem:[%s11069_s1 + $0x4e] sm:$0x1] }
 0x134   :  { %v6914_v2 = vpop.f32.mrb[10].mxu1  ;;  %v3981_v22 = vsel %vm131_vm8, %v3980_v4, %v3979_v19  ;;  %v4024_v39 = vrot.slane %v1532_v61, 1  ;;  %v1771_v4 = vld [vmem:[%s11069_s1 + $0xce] sm:$0x1] }
 0x135   :  { %7045 = vmatmul.mubr.msk.f32.vlgmr.msra.gmra.mrb[18].mxu1 %vm2227_vm12, %v9709_v29  ;;  %v1482_v40 = vpop.f32.mrb[11].mxu1  ;;  %6997 = vmatmul.mubr.msk.f32.vlgmr.msra.gmra.mrb[14].mxu0 %vm2227_vm12, %v9479_v31  ;;  %v3989_v31 = vsel %vm122_vm5, %v3988_v35, %v3987_v34  ;;  %v4017_v17 = vsel %vm122_vm5, %v4016_v53, %v4015_v56  ;;  %v3996_v35 = vrot.slane %v1516_v21, 1  ;;  %v1763_v53 = vld [vmem:[%s11069_s1 + $0x8e] sm:$0x1]  ;;  %v4626_v56 = vrot.slane %v1755_v49, 7 }
 0x136   :  { %7047 = vmatprep.mubr.msk.f32.mxu1 %vm2227_vm12, %v9719_v36  ;;  %v9747_v48 = vadd.f32 %v9656_v58, %v1482_v40  ;;  %7051 = vmatpush3.msra.mxu1 %v9401_v50  ;;  %v3991_v0 = vsel %vm125_vm6, %v3990_v46, %v3989_v31  ;;  %v4019_v10 = vsel %vm125_vm6, %v4018_v13, %v4017_v17  ;;  %v4612_v46 = vrot.slane %v1747_v9, 7  ;;  %v1746_v31 = vld [vmem:[%s11069_s1 + $0x6] sm:$0x1]  ;;  %v1772_v21 = vld [vmem:[%s11069_s1 + $0xd6] sm:$0x1] }
 0x137   :  { %7067 = vmatpush3.msra.mxu0 %v7528_v18  ;;  %7058 = vmatprep.subr.msk.mxu1 %vm187_vm0, %v9529_v57  ;;  %v3982_v18 = vrot.slane %v1508_v60, 1  ;;  %v3993_v23 = vsel %vm128_vm7, %v3992_v6, %v3991_v0  ;;  %v4021_v38 = vsel %vm128_vm7, %v4020_v27, %v4019_v10  ;;  %v1751_v6 = vld [vmem:[%s11069_s1 + $0x2e] sm:$0x1]  ;;  %v1762_v13 = vld [vmem:[%s11069_s1 + $0x86] sm:$0x1] }
 0x138   :  { %6999 = vmatprep.mubr.msk.f32.mxu0 %vm2227_vm12, %v9502_v42  ;;  %7074 = vmatprep.subr.msk.mxu0 %vm187_vm0, %v7529_v44  ;;  %v9775_v42 = vadd.f32 %v9656_v58, %v6914_v2  ;;  %v3995_v1 = vsel %vm131_vm8, %v3994_v43, %v3993_v23  ;;  %v4023_v40 = vsel %vm131_vm8, %v4022_v37, %v4021_v38  ;;  %v4654_v43 = vrot.slane %v1771_v4, 7  ;;  %v1770_v23 = vld [vmem:[%s11069_s1 + $0xc6] sm:$0x1]  ;;  %v1759_v37 = vld [vmem:[%s11069_s1 + $0x6e] sm:$0x1] }
 0x139   :  { %7048 = vmatmul.mubr.msk.f32.gmra.mrb[20].mxu1 %vm2227_vm12, %v9733_v41  ;;  %7000 = vmatmul.mubr.msk.f32.gmra.mrb[16].mxu0 %vm2227_vm12, %v9549_v8  ;;  %v4005_v8 = vsel %vm125_vm6, %v4004_v15, %v4003_v54  ;;  %v9819_v34 = vsel %vm134_vm9, %v3982_v18, %v3981_v22  ;;  %v4614_v15 = vrot.slane %v1748_v26, 6  ;;  %v4613_v51 = vsel %vm116_vm1, %v4612_v46, %v1746_v31  ;;  %v1750_v54 = vld [vmem:[%s11069_s1 + $0x26] sm:$0x1]  ;;  %v9997_v49 = vld [vmem:[%s11069_s1 + $0x7e] sm:$0x1] }
 0x13a   :  { %7052 = vmatprep.mubr.msk.f32.mxu1 %vm2031_vm11, %v9747_v48  ;;  %7068 = vmatprep.mubr.msk.f32.mxu0 %vm2031_vm11, %v9546_v7  ;;  %v4008_v7 = vrot.slane %v1523_v63, 2  ;;  %v4007_v30 = vsel %vm128_vm7, %v4006_v11, %v4005_v8  ;;  %v1764_v63 = vld [vmem:[%s11069_s1 + $0x96] sm:$0x1]  ;;  %v4640_v11 = vrot.slane %v1763_v53, 7  ;;  %v9934_v8 = vld [vmem:[%s11069_s1 + $0x3e] sm:$0x1] }
 0x13b   :  { %v4615_v0 = vsel %vm119_vm2, %v4614_v15, %v4613_v51  ;;  %v4618_v17 = vrot.slane %v1750_v54, 4  ;;  %v4642_v22 = vrot.slane %v1764_v63, 6  ;;  %v1774_v26 = vld [vmem:[%s11069_s1 + $0xe6] sm:$0x1]  ;;  %v1768_v51 = vld [vmem:[%s11069_s1 + $0xb6] sm:$0x1] }
 0x13c   :  { %v6917_v16 = vpop.f32.mrb[12].mxu1  ;;  %v4009_v2 = vsel %vm131_vm8, %v4008_v7, %v4007_v30  ;;  %v1758_v7 = vld [vmem:[%s11069_s1 + $0x66] sm:$0x1]  ;;  %v4641_v27 = vsel %vm116_vm1, %v4640_v11, %v1762_v13  ;;  %v10012_v53 = vld [vmem:[%s11069_s1 + $0xbe] sm:$0x1]  ;;  %v4650_v13 = vrot.slane %v1768_v51, 2 }
 0x13d   :  { %v9806_v47 = vadd.f32 %v9656_v58, %v6917_v16  ;;  %v1492_v20 = vpop.f32.mrb[13].mxu1  ;;  %7053 = vmatmul.mubr.msk.f32.vlgmr.msra.gmra.mrb[18].mxu1 %vm2031_vm11, %v9775_v42  ;;  %7069 = vmatmul.mubr.msk.f32.vlgmr.msra.gmra.mrb[18].mxu0 %vm2031_vm11, %v9587_v28  ;;  %v7530_v28 = vld [vmem:[%s11068_s4 + $0xc] sm:$0xff]  ;;  %v9845_v24 = vsel %vm134_vm9, %v4010_v33, %v4009_v2  ;;  %v1765_v16 = vld [vmem:[%s11069_s1 + $0x9e] sm:$0x1]  ;;  %v1766_v33 = vld [vmem:[%s11069_s1 + $0xa6] sm:$0x1] }
 0x13e   :  { %v1493_v32 = vadd.f32 %v9656_v58, %v1492_v20  ;;  %7059 = vmatpush3.msk.msra.mxu1 %vm187_vm0, %v9529_v57  ;;  %7075 = vmatpush3.msk.msra.mxu0 %vm187_vm0, %v7529_v44  ;;  %v9916_v44 = vld [vmem:[%s11069_s1 + $0x36] sm:$0x1]  ;;  %v4620_v20 = vrot.slane %v1751_v6, 3  ;;  %v4644_v61 = vrot.slane %v1765_v16, 5  ;;  %v4632_v2 = vrot.slane %v1758_v7, 4 }
 0x13f   :  { %7071 = vmatprep.mubr.msk.f32.mxu0 %vm2031_vm11, %v9659_v59  ;;  %7082 = vmatprep.subr.mxu0 %v7530_v28  ;;  %v9840_v59 = vsel %vm134_vm9, %v3996_v35, %v3995_v1  ;;  %v4622_v30 = vrot.slane %v9916_v44, 2  ;;  %v4624_v1 = vrot.slane %v9934_v8, 1  ;;  %v4646_v15 = vrot.slane %v1766_v33, 4  ;;  %v1991_v11 = vld [vmem:[%s11069_s1 + $0x7] sm:$0x1] }
 0x140   :  { %7055 = vmatprep.mubr.msk.f32.mxu1 %vm2031_vm11, %v1493_v32  ;;  %v4638_v44 = vrot.slane %v9997_v49, 1  ;;  %v2016_v33 = vld [vmem:[%s11069_s1 + $0xcf] sm:$0x1] }
 0x141   :  { %7056 = vmatmul.mubr.msk.f32.gmra.mrb[20].mxu1 %vm2031_vm11, %v9806_v47  ;;  %7072 = vmatmul.mubr.msk.f32.gmra.mrb[20].mxu0 %vm2031_vm11, %v9637_v52  ;;  %v4940_v49 = vrot.slane %v2016_v33, 7 }
 0x142   :  { %7060 = vmatprep.mubr.msk.f32.mxu1 %vm2227_vm12, %v9819_v34  ;;  %7076 = vmatprep.mubr.msk.f32.mxu0 %vm2227_vm12, %v9642_v62  ;;  %v9862_v62 = vsel %vm134_vm9, %v4024_v39, %v4023_v40  ;;  %v4643_v39 = vsel %vm119_vm2, %v4642_v22, %v4641_v27  ;;  %v1999_v27 = vld [vmem:[%s11069_s1 + $0x47] sm:$0x1] }
 0x143   :  { %v4645_v54 = vsel %vm122_vm5, %v4644_v61, %v4643_v39  ;;  %v2007_v39 = vld [vmem:[%s11069_s1 + $0x87] sm:$0x1] }
 0x144   :  { %v9851_v52 = vpop.f32.mrb[10].mxu0 }
 0x145   :  { %7061 = vmatmul.mubr.msk.f32.vlgmr.msra.gmra.mrb[18].mxu1 %vm2227_vm12, %v9840_v59  ;;  %7077 = vmatmul.mubr.msk.f32.vlgmr.msra.gmra.mrb[18].mxu0 %vm2227_vm12, %v9709_v29  ;;  %v9857_v3 = vpop.f32.mrb[11].mxu0  ;;  %v7531_v29 = vld [vmem:[%s11068_s4 + $0x14] sm:$0xf] }
 0x146   :  { %7063 = vmatprep.mubr.msk.f32.mxu1 %vm2227_vm12, %v9845_v24  ;;  %7083 = vmatpush3.msra.mxu0 %v7530_v28  ;;  %v9972_v28 = vld [vmem:[%s11069_s1 + $0x76] sm:$0x1]  ;;  %v1728_v31 = vadd.f32 %v9656_v58, %v9857_v3  ;;  %v4634_v3 = vrot.slane %v1759_v37, 3 }
 0x147   :  { %7079 = vmatprep.mubr.msk.f32.mxu0 %vm2227_vm12, %v9719_v36  ;;  %7090 = vmatprep.subr.msk.mxu0 %vm187_vm0, %v7531_v29  ;;  %v1749_v36 = vld [vmem:[%s11069_s1 + $0x1e] sm:$0x1] }
 0x148   :  { %v4616_v19 = vrot.slane %v1749_v36, 5  ;;  %v1767_v36 = vld [vmem:[%s11069_s1 + $0xae] sm:$0x1] }
 0x149   :  { %7064 = vmatmul.mubr.msk.f32.gmra.mrb[20].mxu1 %vm2227_vm12, %v9862_v62  ;;  %7080 = vmatmul.mubr.msk.f32.gmra.mrb[20].mxu0 %vm2227_vm12, %v9733_v41  ;;  %v1756_v41 = vld [vmem:[%s11069_s1 + $0x56] sm:$0x1] }
 0x14a   :  { %7084 = vmatprep.mubr.msk.f32.mxu0 %vm2031_vm11, %v9747_v48  ;;  %v1754_v48 = vld [vmem:[%s11069_s1 + $0x46] sm:$0x1]  ;;  %v4628_v12 = vrot.slane %v1756_v41, 6  ;;  %v4617_v55 = vsel %vm122_vm5, %v4616_v19, %v4615_v0  ;;  %v4660_v19 = vrot.slane %v1774_v26, 4  ;;  %v4648_v0 = vrot.slane %v1767_v36, 3 }
 0x14b   :  { %v4627_v18 = vsel %vm116_vm1, %v4626_v56, %v1754_v48  ;;  %v4619_v35 = vsel %vm125_vm6, %v4618_v17, %v4617_v55  ;;  %v1775_v56 = vld [vmem:[%s11069_s1 + $0xee] sm:$0x1]  ;;  %v1993_v48 = vld [vmem:[%s11069_s1 + $0x17] sm:$0x1]  ;;  %v4652_v17 = vrot.slane %v10012_v53, 1 }
 0x14c   :  { %v9898_v60 = vpop.f32.mrb[12].mxu0  ;;  %v4629_v10 = vsel %vm119_vm2, %v4628_v12, %v4627_v18  ;;  %v4647_v12 = vsel %vm125_vm6, %v4646_v15, %v4645_v54  ;;  %v2008_v18 = vld [vmem:[%s11069_s1 + $0x8f] sm:$0x1]  ;;  %v1776_v55 = vld [vmem:[%s11069_s1 + $0xf6] sm:$0x1]  ;;  %v4662_v16 = vrot.slane %v1775_v56, 3 }
 0x14d   :  { %7085 = vmatmul.mubr.msk.f32.vlgmr.msra.gmra.mrb[18].mxu0 %vm2031_vm11, %v9775_v42  ;;  %v9908_v5 = vpop.f32.mrb[13].mxu0  ;;  %v1757_v42 = vld [vmem:[%s11069_s1 + $0x5e] sm:$0x1]  ;;  %v4900_v22 = vrot.slane %v1993_v48, 6  ;;  %v4664_v37 = vrot.slane %v1776_v55, 2 }
 0x14e   :  { %7091 = vmatpush3.msk.msra.mxu0 %vm187_vm0, %v7531_v29  ;;  %7087 = vmatprep.mubr.msk.f32.mxu0 %vm2031_vm11, %v1493_v32  ;;  %v4630_v25 = vrot.slane %v1757_v42, 5  ;;  %v1773_v32 = vld [vmem:[%s11069_s1 + $0xde] sm:$0x1]  ;;  %v1992_v29 = vld [vmem:[%s11069_s1 + $0xf] sm:$0x1] }
 0x14f   :  { %7098 = vmatprep.subr.mxu0 %v9198_v45  ;;  %v4658_v46 = vrot.slane %v1773_v32, 5  ;;  %v4898_v4 = vrot.slane %v1992_v29, 7  ;;  %v2000_v42 = vld [vmem:[%s11069_s1 + $0x4f] sm:$0x1] }
 0x150   :  { %v4631_v40 = vsel %vm122_vm5, %v4630_v25, %v4629_v10  ;;  %v4649_v10 = vsel %vm128_vm7, %v4648_v0, %v4647_v12  ;;  %v1996_v15 = vld [vmem:[%s11069_s1 + $0x2f] sm:$0x1] }
 0x151   :  { %7088 = vmatmul.mubr.msk.f32.gmra.mrb[20].mxu0 %vm2031_vm11, %v9806_v47  ;;  %v4656_v47 = vrot.slane %v1772_v21, 6  ;;  %v4633_v41 = vsel %vm125_vm6, %v4632_v2, %v4631_v40  ;;  %v1733_v21 = vadd.f32 %v9656_v58, %v9851_v52  ;;  %v4899_v52 = vsel %vm116_vm1, %v4898_v4, %v1991_v11  ;;  %v2002_v40 = vld [vmem:[%s11069_s1 + $0x5f] sm:$0x1]  ;;  %v2011_v4 = vld [vmem:[%s11069_s1 + $0xa7] sm:$0x1] }
 0x152   :  { %7092 = vmatprep.mubr.msk.f32.mxu0 %vm2227_vm12, %v9819_v34  ;;  %v4655_v34 = vsel %vm116_vm1, %v4654_v43, %v1770_v23  ;;  %v4635_v43 = vsel %vm128_vm7, %v4634_v3, %v4633_v41  ;;  %v1777_v23 = vld [vmem:[%s11069_s1 + $0xfe] sm:$0x1]  ;;  %v2003_v41 = vld [vmem:[%s11069_s1 + $0x67] sm:$0x1]  ;;  %v4916_v56 = vrot.slane %v2002_v40, 5  ;;  %v4906_v11 = vrot.slane %v1996_v15, 3 }
 0x153   :  { %v4666_v36 = vrot.slane %v1777_v23, 1  ;;  %v2012_v55 = vld [vmem:[%s11069_s1 + $0xaf] sm:$0x1]  ;;  %v2022_v15 = vld [vmem:[%s11069_s1 + $0xff] sm:$0x1] }
 0x154   :  { %v9974_v38 = vpop.f32.mrb[14].mxu1 }
 0x155   :  { %7093 = vmatmul.mubr.msk.f32.vlgmr.msra.gmra.mrb[18].mxu0 %vm2227_vm12, %v9840_v59  ;;  %v9980_v9 = vpop.f32.mrb[15].mxu1  ;;  %v4621_v59 = vsel %vm128_vm7, %v4620_v20, %v4619_v35  ;;  %v2001_v20 = vld [vmem:[%s11069_s1 + $0x57] sm:$0x1]  ;;  %v4926_v35 = vrot.slane %v2008_v18, 7  ;;  %v4918_v18 = vrot.slane %v2003_v41, 4  ;;  %v5054_v41 = vld [vmem:[%s11071_s8 + $0x8] sm:$0xff] }
 0x156   :  { %7099 = vmatpush3.msra.mxu0 %v9198_v45  ;;  %7095 = vmatprep.mubr.msk.f32.mxu0 %vm2227_vm12, %v9845_v24  ;;  %v4657_v45 = vsel %vm119_vm2, %v4656_v47, %v4655_v34  ;;  %v4636_v24 = vrot.slane %v9972_v28, 2  ;;  %v4623_v6 = vsel %vm131_vm8, %v4622_v30, %v4621_v59  ;;  %v4912_v30 = vrot.slane %v2000_v42, 7  ;;  %v2009_v47 = vld [vmem:[%s11069_s1 + $0x97] sm:$0x1]  ;;  %v1995_v28 = vld [vmem:[%s11069_s1 + $0x27] sm:$0x1] }
 0x157   :  { %7106 = vmatprep.subr.msk.mxu0 %vm187_vm0, %v9325_v14  ;;  %v4659_v63 = vsel %vm122_vm5, %v4658_v46, %v4657_v45  ;;  %v4625_v61 = vsel %vm134_vm9, %v4624_v1, %v4623_v6  ;;  %v4901_v1 = vsel %vm119_vm2, %v4900_v22, %v4899_v52  ;;  %v4914_v26 = vrot.slane %v2001_v20, 6  ;;  %v2017_v59 = vld [vmem:[%s11069_s1 + $0xd7] sm:$0x1] }
 0x158   :  { %v4661_v7 = vsel %vm125_vm6, %v4660_v19, %v4659_v63  ;;  %v4637_v34 = vsel %vm131_vm8, %v4636_v24, %v4635_v43  ;;  %v4651_v46 = vsel %vm131_vm8, %v4650_v13, %v4649_v10  ;;  %v4913_v29 = vsel %vm116_vm1, %v4912_v30, %v1999_v27  ;;  %v2015_v24 = vld [vmem:[%s11069_s1 + $0xc7] sm:$0x1]  ;;  %v1997_v63 = vld [vmem:[%s11069_s1 + $0x37] sm:$0x1] }
 0x159   :  { %7096 = vmatmul.mubr.msk.f32.gmra.mrb[20].mxu0 %vm2227_vm12, %v9862_v62  ;;  %v1738_v62 = vadd.f32 %v9656_v58, %v9908_v5  ;;  %v1994_v5 = vld [vmem:[%s11069_s1 + $0x1f] sm:$0x1]  ;;  %v4663_v8 = vsel %vm128_vm7, %v4662_v16, %v4661_v7  ;;  %v4904_v45 = vrot.slane %v1995_v28, 4  ;;  %v4927_v3 = vsel %vm116_vm1, %v4926_v35, %v2007_v39  ;;  %v2005_v27 = vld [vmem:[%s11069_s1 + $0x77] sm:$0x1] }
 0x15a   :  { %7100 = vmatprep.mubr.msk.f32.mxu0 %vm2031_vm11, %v1728_v31  ;;  %v4902_v2 = vrot.slane %v1994_v5, 5  ;;  %v2010_v31 = vld [vmem:[%s11069_s1 + $0x9f] sm:$0x1]  ;;  %v4639_v51 = vsel %vm134_vm9, %v4638_v44, %v4637_v34  ;;  %v4665_v53 = vsel %vm131_vm8, %v4664_v37, %v4663_v8  ;;  %v4653_v19 = vsel %vm134_vm9, %v4652_v17, %v4651_v46  ;;  %v2004_v17 = vld [vmem:[%s11069_s1 + $0x6f] sm:$0x1] }
 0x15b   :  { %v4915_v48 = vsel %vm119_vm2, %v4914_v26, %v4913_v29  ;;  %v4930_v6 = vrot.slane %v2010_v31, 5  ;;  %v2018_v44 = vld [vmem:[%s11069_s1 + $0xdf] sm:$0x1]  ;;  %v4942_v0 = vrot.slane %v2017_v59, 6  ;;  %v4667_v12 = vsel %vm134_vm9, %v4666_v36, %v4665_v53  ;;  %v2019_v5 = vld [vmem:[%s11069_s1 + $0xe7] sm:$0x1] }
 0x15c   :  { %v10054_v25 = vpop.f32.mrb[16].mxu1  ;;  %v4903_v54 = vsel %vm122_vm5, %v4902_v2, %v4901_v1  ;;  %v4917_v43 = vsel %vm122_vm5, %v4916_v56, %v4915_v48  ;;  %v4932_v16 = vrot.slane %v2011_v4, 4  ;;  %v4944_v22 = vrot.slane %v2018_v44, 5  ;;  %v2013_v10 = vld [vmem:[%s11069_s1 + $0xb7] sm:$0x1]  ;;  %v5056_v48 = vld [vmem:[%s11071_s8 + $0x18] sm:$0xff] }
 0x15d   :  { %7101 = vmatmul.mubr.msk.f32.vlgmr.msra.gmra.mrb[18].mxu0 %vm2031_vm11, %v1733_v21  ;;  %v10065_v32 = vpop.f32.mrb[17].mxu1  ;;  %v4905_v13 = vsel %vm125_vm6, %v4904_v45, %v4903_v54  ;;  %v1973_v21 = vadd.f32 %v9656_v58, %v9980_v9  ;;  %v4908_v9 = vrot.slane %v1997_v63, 2  ;;  %v4920_v20 = vrot.slane %v2004_v17, 3  ;;  %v2020_v35 = vld [vmem:[%s11069_s1 + $0xef] sm:$0x1]  ;;  %v5053_v54 = vld [vmem:[%s11071_s8] sm:$0xff] }
 0x15e   :  { %7107 = vmatpush3.msk.msra.mxu0 %vm187_vm0, %v9325_v14  ;;  %7103 = vmatprep.mubr.msk.f32.mxu0 %vm2031_vm11, %v1738_v62  ;;  %v1743_v14 = vadd.f32 %v9656_v58, %v9898_v60  ;;  %v4928_v60 = vrot.slane %v2009_v47, 6  ;;  %v4941_v62 = vsel %vm116_vm1, %v4940_v49, %v2015_v24  ;;  %v4907_v52 = vsel %vm128_vm7, %v4906_v11, %v4905_v13  ;;  %v2021_v26 = vld [vmem:[%s11069_s1 + $0xf7] sm:$0x1]  ;;  %v5051_v13 = vld [vmem:[%s11073_s6] sm:$0xf] }
 0x15f   :  { %7114 = vmatprep.subr.mxu0 %v9401_v50  ;;  %v4943_v7 = vsel %vm119_vm2, %v4942_v0, %v4941_v62  ;;  %v4919_v30 = vsel %vm125_vm6, %v4918_v18, %v4917_v43  ;;  %v4934_v47 = vrot.slane %v2012_v55, 3  ;;  %v4946_v33 = vrot.slane %v2019_v5, 4  ;;  %v5055_v56 = vld [vmem:[%s11071_s8 + $0x10] sm:$0xff] }
 0x160   :  { %v4929_v42 = vsel %vm119_vm2, %v4928_v60, %v4927_v3  ;;  %v4945_v28 = vsel %vm122_vm5, %v4944_v22, %v4943_v7  ;;  %v1978_v2 = vadd.f32 %v9656_v58, %v9974_v38  ;;  %v4909_v39 = vsel %vm131_vm8, %v4908_v9, %v4907_v52  ;;  %v6594_v22 = vld [vmem:[%s11074_s7] ss:$0 sm:$0xff] }
 0x161   :  { %7104 = vmatmul.mubr.msk.f32.gmra.mrb[20].mxu0 %vm2031_vm11, %v1743_v14  ;;  %v4931_v23 = vsel %vm122_vm5, %v4930_v6, %v4929_v42  ;;  %v2006_v14 = vld [vmem:[%s11069_s1 + $0x7f] sm:$0x1]  ;;  %v4922_v8 = vrot.slane %v2005_v27, 2  ;;  %v4921_v1 = vsel %vm128_vm7, %v4920_v20, %v4919_v30  ;;  %v4936_v40 = vrot.slane %v2013_v10, 2 }
 0x162   :  { %7108 = vmatprep.mubr.msk.f32.mxu0 %vm2227_vm12, %v4625_v61  ;;  %v1983_v61 = vadd.f32 %v9656_v58, %v10065_v32  ;;  %v4933_v37 = vsel %vm125_vm6, %v4932_v16, %v4931_v23  ;;  %v2014_v32 = vld [vmem:[%s11069_s1 + $0xbf] sm:$0x1]  ;;  %v4948_v46 = vrot.slane %v2020_v35, 3  ;;  %v4947_v29 = vsel %vm125_vm6, %v4946_v33, %v4945_v28 }
 0x163   :  { %v4935_v38 = vsel %vm128_vm7, %v4934_v47, %v4933_v37  ;;  %v4924_v60 = vrot.slane %v2006_v14, 1  ;;  %v1988_v59 = vadd.f32 %v9656_v58, %v10054_v25  ;;  %v4923_v49 = vsel %vm131_vm8, %v4922_v8, %v4921_v1 }
 0x164   :  { %v4938_v36 = vrot.slane %v2014_v32, 1  ;;  %v4950_v45 = vrot.slane %v2021_v26, 2  ;;  %v4937_v3 = vsel %vm131_vm8, %v4936_v40, %v4935_v38  ;;  %v10222_v4 = vpack.c.bf16 %v5056_v48, %v5055_v56 }
 0x165   :  { %7109 = vmatmul.mubr.msk.f32.vlgmr.msra.gmra.mrb[18].mxu0 %vm2227_vm12, %v4639_v51  ;;  %v4925_v24 = vsel %vm134_vm9, %v4924_v60, %v4923_v49  ;;  %v4952_v51 = vrot.slane %v2022_v15, 1  ;;  %v5058_v6 = vlaneseq }
 0x166   :  { %7115 = vmatpush3.msra.mxu0 %v9401_v50  ;;  %7111 = vmatprep.mubr.msk.f32.mxu0 %vm2227_vm12, %v4653_v19  ;;  %v1998_v50 = vld [vmem:[%s11069_s1 + $0x3f] sm:$0x1]  ;;  %v4939_v58 = vsel %vm134_vm9, %v4938_v36, %v4937_v3  ;;  %v10217_v19 = vpack.c.bf16 %v5054_v41, %v5053_v54 }
 0x167   :  { %7122 = vmatprep.subr.msk.mxu0 %vm187_vm0, %v9529_v57  ;;  %v4910_v34 = vrot.slane %v1998_v50, 1  ;;  %v10229_v0 = vshrl.u32 %v5058_v6, 7 }
 0x168   :  { %7277 = vmatprep.subr.bf16.mxu1 %v10217_v19 }
 0x169   :  { %7112 = vmatmul.mubr.msk.f32.gmra.mrb[20].mxu0 %vm2227_vm12, %v4667_v12  ;;  %v4911_v31 = vsel %vm134_vm9, %v4910_v34, %v4909_v39  ;;  %7279 = vmatpush3.bf16.msra.mxu1 %v10217_v19  ;;  %v5060_v42 = vsub.s32 1, %v10229_v0  ;;  %v10235_v12 = vld [vmem:[%s11072_s5] ss:$0 sm:$0xff]  ;;  %v5138_v17 = vsub.s32 0, %v10229_v0  ;;  %v5078_v16 = vsub.s32 2, %v10229_v0 }
 0x16a   :  { %7116 = vmatprep.mubr.msk.f32.mxu0 %vm2031_vm11, %v1973_v21  ;;  %7281 = vmatprep.subr.bf16.mxu1 %v10222_v4  ;;  %v5090_v41 = vsub.s32 3, %v10229_v0 }
 0x16b   :  { %v10246_v21 = vrot.slane %v5051_v13, %v5060_v42  ;;  %v5139_v43 = vrot.slane %v5051_v13, %v5138_v17  ;;  %v10268_v52 = vrot.slane %v5051_v13, %v5078_v16 }
 0x16d   :  { %7117 = vmatmul.mubr.msk.f32.vlgmr.msra.gmra.mrb[18].mxu0 %vm2031_vm11, %v1978_v2  ;;  %7283 = vmatpush3.bf16.msra.mxu1 %v10222_v4 }
 0x16e   :  { %7123 = vmatpush3.msk.msra.mxu0 %vm187_vm0, %v9529_v57  ;;  %7119 = vmatprep.mubr.msk.f32.mxu0 %vm2031_vm11, %v1983_v61  ;;  %v4949_v57 = vsel %vm128_vm7, %v4948_v46, %v4947_v29 }
 0x16f   :  { %v4951_v25 = vsel %vm131_vm8, %v4950_v45, %v4949_v57  ;;  %7285 = vmatprep.subr.bf16.mxu1 %v10217_v19 }
 0x170   :  { %v4953_v53 = vsel %vm134_vm9, %v4952_v51, %v4951_v25 }
 0x171   :  { %7120 = vmatmul.mubr.msk.f32.gmra.mrb[20].mxu0 %vm2031_vm11, %v1988_v59 }
 0x172   :  { %7124 = vmatprep.mubr.msk.f32.mxu0 %vm2227_vm12, %v4911_v31 }
 0x175   :  { %7125 = vmatmul.mubr.msk.f32.vlgmr.msra.gmra.mrb[18].mxu0 %vm2227_vm12, %v4925_v24 }
 0x176   :  { %7127 = vmatprep.mubr.msk.f32.mxu0 %vm2227_vm12, %v4939_v58 }
 0x179   :  { %7128 = vmatmul.mubr.msk.f32.gmra.mrb[20].mxu0 %vm2227_vm12, %v4953_v53 }
 0x208   :  { %v6998_v44 = vpop.f32.mrb[14].mxu0 }
 0x209   :  { %v3172_v63 = vpop.f32.mrb[15].mxu0  ;;  %v10242_v18 = vadd.f32 %v6998_v44, %v10235_v12  ;;  %v5091_v44 = vrot.slane %v5051_v13, %v5090_v41 }
 0x20a   :  { %v10251_v55 = vadd.f32 %v10235_v12, %v3172_v63 }
 0x20b   :  { %v5063_v5 = vmul.f32 %v10242_v18, %v10246_v21  ;;  %v5141_v50 = vmul.f32 %v10242_v18, %v5139_v43 }
 0x20c   :  { %v7001_v11 = vpop.f32.mrb[16].mxu0  ;;  %v5062_v9 = vmul.f32 %v10251_v55, %v10246_v21  ;;  %v5140_v23 = vmul.f32 %v10251_v55, %v5139_v43 }
 0x20d   :  { %v3182_v62 = vpop.f32.mrb[17].mxu0  ;;  %v10264_v7 = vadd.f32 %v7001_v11, %v10235_v12  ;;  %v5073_v30 = vadd.f32 %v6594_v22, %v5063_v5  ;;  %v5145_v35 = vadd.f32 %v6594_v22, %v5141_v50 }
 0x20e   :  { %v10271_v20 = vadd.f32 %v10235_v12, %v3182_v62  ;;  %v5072_v33 = vadd.f32 %v6594_v22, %v5062_v9  ;;  %v5144_v61 = vadd.f32 %v6594_v22, %v5140_v23 }
 0x20f   :  { %v5065_v37 = vmul.f32 %v10264_v7, %v10246_v21  ;;  %v5143_v28 = vmul.f32 %v10264_v7, %v5139_v43 }
 0x210   :  { %v5064_v14 = vmul.f32 %v10271_v20, %v10246_v21  ;;  %v5142_v8 = vmul.f32 %v10271_v20, %v5139_v43 }
 0x211   :  { %v5075_v49 = vadd.f32 %v6594_v22, %v5065_v37  ;;  %v5147_v36 = vadd.f32 %v6594_v22, %v5143_v28 }
 0x212   :  { %v5074_v3 = vadd.f32 %v6594_v22, %v5064_v14  ;;  %v5146_v57 = vadd.f32 %v6594_v22, %v5142_v8 }
 0x218   :  { %v7062_v27 = vpop.f32.mrb[18].mxu1 }
 0x219   :  { %v10274_v10 = vadd.f32 %v7062_v27, %v10235_v12  ;;  %v4100_v47 = vpop.f32.mrb[19].mxu1 }
 0x21a   :  { %v10277_v34 = vadd.f32 %v10235_v12, %v4100_v47 }
 0x21b   :  { %v5081_v2 = vmul.f32 %v10274_v10, %v10268_v52  ;;  %v5149_v39 = vmul.f32 %v10274_v10, %v10246_v21  ;;  %v5201_v56 = vmul.f32 %v10274_v10, %v5139_v43 }
 0x21c   :  { %v5080_v1 = vmul.f32 %v10277_v34, %v10268_v52  ;;  %v5148_v32 = vmul.f32 %v10277_v34, %v10246_v21  ;;  %v7065_v40 = vpop.f32.mrb[20].mxu1  ;;  %v5200_v48 = vmul.f32 %v10277_v34, %v5139_v43 }
 0x21d   :  { %v5085_v26 = vadd.f32 %v5081_v2, %v5073_v30  ;;  %v5153_v46 = vadd.f32 %v5149_v39, %v5145_v35  ;;  %v10294_v38 = vadd.f32 %v7065_v40, %v10235_v12  ;;  %v4110_v29 = vpop.f32.mrb[21].mxu1  ;;  %v5205_v50 = vadd.f32 %v6594_v22, %v5201_v56 }
 0x21e   :  { %v5084_v31 = vadd.f32 %v5080_v1, %v5072_v33  ;;  %v5152_v60 = vadd.f32 %v5148_v32, %v5144_v61  ;;  %v10297_v59 = vadd.f32 %v10235_v12, %v4110_v29  ;;  %v5204_v9 = vadd.f32 %v6594_v22, %v5200_v48 }
 0x21f   :  { %v5083_v15 = vmul.f32 %v10294_v38, %v10268_v52  ;;  %v5151_v45 = vmul.f32 %v10294_v38, %v10246_v21  ;;  %v5203_v6 = vmul.f32 %v10294_v38, %v5139_v43 }
 0x220   :  { %v5082_v24 = vmul.f32 %v10297_v59, %v10268_v52  ;;  %v5150_v51 = vmul.f32 %v10297_v59, %v10246_v21  ;;  %v5202_v63 = vmul.f32 %v10297_v59, %v5139_v43 }
 0x221   :  { %v5087_v58 = vadd.f32 %v5083_v15, %v5075_v49  ;;  %v5155_v25 = vadd.f32 %v5151_v45, %v5147_v36  ;;  %v5207_v27 = vadd.f32 %v6594_v22, %v5203_v6 }
 0x222   :  { %v5086_v53 = vadd.f32 %v5082_v24, %v5074_v3  ;;  %v5154_v54 = vadd.f32 %v5150_v51, %v5146_v57  ;;  %v5206_v43 = vadd.f32 %v6594_v22, %v5202_v63 }
 0x248   :  { %v7126_v11 = vpop.f32.mrb[18].mxu0 }
 0x249   :  { %v10315_v62 = vadd.f32 %v7126_v11, %v10235_v12  ;;  %v5028_v5 = vpop.f32.mrb[19].mxu0 }
 0x24a   :  { %v10318_v23 = vadd.f32 %v10235_v12, %v5028_v5 }
 0x24b   :  { %v5093_v30 = vmul.f32 %v10315_v62, %v5091_v44  ;;  %v5157_v47 = vmul.f32 %v10315_v62, %v10268_v52  ;;  %v5209_v13 = vmul.f32 %v10315_v62, %v10246_v21 }
 0x24c   :  { %v5092_v35 = vmul.f32 %v10318_v23, %v5091_v44  ;;  %v5156_v33 = vmul.f32 %v10318_v23, %v10268_v52  ;;  %v5208_v61 = vmul.f32 %v10318_v23, %v10246_v21  ;;  %v7129_v37 = vpop.f32.mrb[20].mxu0 }
 0x24d   :  { %v10330_v28 = vadd.f32 %v5093_v30, %v5085_v26  ;;  %v10332_v2 = vadd.f32 %v5157_v47, %v5153_v46  ;;  %v10334_v39 = vadd.f32 %v5209_v13, %v5205_v50  ;;  %v10337_v14 = vadd.f32 %v7129_v37, %v10235_v12  ;;  %v5038_v8 = vpop.f32.mrb[21].mxu0 }
 0x24e   :  { %v10339_v22 = vadd.f32 %v5092_v35, %v5084_v31  ;;  %v10341_v1 = vadd.f32 %v5156_v33, %v5152_v60  ;;  %v10343_v32 = vadd.f32 %v5208_v61, %v5204_v9  ;;  %v10346_v40 = vadd.f32 %v10235_v12, %v5038_v8 }
 0x24f   :  { %v5101_v26 = vmul.f32 %v10330_v28, %v10330_v28  ;;  %v5165_v46 = vmul.f32 %v10332_v2, %v10332_v2  ;;  %v5217_v29 = vmul.f32 %v10334_v39, %v10334_v39  ;;  %v5095_v49 = vmul.f32 %v10337_v14, %v5091_v44 }
 0x250   :  { %v5100_v31 = vmul.f32 %v10339_v22, %v10339_v22  ;;  %v5164_v60 = vmul.f32 %v10341_v1, %v10341_v1  ;;  %v5216_v12 = vmul.f32 %v10343_v32, %v10343_v32  ;;  %v5159_v36 = vmul.f32 %v10337_v14, %v10268_v52 }
 0x251   :  { %v5105_v15 = vmul.f32 %v5101_v26, %v10330_v28  ;;  %v5169_v45 = vmul.f32 %v5165_v46, %v10332_v2  ;;  %v5221_v3 = vmul.f32 %v5217_v29, %v10334_v39  ;;  %v10366_v57 = vadd.f32 %v5095_v49, %v5087_v58 }
 0x252   :  { %v10368_v24 = vadd.f32 %v5159_v36, %v5155_v25  ;;  %v5211_v51 = vmul.f32 %v10337_v14, %v10246_v21  ;;  %v5094_v56 = vmul.f32 %v10346_v40, %v5091_v44  ;;  %v5158_v48 = vmul.f32 %v10346_v40, %v10268_v52 }
 0x253   :  { %v5109_v6 = vmul.f32 0.044715, %v5105_v15  ;;  %v5173_v63 = vmul.f32 0.044715, %v5169_v45  ;;  %v5225_v11 = vmul.f32 0.044715, %v5221_v3  ;;  %v5103_v5 = vmul.f32 %v10366_v57, %v10366_v57 }
 0x254   :  { %v5167_v58 = vmul.f32 %v10368_v24, %v10368_v24  ;;  %v10379_v50 = vadd.f32 %v5211_v51, %v5207_v27  ;;  %v10381_v25 = vadd.f32 %v5094_v56, %v5086_v53  ;;  %v10383_v9 = vadd.f32 %v5158_v48, %v5154_v54 }
 0x255   :  { %v5113_v44 = vadd.f32 %v5109_v6, %v10330_v28  ;;  %v5177_v30 = vadd.f32 %v5173_v63, %v10332_v2  ;;  %v5229_v52 = vadd.f32 %v5225_v11, %v10334_v39  ;;  %v5210_v47 = vmul.f32 %v10346_v40, %v10246_v21 }
 0x256   :  { %v5219_v13 = vmul.f32 %v10379_v50, %v10379_v50  ;;  %v5102_v27 = vmul.f32 %v10381_v25, %v10381_v25  ;;  %v5166_v53 = vmul.f32 %v10383_v9, %v10383_v9  ;;  %v5104_v54 = vmul.f32 %v5100_v31, %v10339_v22 }
 0x257   :  { %v5117_v35 = vmul.f32 0.7978846, %v5113_v44  ;;  %v5181_v33 = vmul.f32 0.7978846, %v5177_v30  ;;  %v5233_v61 = vmul.f32 0.7978846, %v5229_v52  ;;  %v10397_v37 = vadd.f32 %v5210_v47, %v5206_v43 }
 0x258   :  { %v5108_v8 = vmul.f32 0.044715, %v5104_v54  ;;  %v5106_v26 = vmul.f32 %v5102_v27, %v10381_v25  ;;  %v5107_v21 = vmul.f32 %v5103_v5, %v10366_v57  ;;  %v5168_v46 = vmul.f32 %v5164_v60, %v10341_v1 }
 0x259   :  { %7431 = vtanh.f32 %v5117_v35  ;;  %v5218_v29 = vmul.f32 %v10397_v37, %v10397_v37  ;;  %v5170_v49 = vmul.f32 %v5166_v53, %v10383_v9  ;;  %v5171_v31 = vmul.f32 %v5167_v58, %v10368_v24 }
 0x25a   :  { %7433 = vtanh.f32 %v5181_v33  ;;  %v5112_v36 = vadd.f32 %v5108_v8, %v10339_v22  ;;  %v5110_v43 = vmul.f32 0.044715, %v5106_v26  ;;  %v5111_v15 = vmul.f32 0.044715, %v5107_v21 }
 0x25b   :  { %7435 = vtanh.f32 %v5233_v61  ;;  %v5172_v45 = vmul.f32 0.044715, %v5168_v46  ;;  %v5174_v3 = vmul.f32 0.044715, %v5170_v49  ;;  %v5175_v51 = vmul.f32 0.044715, %v5171_v31 }
 0x25c   :  { %v5116_v56 = vmul.f32 0.7978846, %v5112_v36  ;;  %v5114_v60 = vadd.f32 %v5110_v43, %v10381_v25  ;;  %v5115_v48 = vadd.f32 %v5111_v15, %v10366_v57  ;;  %v5220_v6 = vmul.f32 %v5216_v12, %v10343_v32 }
 0x25d   :  { %v5176_v63 = vadd.f32 %v5172_v45, %v10341_v1  ;;  %v5178_v11 = vadd.f32 %v5174_v3, %v10383_v9  ;;  %v5179_v5 = vadd.f32 %v5175_v51, %v10368_v24  ;;  %v5222_v58 = vmul.f32 %v5218_v29, %v10397_v37 }
 0x25e   :  { %7437 = vtanh.f32 %v5116_v56  ;;  %v5118_v44 = vmul.f32 0.7978846, %v5114_v60  ;;  %v5119_v30 = vmul.f32 0.7978846, %v5115_v48  ;;  %v5224_v52 = vmul.f32 0.044715, %v5220_v6 }
 0x25f   :  { %v5180_v47 = vmul.f32 0.7978846, %v5176_v63  ;;  %v5182_v27 = vmul.f32 0.7978846, %v5178_v11  ;;  %v5223_v53 = vmul.f32 %v5219_v13, %v10379_v50  ;;  %v5183_v54 = vmul.f32 0.7978846, %v5179_v5 }
 0x260   :  { %7439 = vtanh.f32 %v5118_v44  ;;  %v5228_v12 = vadd.f32 %v5224_v52, %v10343_v32  ;;  %v5226_v35 = vmul.f32 0.044715, %v5222_v58 }
 0x261   :  { %7441 = vtanh.f32 %v5119_v30  ;;  %v5227_v33 = vmul.f32 0.044715, %v5223_v53 }
 0x262   :  { %7443 = vtanh.f32 %v5180_v47  ;;  %v5232_v61 = vmul.f32 0.7978846, %v5228_v12  ;;  %v5230_v8 = vadd.f32 %v5226_v35, %v10397_v37 }
 0x263   :  { %v7432_v26 = vpop.eup %7431  ;;  %7445 = vtanh.f32 %v5182_v27  ;;  %v5231_v21 = vadd.f32 %v5227_v33, %v10379_v50 }
 0x264   :  { %v7434_v46 = vpop.eup %7433  ;;  %v5125_v29 = vadd.f32 1.0, %v7432_v26  ;;  %7447 = vtanh.f32 %v5183_v54  ;;  %v5234_v49 = vmul.f32 0.7978846, %v5230_v8 }
 0x265   :  { %v7436_v13 = vpop.eup %7435  ;;  %v5189_v31 = vadd.f32 1.0, %v7434_v46  ;;  %7449 = vtanh.f32 %v5232_v61  ;;  %v5235_v36 = vmul.f32 0.7978846, %v5231_v21 }
 0x266   :  { %v5129_v43 = vmul.f32 0.5, %v5125_v29  ;;  %v5241_v15 = vadd.f32 1.0, %v7436_v13  ;;  %7451 = vtanh.f32 %v5234_v49 }
 0x267   :  { %v5193_v45 = vmul.f32 0.5, %v5189_v31  ;;  %7453 = vtanh.f32 %v5235_v36 }
 0x268   :  { %v7438_v3 = vpop.eup %7437  ;;  %v5133_v51 = vmul.f32 %v5129_v43, %v10330_v28  ;;  %v5245_v56 = vmul.f32 0.5, %v5241_v15 }
 0x269   :  { %v5197_v60 = vmul.f32 %v5193_v45, %v10332_v2  ;;  %v5124_v48 = vadd.f32 1.0, %v7438_v3 }
 0x26a   :  { %v7440_v6 = vpop.eup %7439  ;;  %v5249_v63 = vmul.f32 %v5245_v56, %v10334_v39  ;;  %v10422_v11 = vadd.f32 %v10242_v18, %v5133_v51 }
 0x26b   :  { %v7442_v5 = vpop.eup %7441  ;;  %v5128_v58 = vmul.f32 0.5, %v5124_v48  ;;  %v5126_v44 = vadd.f32 1.0, %v7440_v6  ;;  %v10425_v30 = vadd.f32 %v10274_v10, %v5197_v60 }
 0x26c   :  { %v7444_v52 = vpop.eup %7443  ;;  %v10428_v47 = vadd.f32 %v10315_v62, %v5249_v63  ;;  %v5127_v28 = vadd.f32 1.0, %v7442_v5 }
 0x26d   :  { %v7446_v27 = vpop.eup %7445  ;;  %v5132_v2 = vmul.f32 %v5128_v58, %v10339_v22  ;;  %v5130_v53 = vmul.f32 0.5, %v5126_v44  ;;  %v5188_v54 = vadd.f32 1.0, %v7444_v52 }
 0x26e   :  { %v7448_v39 = vpop.eup %7447  ;;  %v5131_v18 = vmul.f32 0.5, %v5127_v28  ;;  %v5190_v12 = vadd.f32 1.0, %v7446_v27 }
 0x26f   :  { %v7450_v35 = vpop.eup %7449  ;;  %v10432_v33 = vadd.f32 %v10251_v55, %v5132_v2  ;;  %v5134_v10 = vmul.f32 %v5130_v53, %v10381_v25  ;;  %v5192_v61 = vmul.f32 0.5, %v5188_v54  ;;  %v5191_v8 = vadd.f32 1.0, %v7448_v39 }
 0x270   :  { %v7452_v62 = vpop.eup %7451  ;;  %v5135_v26 = vmul.f32 %v5131_v18, %v10366_v57  ;;  %v5194_v21 = vmul.f32 0.5, %v5190_v12  ;;  %v5240_v46 = vadd.f32 1.0, %v7450_v35 }
 0x271   :  { %v7454_v22 = vpop.eup %7453  ;;  %7138 = vmatprep.mubr.msk.f32.mxu1 %vm5270_vm13, %v10432_v33  ;;  %v10439_v29 = vadd.f32 %v10271_v20, %v5134_v10  ;;  %v5196_v49 = vmul.f32 %v5192_v61, %v10341_v1  ;;  %v5195_v55 = vmul.f32 0.5, %v5191_v8  ;;  %v5242_v13 = vadd.f32 1.0, %v7452_v62 }
 0x272   :  { %7139 = vmatmul.mubr.msk.f32.vlgmr.msra.gmra.mrb[22].mxu1 %vm5270_vm13, %v10422_v11  ;;  %v10445_v25 = vadd.f32 %v10264_v7, %v5135_v26  ;;  %v5198_v57 = vmul.f32 %v5194_v21, %v10383_v9  ;;  %v5244_v31 = vmul.f32 0.5, %v5240_v46  ;;  %v5243_v36 = vadd.f32 1.0, %v7454_v22 }
 0x273   :  { %7287 = vmatpush3.bf16.msra.mxu1 %v10217_v19  ;;  %7141 = vmatprep.mubr.msk.f32.mxu1 %vm5270_vm13, %v10439_v29  ;;  %v10452_v20 = vadd.f32 %v10277_v34, %v5196_v49  ;;  %v5199_v1 = vmul.f32 %v5195_v55, %v10368_v24  ;;  %v5246_v43 = vmul.f32 0.5, %v5242_v13 }
 0x274   :  { %7289 = vmatprep.subr.bf16.mxu1 %v10222_v4  ;;  %v10457_v7 = vadd.f32 %v10297_v59, %v5198_v57  ;;  %v5248_v9 = vmul.f32 %v5244_v31, %v10343_v32  ;;  %v5247_v15 = vmul.f32 0.5, %v5243_v36  ;;  %v6613_v32 = vld [vmem:[%s11071_s8 + $0x38] sm:$0xff] }
 0x275   :  { %v10461_v45 = vadd.f32 %v10294_v38, %v5199_v1  ;;  %v5250_v3 = vmul.f32 %v5246_v43, %v10397_v37 }
 0x276   :  { %7142 = vmatmul.mubr.msk.f32.gmra.mrb[24].mxu1 %vm5270_vm13, %v10445_v25  ;;  %v10467_v34 = vadd.f32 %v10318_v23, %v5248_v9  ;;  %v5251_v24 = vmul.f32 %v5247_v15, %v10379_v50  ;;  %v6612_v23 = vld [vmem:[%s11071_s8 + $0x30] sm:$0xff]  ;;  %v10521_v50 = vld [vmem:[%s11075_s9] ss:$0 sm:$0xff] }
 0x277   :  { %7291 = vmatpush3.bf16.msra.mxu1 %v10222_v4  ;;  %7152 = vmatprep.mubr.msk.f32.mxu1 %vm5270_vm13, %v10452_v20  ;;  %v10474_v59 = vadd.f32 %v10346_v40, %v5250_v3  ;;  %v10511_v40 = vpack.c.bf16 %v6613_v32, %v6612_v23 }
 0x278   :  { %7293 = vmatprep.subr.bf16.mxu1 %v10217_v19  ;;  %v10478_v38 = vadd.f32 %v10337_v14, %v5251_v24 }
 0x27a   :  { %7153 = vmatmul.mubr.msk.f32.vlgmr.msra.gmra.mrb[26].mxu1 %vm5270_vm13, %v10425_v30 }
 0x27b   :  { %7295 = vmatpush3.bf16.msra.mxu1 %v10217_v19  ;;  %7155 = vmatprep.mubr.msk.f32.mxu1 %vm5270_vm13, %v10457_v7  ;;  %v6610_v19 = vld [vmem:[%s11071_s8 + $0x20] sm:$0xff] }
 0x27c   :  { %7297 = vmatprep.subr.bf16.mxu1 %v10222_v4 }
 0x27e   :  { %7156 = vmatmul.mubr.msk.f32.gmra.mrb[28].mxu1 %vm5270_vm13, %v10461_v45 }
 0x27f   :  { %7299 = vmatpush3.bf16.msra.mxu1 %v10222_v4  ;;  %7166 = vmatprep.mubr.msk.f32.mxu1 %vm5270_vm13, %v10467_v34  ;;  %v6611_v4 = vld [vmem:[%s11071_s8 + $0x28] sm:$0xff] }
 0x280   :  { %v10506_v14 = vpack.c.bf16 %v6611_v4, %v6610_v19 }
 0x282   :  { %7167 = vmatmul.mubr.msk.f32.vlgmr.msra.gmra.mrb[30].mxu1 %vm5270_vm13, %v10428_v47  ;;  %7301 = vmatprep.subr.bf16.mxu1 %v10506_v14 }
 0x283   :  { %7169 = vmatprep.mubr.msk.f32.mxu1 %vm5270_vm13, %v10474_v59  ;;  %7303 = vmatpush3.bf16.msra.mxu1 %v10506_v14 }
 0x284   :  { %7305 = vmatprep.subr.bf16.mxu1 %v10511_v40 }
 0x286   :  { %7170 = vmatmul.mubr.msk.f32.gmra.mrb[32].mxu1 %vm5270_vm13, %v10478_v38 }
 0x287   :  { %7307 = vmatpush3.bf16.msra.mxu1 %v10511_v40 }
 0x288   :  { %7309 = vmatprep.subr.bf16.mxu1 %v10506_v14 }
 0x345   :  { %v7140_v37 = vpop.f32.mrb[22].mxu1 }
 0x346   :  { %v10524_v51 = vadd.f32 %v7140_v37, %v10521_v50  ;;  %v5349_v56 = vpop.f32.mrb[23].mxu1 }
 0x347   :  { %v10527_v60 = vadd.f32 %v10521_v50, %v5349_v56  ;;  %v6608_v56 = vld [vmem:[%s11073_s6 + $0x4] sm:$0xf] }
 0x348   :  { %v5369_v48 = vmul.f32 %v10524_v51, %v10524_v51 }
 0x349   :  { %v5368_v6 = vmul.f32 %v10527_v60, %v10527_v60  ;;  %v7143_v63 = vpop.f32.mrb[24].mxu1 }
 0x34a   :  { %v5373_v5 = vmul.f32 %v5369_v48, %v10524_v51  ;;  %v10535_v58 = vadd.f32 %v7143_v63, %v10521_v50  ;;  %v5359_v44 = vpop.f32.mrb[25].mxu1 }
 0x34b   :  { %v5372_v52 = vmul.f32 %v5368_v6, %v10527_v60  ;;  %v10539_v28 = vadd.f32 %v10521_v50, %v5359_v44 }
 0x34c   :  { %v5377_v27 = vmul.f32 0.044715, %v5373_v5  ;;  %v5371_v2 = vmul.f32 %v10535_v58, %v10535_v58 }
 0x34d   :  { %v5376_v53 = vmul.f32 0.044715, %v5372_v52  ;;  %v5370_v54 = vmul.f32 %v10539_v28, %v10539_v28  ;;  %v7154_v39 = vpop.f32.mrb[26].mxu1 }
 0x34e   :  { %v5381_v18 = vadd.f32 %v5377_v27, %v10524_v51  ;;  %v5375_v12 = vmul.f32 %v5371_v2, %v10535_v58  ;;  %v10548_v35 = vadd.f32 %v7154_v39, %v10521_v50  ;;  %v5486_v10 = vpop.f32.mrb[27].mxu1  ;;  %v10590_v39 = vrot.slane %v6608_v56, %v5060_v42 }
 0x34f   :  { %v5380_v61 = vadd.f32 %v5376_v53, %v10527_v60  ;;  %v5374_v8 = vmul.f32 %v5370_v54, %v10539_v28  ;;  %v10553_v62 = vadd.f32 %v10521_v50, %v5486_v10 }
 0x350   :  { %v5385_v26 = vmul.f32 0.7978846, %v5381_v18  ;;  %v5379_v21 = vmul.f32 0.044715, %v5375_v12  ;;  %v5506_v46 = vmul.f32 %v10548_v35, %v10548_v35 }
 0x351   :  { %v5384_v22 = vmul.f32 0.7978846, %v5380_v61  ;;  %v5378_v49 = vmul.f32 0.044715, %v5374_v8  ;;  %v5505_v55 = vmul.f32 %v10553_v62, %v10553_v62  ;;  %v7157_v13 = vpop.f32.mrb[28].mxu1 }
 0x352   :  { %7455 = vtanh.f32 %v5385_v26  ;;  %v5383_v57 = vadd.f32 %v5379_v21, %v10535_v58  ;;  %v5510_v31 = vmul.f32 %v5506_v46, %v10548_v35  ;;  %v10562_v36 = vadd.f32 %v7157_v13, %v10521_v50  ;;  %v5496_v1 = vpop.f32.mrb[29].mxu1 }
 0x353   :  { %7457 = vtanh.f32 %v5384_v22  ;;  %v5382_v43 = vadd.f32 %v5378_v49, %v10539_v28  ;;  %v5509_v9 = vmul.f32 %v5505_v55, %v10553_v62  ;;  %v10567_v15 = vadd.f32 %v10521_v50, %v5496_v1 }
 0x354   :  { %v5387_v3 = vmul.f32 0.7978846, %v5383_v57  ;;  %v5514_v24 = vmul.f32 0.044715, %v5510_v31  ;;  %v5508_v19 = vmul.f32 %v10562_v36, %v10562_v36  ;;  %v10606_v13 = vrot.slane %v6608_v56, %v5078_v16 }
 0x355   :  { %v5386_v4 = vmul.f32 0.7978846, %v5382_v43  ;;  %v5513_v23 = vmul.f32 0.044715, %v5509_v9  ;;  %v5507_v32 = vmul.f32 %v10567_v15, %v10567_v15  ;;  %v7168_v37 = vpop.f32.mrb[30].mxu1 }
 0x356   :  { %7459 = vtanh.f32 %v5387_v3  ;;  %v5518_v48 = vadd.f32 %v5514_v24, %v10548_v35  ;;  %v5512_v6 = vmul.f32 %v5508_v19, %v10562_v36  ;;  %v10579_v63 = vadd.f32 %v7168_v37, %v10521_v50  ;;  %v5623_v5 = vpop.f32.mrb[31].mxu1 }
 0x357   :  { %7461 = vtanh.f32 %v5386_v4  ;;  %v5517_v44 = vadd.f32 %v5513_v23, %v10553_v62  ;;  %v5511_v52 = vmul.f32 %v5507_v32, %v10567_v15  ;;  %v10584_v27 = vadd.f32 %v10521_v50, %v5623_v5 }
 0x358   :  { %v5522_v2 = vmul.f32 0.7978846, %v5518_v48  ;;  %v5516_v53 = vmul.f32 0.044715, %v5512_v6  ;;  %v5643_v54 = vmul.f32 %v10579_v63, %v10579_v63  ;;  %v10618_v6 = vrot.slane %v6608_v56, %v5138_v17 }
 0x359   :  { %v5521_v18 = vmul.f32 0.7978846, %v5517_v44  ;;  %v5515_v12 = vmul.f32 0.044715, %v5511_v52  ;;  %v5642_v10 = vmul.f32 %v10584_v27, %v10584_v27  ;;  %v7171_v61 = vpop.f32.mrb[32].mxu1 }
 0x35a   :  { %7463 = vtanh.f32 %v5522_v2  ;;  %v5520_v8 = vadd.f32 %v5516_v53, %v10562_v36  ;;  %v5647_v26 = vmul.f32 %v5643_v54, %v10579_v63  ;;  %v10597_v21 = vadd.f32 %v7171_v61, %v10521_v50  ;;  %v5633_v46 = vpop.f32.mrb[33].mxu1 }
 0x35b   :  { %7465 = vtanh.f32 %v5521_v18  ;;  %v5519_v22 = vadd.f32 %v5515_v12, %v10567_v15  ;;  %v5646_v42 = vmul.f32 %v5642_v10, %v10584_v27  ;;  %v10602_v49 = vadd.f32 %v10521_v50, %v5633_v46 }
 0x35c   :  { %v7456_v55 = vpop.eup %7455  ;;  %v5524_v57 = vmul.f32 0.7978846, %v5520_v8  ;;  %v5651_v31 = vmul.f32 0.044715, %v5647_v26  ;;  %v5645_v1 = vmul.f32 %v10597_v21, %v10597_v21  ;;  %v10625_v26 = vrot.slane %v6608_v56, %v5090_v41 }
 0x35d   :  { %v7458_v43 = vpop.eup %7457  ;;  %v5393_v9 = vadd.f32 1.0, %v7456_v55  ;;  %v5523_v3 = vmul.f32 0.7978846, %v5519_v22  ;;  %v5650_v24 = vmul.f32 0.044715, %v5646_v42  ;;  %v5644_v19 = vmul.f32 %v10602_v49, %v10602_v49 }
 0x35e   :  { %v5392_v4 = vadd.f32 1.0, %v7458_v43  ;;  %7467 = vtanh.f32 %v5524_v57  ;;  %v5655_v50 = vadd.f32 %v5651_v31, %v10579_v63  ;;  %v5649_v23 = vmul.f32 %v5645_v1, %v10597_v21 }
 0x35f   :  { %v5397_v16 = vmul.f32 0.5, %v5393_v9  ;;  %7469 = vtanh.f32 %v5523_v3  ;;  %v5654_v32 = vadd.f32 %v5650_v24, %v10584_v27  ;;  %v5648_v37 = vmul.f32 %v5644_v19, %v10602_v49 }
 0x360   :  { %v7460_v48 = vpop.eup %7459  ;;  %v5396_v5 = vmul.f32 0.5, %v5392_v4  ;;  %v5659_v44 = vmul.f32 0.7978846, %v5655_v50  ;;  %v5653_v52 = vmul.f32 0.044715, %v5649_v23 }
 0x361   :  { %v7462_v2 = vpop.eup %7461  ;;  %v5401_v53 = vmul.f32 %v5397_v16, %v10524_v51  ;;  %v5395_v54 = vadd.f32 1.0, %v7460_v48  ;;  %v5658_v18 = vmul.f32 0.7978846, %v5654_v32  ;;  %v5652_v12 = vmul.f32 0.044715, %v5648_v37 }
 0x362   :  { %v5400_v10 = vmul.f32 %v5396_v5, %v10527_v60  ;;  %v5394_v61 = vadd.f32 1.0, %v7462_v2  ;;  %7471 = vtanh.f32 %v5659_v44  ;;  %v5657_v8 = vadd.f32 %v5653_v52, %v10597_v21  ;;  %v10633_v51 = vld [vmem:[%s11074_s7 + $0x1] ss:$0 sm:$0xff] }
 0x363   :  { %v10628_v17 = vadd.f32 %v5401_v53, %v10422_v11  ;;  %v5399_v46 = vmul.f32 0.5, %v5395_v54  ;;  %7473 = vtanh.f32 %v5658_v18  ;;  %v5656_v0 = vadd.f32 %v5652_v12, %v10602_v49 }
 0x364   :  { %v7464_v22 = vpop.eup %7463  ;;  %v10636_v60 = vadd.f32 %v5400_v10, %v10432_v33  ;;  %v5398_v42 = vmul.f32 0.5, %v5394_v61  ;;  %v5661_v55 = vmul.f32 0.7978846, %v5657_v8 }
 0x365   :  { %v7466_v41 = vpop.eup %7465  ;;  %v5698_v11 = vmul.f32 %v10590_v39, %v10628_v17  ;;  %v5776_v56 = vmul.f32 %v10618_v6, %v10628_v17  ;;  %v5403_v57 = vmul.f32 %v5399_v46, %v10535_v58  ;;  %v5530_v31 = vadd.f32 1.0, %v7464_v22 }
 0x366   :  { %v5697_v1 = vmul.f32 %v10590_v39, %v10636_v60  ;;  %v5775_v33 = vmul.f32 %v10618_v6, %v10636_v60  ;;  %v5402_v43 = vmul.f32 %v5398_v42, %v10539_v28  ;;  %v5529_v9 = vadd.f32 1.0, %v7466_v41 }
 0x367   :  { %v5708_v3 = vadd.f32 %v10633_v51, %v5698_v11  ;;  %v5780_v24 = vadd.f32 %v10633_v51, %v5776_v56  ;;  %v10652_v19 = vadd.f32 %v5403_v57, %v10445_v25  ;;  %v5534_v4 = vmul.f32 0.5, %v5530_v31 }
 0x368   :  { %v7468_v50 = vpop.eup %7467  ;;  %v5707_v58 = vadd.f32 %v10633_v51, %v5697_v1  ;;  %v5779_v23 = vadd.f32 %v10633_v51, %v5775_v33  ;;  %v10657_v16 = vadd.f32 %v5402_v43, %v10439_v29  ;;  %v5533_v32 = vmul.f32 0.5, %v5529_v9 }
 0x369   :  { %v7470_v37 = vpop.eup %7469  ;;  %v5700_v28 = vmul.f32 %v10590_v39, %v10652_v19  ;;  %v5778_v48 = vmul.f32 %v10618_v6, %v10652_v19  ;;  %v5538_v25 = vmul.f32 %v5534_v4, %v10548_v35  ;;  %v5532_v5 = vadd.f32 1.0, %v7468_v50 }
 0x36a   :  { %v5699_v44 = vmul.f32 %v10590_v39, %v10657_v16  ;;  %v5777_v52 = vmul.f32 %v10618_v6, %v10657_v16  ;;  %v5537_v29 = vmul.f32 %v5533_v32, %v10553_v62  ;;  %v5531_v2 = vadd.f32 1.0, %v7470_v37 }
 0x36b   :  { %v5710_v53 = vadd.f32 %v10633_v51, %v5700_v28  ;;  %v5782_v54 = vadd.f32 %v10633_v51, %v5778_v48  ;;  %v10672_v18 = vadd.f32 %v5538_v25, %v10425_v30  ;;  %v5536_v12 = vmul.f32 0.5, %v5532_v5 }
 0x36c   :  { %v7472_v10 = vpop.eup %7471  ;;  %v5709_v35 = vadd.f32 %v10633_v51, %v5699_v44  ;;  %v5781_v61 = vadd.f32 %v10633_v51, %v5777_v52  ;;  %v10677_v8 = vadd.f32 %v5537_v29, %v10452_v20  ;;  %v5535_v46 = vmul.f32 0.5, %v5531_v2 }
 0x36d   :  { %v7474_v22 = vpop.eup %7473  ;;  %v5716_v62 = vmul.f32 %v10606_v13, %v10672_v18  ;;  %v5784_v42 = vmul.f32 %v10590_v39, %v10672_v18  ;;  %v5836_v30 = vmul.f32 %v10618_v6, %v10672_v18  ;;  %v5540_v41 = vmul.f32 %v5536_v12, %v10562_v36 }
 0x36e   :  { %v5715_v11 = vmul.f32 %v10606_v13, %v10677_v8  ;;  %v5783_v20 = vmul.f32 %v10590_v39, %v10677_v8  ;;  %v5835_v56 = vmul.f32 %v10618_v6, %v10677_v8  ;;  %v5539_v57 = vmul.f32 %v5535_v46, %v10567_v15 }
 0x36f   :  { %v5720_v31 = vadd.f32 %v5716_v62, %v5708_v3  ;;  %v5788_v1 = vadd.f32 %v5784_v42, %v5780_v24  ;;  %v5840_v33 = vadd.f32 %v10633_v51, %v5836_v30  ;;  %v10695_v43 = vadd.f32 %v5540_v41, %v10461_v45 }
 0x370   :  { %v10698_v36 = vadd.f32 %v5539_v57, %v10457_v7  ;;  %v5667_v9 = vadd.f32 1.0, %v7472_v10  ;;  %v5666_v4 = vadd.f32 1.0, %v7474_v22  ;;  %7475 = vtanh.f32 %v5661_v55 }
 0x371   :  { %v5718_v50 = vmul.f32 %v10606_v13, %v10695_v43  ;;  %v5786_v32 = vmul.f32 %v10590_v39, %v10695_v43  ;;  %v5838_v15 = vmul.f32 %v10618_v6, %v10695_v43  ;;  %v5660_v3 = vmul.f32 0.7978846, %v5656_v0 }
 0x372   :  { %v5717_v45 = vmul.f32 %v10606_v13, %v10698_v36  ;;  %v5785_v7 = vmul.f32 %v10590_v39, %v10698_v36  ;;  %v5837_v24 = vmul.f32 %v10618_v6, %v10698_v36  ;;  %v5671_v55 = vmul.f32 0.5, %v5667_v9 }
 0x373   :  { %v5670_v37 = vmul.f32 0.5, %v5666_v4  ;;  %7477 = vtanh.f32 %v5660_v3  ;;  %v5719_v28 = vadd.f32 %v5715_v11, %v5707_v58  ;;  %v5722_v48 = vadd.f32 %v5718_v50, %v5710_v53 }
 0x374   :  { %v5675_v25 = vmul.f32 %v5671_v55, %v10579_v63  ;;  %v10713_v5 = vadd.f32 %v5717_v45, %v5709_v35  ;;  %v5787_v44 = vadd.f32 %v5783_v20, %v5779_v23  ;;  %v10715_v0 = vadd.f32 %v5785_v7, %v5781_v61 }
 0x375   :  { %v5674_v52 = vmul.f32 %v5670_v37, %v10584_v27  ;;  %v5790_v29 = vadd.f32 %v5786_v32, %v5782_v54  ;;  %v5839_v2 = vadd.f32 %v10633_v51, %v5835_v56  ;;  %v10720_v12 = vadd.f32 %v10633_v51, %v5837_v24 }
 0x376   :  { %v10723_v6 = vadd.f32 %v5675_v25, %v10428_v47  ;;  %v10726_v58 = vadd.f32 %v10633_v51, %v5838_v15 }
 0x377   :  { %v10729_v63 = vadd.f32 %v5674_v52, %v10467_v34 }
 0x378   :  { %v5728_v23 = vmul.f32 %v10625_v26, %v10723_v6  ;;  %v5792_v27 = vmul.f32 %v10606_v13, %v10723_v6  ;;  %v5844_v53 = vmul.f32 %v10590_v39, %v10723_v6 }
 0x379   :  { %v5727_v54 = vmul.f32 %v10625_v26, %v10729_v63  ;;  %v5791_v47 = vmul.f32 %v10606_v13, %v10729_v63  ;;  %v5843_v51 = vmul.f32 %v10590_v39, %v10729_v63 }
 0x37a   :  { %v7476_v34 = vpop.eup %7475  ;;  %v10743_v10 = vadd.f32 %v5728_v23, %v5720_v31  ;;  %v10745_v35 = vadd.f32 %v5792_v27, %v5788_v1  ;;  %v10747_v61 = vadd.f32 %v5844_v53, %v5840_v33 }
 0x37b   :  { %v5669_v46 = vadd.f32 1.0, %v7476_v34  ;;  %v10749_v22 = vadd.f32 %v5727_v54, %v5719_v28  ;;  %v10751_v62 = vadd.f32 %v5791_v47, %v5787_v44  ;;  %v10753_v42 = vadd.f32 %v5843_v51, %v5839_v2 }
 0x37c   :  { %v5736_v30 = vmul.f32 %v10743_v10, %v10743_v10  ;;  %v5800_v41 = vmul.f32 %v10745_v35, %v10745_v35  ;;  %v5852_v11 = vmul.f32 %v10747_v61, %v10747_v61 }
 0x37d   :  { %v7478_v20 = vpop.eup %7477  ;;  %v5673_v56 = vmul.f32 0.5, %v5669_v46  ;;  %v5735_v57 = vmul.f32 %v10749_v22, %v10749_v22  ;;  %v5799_v31 = vmul.f32 %v10751_v62, %v10751_v62  ;;  %v5851_v1 = vmul.f32 %v10753_v42, %v10753_v42 }
 0x37e   :  { %v5668_v33 = vadd.f32 1.0, %v7478_v20  ;;  %v5740_v9 = vmul.f32 %v5736_v30, %v10743_v10  ;;  %v5804_v4 = vmul.f32 %v5800_v41, %v10745_v35  ;;  %v5856_v50 = vmul.f32 %v5852_v11, %v10747_v61 }
 0x37f   :  { %v5677_v32 = vmul.f32 %v5673_v56, %v10597_v21  ;;  %v5739_v15 = vmul.f32 %v5735_v57, %v10749_v22  ;;  %v5803_v3 = vmul.f32 %v5799_v31, %v10751_v62  ;;  %v5855_v45 = vmul.f32 %v5851_v1, %v10753_v42 }
 0x380   :  { %v5672_v7 = vmul.f32 0.5, %v5668_v33  ;;  %v5744_v24 = vmul.f32 0.044715, %v5740_v9  ;;  %v5808_v55 = vmul.f32 0.044715, %v5804_v4 }
 0x381   :  { %v10775_v37 = vadd.f32 %v5677_v32, %v10478_v38  ;;  %v5743_v28 = vmul.f32 0.044715, %v5739_v15  ;;  %v5807_v25 = vmul.f32 0.044715, %v5803_v3  ;;  %v5859_v44 = vmul.f32 0.044715, %v5855_v45 }
 0x382   :  { %v5676_v52 = vmul.f32 %v5672_v7, %v10602_v49  ;;  %v5748_v2 = vadd.f32 %v5744_v24, %v10743_v10  ;;  %v5812_v21 = vadd.f32 %v5808_v55, %v10745_v35  ;;  %v5860_v23 = vmul.f32 0.044715, %v5856_v50 }
 0x383   :  { %v5730_v27 = vmul.f32 %v10625_v26, %v10775_v37  ;;  %v5794_v53 = vmul.f32 %v10606_v13, %v10775_v37  ;;  %v5846_v38 = vmul.f32 %v10590_v39, %v10775_v37  ;;  %v5747_v54 = vadd.f32 %v5743_v28, %v10749_v22 }
 0x384   :  { %v10788_v47 = vadd.f32 %v5676_v52, %v10474_v59  ;;  %v5752_v49 = vmul.f32 0.7978846, %v5748_v2  ;;  %v5811_v51 = vadd.f32 %v5807_v25, %v10751_v62  ;;  %v5816_v34 = vmul.f32 0.7978846, %v5812_v21 }
 0x385   :  { %v5751_v46 = vmul.f32 0.7978846, %v5747_v54  ;;  %v10791_v30 = vadd.f32 %v5730_v27, %v5722_v48  ;;  %v10793_v41 = vadd.f32 %v5794_v53, %v5790_v29  ;;  %v5863_v11 = vadd.f32 %v5859_v44, %v10753_v42 }
 0x386   :  { %v5729_v20 = vmul.f32 %v10625_v26, %v10788_v47  ;;  %v5793_v56 = vmul.f32 %v10606_v13, %v10788_v47  ;;  %v5845_v59 = vmul.f32 %v10590_v39, %v10788_v47  ;;  %7479 = vtanh.f32 %v5752_v49 }
 0x387   :  { %7481 = vtanh.f32 %v5751_v46  ;;  %v5738_v57 = vmul.f32 %v10791_v30, %v10791_v30  ;;  %v5815_v48 = vmul.f32 0.7978846, %v5811_v51  ;;  %v5802_v29 = vmul.f32 %v10793_v41, %v10793_v41 }
 0x388   :  { %v10807_v31 = vadd.f32 %v5729_v20, %v10713_v5  ;;  %7483 = vtanh.f32 %v5816_v34  ;;  %v10810_v26 = vadd.f32 %v5793_v56, %v10715_v0  ;;  %v5867_v13 = vmul.f32 0.7978846, %v5863_v11 }
 0x389   :  { %v5742_v1 = vmul.f32 %v5738_v57, %v10791_v30  ;;  %7485 = vtanh.f32 %v5815_v48  ;;  %v5806_v39 = vmul.f32 %v5802_v29, %v10793_v41  ;;  %v5864_v33 = vadd.f32 %v5860_v23, %v10747_v61 }
 0x38a   :  { %v5737_v9 = vmul.f32 %v10807_v31, %v10807_v31  ;;  %v5801_v4 = vmul.f32 %v10810_v26, %v10810_v26  ;;  %7487 = vtanh.f32 %v5867_v13  ;;  %v10820_v5 = vadd.f32 %v5845_v59, %v10720_v12 }
 0x38b   :  { %v5746_v0 = vmul.f32 0.044715, %v5742_v1  ;;  %v5810_v50 = vmul.f32 0.044715, %v5806_v39  ;;  %v5868_v32 = vmul.f32 0.7978846, %v5864_v33  ;;  %v10823_v15 = vadd.f32 %v5846_v38, %v10726_v58 }
 0x38c   :  { %v5741_v3 = vmul.f32 %v5737_v9, %v10807_v31  ;;  %v5805_v45 = vmul.f32 %v5801_v4, %v10810_v26  ;;  %v5853_v7 = vmul.f32 %v10820_v5, %v10820_v5 }
 0x38d   :  { %v5750_v24 = vadd.f32 %v5746_v0, %v10791_v30  ;;  %v5814_v55 = vadd.f32 %v5810_v50, %v10793_v41  ;;  %7489 = vtanh.f32 %v5868_v32  ;;  %v5854_v12 = vmul.f32 %v10823_v15, %v10823_v15 }
 0x38e   :  { %v5745_v28 = vmul.f32 0.044715, %v5741_v3  ;;  %v5809_v25 = vmul.f32 0.044715, %v5805_v45  ;;  %v5857_v58 = vmul.f32 %v5853_v7, %v10820_v5 }
 0x38f   :  { %v5754_v44 = vmul.f32 0.7978846, %v5750_v24  ;;  %v5818_v52 = vmul.f32 0.7978846, %v5814_v55  ;;  %v5858_v2 = vmul.f32 %v5854_v12, %v10823_v15 }
 0x390   :  { %v7480_v21 = vpop.eup %7479  ;;  %v5749_v23 = vadd.f32 %v5745_v28, %v10807_v31  ;;  %v5813_v27 = vadd.f32 %v5809_v25, %v10810_v26  ;;  %v5861_v53 = vmul.f32 0.044715, %v5857_v58 }
 0x391   :  { %v7482_v38 = vpop.eup %7481  ;;  %v5760_v54 = vadd.f32 1.0, %v7480_v21  ;;  %7491 = vtanh.f32 %v5754_v44  ;;  %v5862_v49 = vmul.f32 0.044715, %v5858_v2 }
 0x392   :  { %v7484_v51 = vpop.eup %7483  ;;  %v5759_v34 = vadd.f32 1.0, %v7482_v38  ;;  %v5753_v46 = vmul.f32 0.7978846, %v5749_v23  ;;  %v5817_v11 = vmul.f32 0.7978846, %v5813_v27  ;;  %7493 = vtanh.f32 %v5818_v52 }
 0x393   :  { %v7486_v20 = vpop.eup %7485  ;;  %v5764_v56 = vmul.f32 0.5, %v5760_v54  ;;  %v5824_v59 = vadd.f32 1.0, %v7484_v51  ;;  %v5865_v57 = vadd.f32 %v5861_v53, %v10820_v5  ;;  %v5866_v48 = vadd.f32 %v5862_v49, %v10823_v15 }
 0x394   :  { %v7488_v29 = vpop.eup %7487  ;;  %v5763_v13 = vmul.f32 0.5, %v5759_v34  ;;  %7495 = vtanh.f32 %v5753_v46  ;;  %v5823_v1 = vadd.f32 1.0, %v7486_v20 }
 0x395   :  { %v5768_v39 = vmul.f32 %v5764_v56, %v10743_v10  ;;  %v5828_v33 = vmul.f32 0.5, %v5824_v59  ;;  %7497 = vtanh.f32 %v5817_v11  ;;  %v5875_v9 = vadd.f32 1.0, %v7488_v29 }
 0x396   :  { %v5767_v4 = vmul.f32 %v5763_v13, %v10749_v22  ;;  %v5827_v0 = vmul.f32 0.5, %v5823_v1  ;;  %v5869_v50 = vmul.f32 0.7978846, %v5865_v57  ;;  %v5870_v32 = vmul.f32 0.7978846, %v5866_v48 }
 0x397   :  { %v7490_v3 = vpop.eup %7489  ;;  %v10842_v45 = vadd.f32 %v5768_v39, %v10628_v17  ;;  %v5832_v7 = vmul.f32 %v5828_v33, %v10745_v35  ;;  %v5879_v24 = vmul.f32 0.5, %v5875_v9 }
 0x398   :  { %v10846_v55 = vadd.f32 %v5767_v4, %v10636_v60  ;;  %v5831_v10 = vmul.f32 %v5827_v0, %v10751_v62  ;;  %v5876_v12 = vadd.f32 1.0, %v7490_v3  ;;  %7499 = vtanh.f32 %v5869_v50 }
 0x399   :  { %v10850_v28 = vadd.f32 %v5832_v7, %v10672_v18  ;;  %v5883_v22 = vmul.f32 %v5879_v24, %v10753_v42  ;;  %7501 = vtanh.f32 %v5870_v32 }
 0x39a   :  { %7180 = vmatprep.mubr.msk.f32.mxu1 %vm5270_vm13, %v10846_v55  ;;  %v10856_v17 = vadd.f32 %v5831_v10, %v10677_v8  ;;  %v5880_v35 = vmul.f32 0.5, %v5876_v12 }
 0x39b   :  { %v7492_v25 = vpop.eup %7491  ;;  %7181 = vmatmul.mubr.msk.f32.vlgmr.msra.gmra.mrb[34].mxu1 %vm5270_vm13, %v10842_v45  ;;  %v10861_v60 = vadd.f32 %v5883_v22, %v10729_v63 }
 0x39c   :  { %v7494_v62 = vpop.eup %7493  ;;  %7311 = vmatpush3.bf16.msra.mxu1 %v10506_v14  ;;  %v5762_v18 = vadd.f32 1.0, %v7492_v25  ;;  %v5884_v42 = vmul.f32 %v5880_v35, %v10747_v61 }
 0x39d   :  { %7313 = vmatprep.subr.bf16.mxu1 %v10511_v40  ;;  %v5826_v58 = vadd.f32 1.0, %v7494_v62 }
 0x39e   :  { %v7496_v44 = vpop.eup %7495  ;;  %v5766_v8 = vmul.f32 0.5, %v5762_v18  ;;  %v10867_v52 = vadd.f32 %v5884_v42, %v10723_v6 }
 0x39f   :  { %v7498_v2 = vpop.eup %7497  ;;  %v5761_v21 = vadd.f32 1.0, %v7496_v44  ;;  %v5830_v23 = vmul.f32 0.5, %v5826_v58 }
 0x3a0   :  { %v5770_v63 = vmul.f32 %v5766_v8, %v10791_v30  ;;  %7315 = vmatpush3.bf16.msra.mxu1 %v10511_v40  ;;  %v5825_v27 = vadd.f32 1.0, %v7498_v2 }
 0x3a1   :  { %v5765_v53 = vmul.f32 0.5, %v5761_v21  ;;  %7317 = vmatprep.subr.bf16.mxu1 %v10506_v14  ;;  %v5834_v61 = vmul.f32 %v5830_v23, %v10793_v41 }
 0x3a2   :  { %v7500_v38 = vpop.eup %7499  ;;  %v10874_v54 = vadd.f32 %v5770_v63, %v10652_v19  ;;  %v5829_v49 = vmul.f32 0.5, %v5825_v27 }
 0x3a3   :  { %v7502_v6 = vpop.eup %7501  ;;  %v5769_v51 = vmul.f32 %v5765_v53, %v10807_v31  ;;  %v10878_v34 = vadd.f32 %v5834_v61, %v10695_v43  ;;  %v5877_v30 = vadd.f32 1.0, %v7500_v38 }
 0x3a4   :  { %v5833_v46 = vmul.f32 %v5829_v49, %v10810_v26  ;;  %v5878_v11 = vadd.f32 1.0, %v7502_v6  ;;  %v6331_v26 = vld [vmem:[%s11076_s10 + $0x18] sm:$0xff] }
 0x3a5   :  { %v10882_v20 = vadd.f32 %v5769_v51, %v10657_v16  ;;  %v5881_v56 = vmul.f32 0.5, %v5877_v30 }
 0x3a6   :  { %v10885_v41 = vadd.f32 %v5833_v46, %v10698_v36  ;;  %v5882_v19 = vmul.f32 0.5, %v5878_v11 }
 0x3a7   :  { %7183 = vmatprep.mubr.msk.f32.mxu1 %vm5270_vm13, %v10882_v20  ;;  %v5885_v31 = vmul.f32 %v5881_v56, %v10820_v5 }
 0x3a8   :  { %7184 = vmatmul.mubr.msk.f32.gmra.mrb[36].mxu1 %vm5270_vm13, %v10874_v54  ;;  %v5886_v43 = vmul.f32 %v5882_v19, %v10823_v15  ;;  %v10933_v15 = vld [vmem:[%s11075_s9 + $0x1] ss:$0 sm:$0xff] }
 0x3a9   :  { %7194 = vmatprep.mubr.msk.f32.mxu1 %vm5270_vm13, %v10856_v17  ;;  %v10896_v16 = vadd.f32 %v5885_v31, %v10788_v47  ;;  %v6330_v47 = vld [vmem:[%s11076_s10 + $0x10] sm:$0xff] }
 0x3aa   :  { %v10899_v36 = vadd.f32 %v5886_v43, %v10775_v37  ;;  %v7328_v5 = vpack.c.bf16 %v6331_v26, %v6330_v47 }
 0x3ac   :  { %7195 = vmatmul.mubr.msk.f32.vlgmr.msra.gmra.mrb[38].mxu1 %vm5270_vm13, %v10850_v28 }
 0x3ad   :  { %7319 = vmatpush3.bf16.msra.mxu1 %v10506_v14  ;;  %7197 = vmatprep.mubr.msk.f32.mxu1 %vm5270_vm13, %v10885_v41  ;;  %v6328_v14 = vld [vmem:[%s11076_s10] sm:$0xff] }
 0x3ae   :  { %7321 = vmatprep.subr.bf16.mxu1 %v10511_v40 }
 0x3b0   :  { %7198 = vmatmul.mubr.msk.f32.gmra.mrb[40].mxu1 %vm5270_vm13, %v10878_v34 }
 0x3b1   :  { %7323 = vmatpush3.bf16.msra.mxu1 %v10511_v40  ;;  %7208 = vmatprep.mubr.msk.f32.mxu1 %vm5270_vm13, %v10861_v60  ;;  %v6329_v40 = vld [vmem:[%s11076_s10 + $0x8] sm:$0xff] }
 0x3b2   :  { %v7324_v37 = vpack.c.bf16 %v6329_v40, %v6328_v14 }
 0x3b4   :  { %7209 = vmatmul.mubr.msk.f32.vlgmr.msra.gmra.mrb[42].mxu1 %vm5270_vm13, %v10867_v52  ;;  %7325 = vmatprep.subr.bf16.mxu1 %v7324_v37 }
 0x3b5   :  { %7211 = vmatprep.mubr.msk.f32.mxu1 %vm5270_vm13, %v10896_v16  ;;  %7327 = vmatpush3.bf16.msra.mxu1 %v7324_v37 }
 0x3b6   :  { %7329 = vmatprep.subr.bf16.mxu1 %v7328_v5 }
 0x3b8   :  { %7212 = vmatmul.mubr.msk.f32.gmra.mrb[44].mxu1 %vm5270_vm13, %v10899_v36 }
 0x3b9   :  { %7331 = vmatpush3.bf16.msra.mxu1 %v7328_v5 }
 0x46e   :  { %v7182_v59 = vpop.f32.mrb[34].mxu1 }
 0x46f   :  { %v10936_v57 = vadd.f32 %v7182_v59, %v10933_v15  ;;  %v5983_v48 = vpop.f32.mrb[35].mxu1 }
 0x470   :  { %v10939_v29 = vadd.f32 %v10933_v15, %v5983_v48 }
 0x471   :  { %v6003_v13 = vmul.f32 %v10936_v57, %v10936_v57 }
 0x472   :  { %v6002_v1 = vmul.f32 %v10939_v29, %v10939_v29 }
 0x473   :  { %v6007_v39 = vmul.f32 %v6003_v13, %v10936_v57 }
 0x474   :  { %v6006_v33 = vmul.f32 %v6002_v1, %v10939_v29 }
 0x475   :  { %v6011_v9 = vmul.f32 0.044715, %v6007_v39 }
 0x476   :  { %v6010_v4 = vmul.f32 0.044715, %v6006_v33 }
 0x477   :  { %v6015_v50 = vadd.f32 %v6011_v9, %v10936_v57 }
 0x478   :  { %v6014_v7 = vadd.f32 %v6010_v4, %v10939_v29 }
 0x479   :  { %v6019_v35 = vmul.f32 0.7978846, %v6015_v50 }
 0x47a   :  { %v6018_v42 = vmul.f32 0.7978846, %v6014_v7 }
 0x47b   :  { %v7185_v0 = vpop.f32.mrb[36].mxu1  ;;  %7503 = vtanh.f32 %v6019_v35 }
 0x47c   :  { %v10949_v32 = vadd.f32 %v7185_v0, %v10933_v15  ;;  %v5993_v3 = vpop.f32.mrb[37].mxu1  ;;  %7505 = vtanh.f32 %v6018_v42 }
 0x47d   :  { %v10953_v24 = vadd.f32 %v10933_v15, %v5993_v3 }
 0x47e   :  { %v6005_v10 = vmul.f32 %v10949_v32, %v10949_v32 }
 0x47f   :  { %v6004_v12 = vmul.f32 %v10953_v24, %v10953_v24  ;;  %v7196_v22 = vpop.f32.mrb[38].mxu1 }
 0x480   :  { %v6009_v25 = vmul.f32 %v6005_v10, %v10949_v32  ;;  %v10961_v62 = vadd.f32 %v7196_v22, %v10933_v15  ;;  %v6120_v18 = vpop.f32.mrb[39].mxu1 }
 0x481   :  { %v6008_v58 = vmul.f32 %v6004_v12, %v10953_v24  ;;  %v10965_v44 = vadd.f32 %v10933_v15, %v6120_v18 }
 0x482   :  { %v6013_v8 = vmul.f32 0.044715, %v6009_v25  ;;  %v6140_v2 = vmul.f32 %v10961_v62, %v10961_v62 }
 0x483   :  { %v6012_v21 = vmul.f32 0.044715, %v6008_v58  ;;  %v6139_v23 = vmul.f32 %v10965_v44, %v10965_v44  ;;  %v7199_v63 = vpop.f32.mrb[40].mxu1 }
 0x484   :  { %v6017_v27 = vadd.f32 %v6013_v8, %v10949_v32  ;;  %v6144_v53 = vmul.f32 %v6140_v2, %v10961_v62  ;;  %v10974_v61 = vadd.f32 %v7199_v63, %v10933_v15  ;;  %v6130_v38 = vpop.f32.mrb[41].mxu1 }
 0x485   :  { %v6016_v49 = vadd.f32 %v6012_v21, %v10953_v24  ;;  %v6143_v6 = vmul.f32 %v6139_v23, %v10965_v44  ;;  %v10979_v51 = vadd.f32 %v10933_v15, %v6130_v38  ;;  %v7504_v7 = vpop.eup %7503 }
 0x486   :  { %v6021_v30 = vmul.f32 0.7978846, %v6017_v27  ;;  %v6148_v46 = vmul.f32 0.044715, %v6144_v53  ;;  %v6142_v11 = vmul.f32 %v10974_v61, %v10974_v61  ;;  %v7506_v25 = vpop.eup %7505  ;;  %v6027_v21 = vadd.f32 1.0, %v7504_v7 }
 0x487   :  { %v6020_v56 = vmul.f32 0.7978846, %v6016_v49  ;;  %v6147_v19 = vmul.f32 0.044715, %v6143_v6  ;;  %v6141_v31 = vmul.f32 %v10979_v51, %v10979_v51  ;;  %v7210_v43 = vpop.f32.mrb[42].mxu1  ;;  %v6026_v27 = vadd.f32 1.0, %v7506_v25 }
 0x488   :  { %7507 = vtanh.f32 %v6021_v30  ;;  %v6152_v14 = vadd.f32 %v6148_v46, %v10961_v62  ;;  %v6146_v40 = vmul.f32 %v6142_v11, %v10974_v61  ;;  %v6257_v37 = vpop.f32.mrb[43].mxu1  ;;  %v10990_v48 = vadd.f32 %v7210_v43, %v10933_v15 }
 0x489   :  { %7509 = vtanh.f32 %v6020_v56  ;;  %v6151_v47 = vadd.f32 %v6147_v19, %v10965_v44  ;;  %v6145_v26 = vmul.f32 %v6141_v31, %v10979_v51  ;;  %v10993_v39 = vadd.f32 %v10933_v15, %v6257_v37 }
 0x48a   :  { %v6156_v5 = vmul.f32 0.7978846, %v6152_v14  ;;  %v6150_v59 = vmul.f32 0.044715, %v6146_v40  ;;  %v6277_v4 = vmul.f32 %v10990_v48, %v10990_v48  ;;  %v6031_v11 = vmul.f32 0.5, %v6027_v21 }
 0x48b   :  { %v6155_v13 = vmul.f32 0.7978846, %v6151_v47  ;;  %v6149_v1 = vmul.f32 0.044715, %v6145_v26  ;;  %v7213_v33 = vpop.f32.mrb[44].mxu1  ;;  %v6276_v3 = vmul.f32 %v10993_v39, %v10993_v39  ;;  %v6030_v14 = vmul.f32 0.5, %v6026_v27 }
 0x48c   :  { %7511 = vtanh.f32 %v6156_v5  ;;  %v6154_v9 = vadd.f32 %v6150_v59, %v10974_v61  ;;  %v6267_v0 = vpop.f32.mrb[45].mxu1  ;;  %v6281_v12 = vmul.f32 %v6277_v4, %v10990_v48  ;;  %v11003_v22 = vadd.f32 %v7213_v33, %v10933_v15 }
 0x48d   :  { %7513 = vtanh.f32 %v6155_v13  ;;  %v6153_v50 = vadd.f32 %v6149_v1, %v10979_v51  ;;  %v11006_v35 = vadd.f32 %v10933_v15, %v6267_v0  ;;  %v6280_v42 = vmul.f32 %v6276_v3, %v10993_v39 }
 0x48e   :  { %v6158_v10 = vmul.f32 0.7978846, %v6154_v9  ;;  %v6285_v58 = vmul.f32 0.044715, %v6281_v12  ;;  %v6279_v8 = vmul.f32 %v11003_v22, %v11003_v22  ;;  %v6035_v1 = vmul.f32 %v6031_v11, %v10936_v57 }
 0x48f   :  { %v6157_v18 = vmul.f32 0.7978846, %v6153_v50  ;;  %v6278_v2 = vmul.f32 %v11006_v35, %v11006_v35  ;;  %v6284_v23 = vmul.f32 0.044715, %v6280_v42  ;;  %v6034_v50 = vmul.f32 %v6030_v14, %v10939_v29 }
 0x490   :  { %7515 = vtanh.f32 %v6158_v10  ;;  %v6289_v15 = vadd.f32 %v6285_v58, %v10990_v48  ;;  %v6283_v53 = vmul.f32 %v6279_v8, %v11003_v22  ;;  %v6039_v58 = vadd.f32 %v6035_v1, %v10842_v45 }
 0x491   :  { %7517 = vtanh.f32 %v6157_v18  ;;  %v6282_v38 = vmul.f32 %v6278_v2, %v11006_v35  ;;  %v6288_v6 = vadd.f32 %v6284_v23, %v10993_v39  ;;  %v6038_v29 = vadd.f32 %v6034_v50, %v10846_v55 }
 0x492   :  { %v7508_v63 = vpop.eup %7507  ;;  %v6293_v30 = vmul.f32 0.7978846, %v6289_v15  ;;  %v6287_v46 = vmul.f32 0.044715, %v6283_v53 }
 0x493   :  { %v7510_v49 = vpop.eup %7509  ;;  %v6029_v56 = vadd.f32 1.0, %v7508_v63  ;;  %v6292_v19 = vmul.f32 0.7978846, %v6288_v6  ;;  %v6286_v31 = vmul.f32 0.044715, %v6282_v38 }
 0x494   :  { %v6028_v40 = vadd.f32 1.0, %v7510_v49  ;;  %7519 = vtanh.f32 %v6293_v30  ;;  %v6291_v37 = vadd.f32 %v6287_v46, %v11003_v22 }
 0x495   :  { %7521 = vtanh.f32 %v6292_v19  ;;  %v6290_v5 = vadd.f32 %v6286_v31, %v11006_v35  ;;  %v6033_v33 = vmul.f32 0.5, %v6029_v56 }
 0x496   :  { %v7512_v43 = vpop.eup %7511  ;;  %v6295_v13 = vmul.f32 0.7978846, %v6291_v37  ;;  %v6032_v3 = vmul.f32 0.5, %v6028_v40 }
 0x497   :  { %v7514_v47 = vpop.eup %7513  ;;  %v6164_v26 = vadd.f32 1.0, %v7512_v43  ;;  %v6294_v4 = vmul.f32 0.7978846, %v6290_v5  ;;  %v6037_v57 = vmul.f32 %v6033_v33, %v10949_v32 }
 0x498   :  { %v6163_v59 = vadd.f32 1.0, %v7514_v47  ;;  %7523 = vtanh.f32 %v6295_v13  ;;  %v6036_v21 = vmul.f32 %v6032_v3, %v10953_v24 }
 0x499   :  { %v6168_v9 = vmul.f32 0.5, %v6164_v26  ;;  %7525 = vtanh.f32 %v6294_v4  ;;  %v6041_v32 = vadd.f32 %v6037_v57, %v10874_v54 }
 0x49a   :  { %v7516_v0 = vpop.eup %7515  ;;  %v6167_v7 = vmul.f32 0.5, %v6163_v59  ;;  %v6040_v55 = vadd.f32 %v6036_v21, %v10882_v20 }
 0x49b   :  { %v7518_v10 = vpop.eup %7517  ;;  %v6172_v12 = vmul.f32 %v6168_v9, %v10961_v62  ;;  %v6166_v25 = vadd.f32 1.0, %v7516_v0 }
 0x49c   :  { %v6171_v18 = vmul.f32 %v6167_v7, %v10965_v44  ;;  %v6165_v42 = vadd.f32 1.0, %v7518_v10 }
 0x49d   :  { %v6176_v8 = vadd.f32 %v6172_v12, %v10850_v28  ;;  %v6170_v2 = vmul.f32 0.5, %v6166_v25 }
 0x49e   :  { %v6175_v23 = vadd.f32 %v6171_v18, %v10856_v17  ;;  %v6169_v63 = vmul.f32 0.5, %v6165_v42  ;;  %v7520_v15 = vpop.eup %7519 }
 0x49f   :  { %v6317_v62 = vadd.f32 %v6176_v8, %v6039_v58  ;;  %v6174_v27 = vmul.f32 %v6170_v2, %v10974_v61  ;;  %v7522_v45 = vpop.eup %7521  ;;  %v6301_v38 = vadd.f32 1.0, %v7520_v15 }
 0x4a0   :  { %v6173_v44 = vmul.f32 %v6169_v63, %v10979_v51  ;;  %v6316_v53 = vadd.f32 %v6175_v23, %v6038_v29  ;;  %v6300_v49 = vadd.f32 1.0, %v7522_v45 }
 0x4a1   :  { %v6178_v28 = vadd.f32 %v6174_v27, %v10878_v34  ;;  %v6305_v17 = vmul.f32 0.5, %v6301_v38 }
 0x4a2   :  { %v6177_v24 = vadd.f32 %v6173_v44, %v10885_v41  ;;  %v7524_v30 = vpop.eup %7523  ;;  %v6304_v46 = vmul.f32 0.5, %v6300_v49 }
 0x4a3   :  { %v6319_v6 = vadd.f32 %v6178_v28, %v6041_v32  ;;  %v7526_v11 = vpop.eup %7525  ;;  %v6309_v51 = vmul.f32 %v6305_v17, %v10990_v48  ;;  %v6303_v56 = vadd.f32 1.0, %v7524_v30 }
 0x4a4   :  { %v6318_v61 = vadd.f32 %v6177_v24, %v6040_v55  ;;  %v6308_v19 = vmul.f32 %v6304_v46, %v10993_v39  ;;  %v6302_v54 = vadd.f32 1.0, %v7526_v11 }
 0x4a5   :  { %v6313_v34 = vadd.f32 %v6309_v51, %v10867_v52  ;;  %v6307_v31 = vmul.f32 0.5, %v6303_v56 }
 0x4a6   :  { %v6306_v43 = vmul.f32 0.5, %v6302_v54  ;;  %v6312_v20 = vadd.f32 %v6308_v19, %v10861_v60 }
 0x4a7   :  { %v6321_v41 = vadd.f32 %v6317_v62, %v6313_v34  ;;  %v6311_v14 = vmul.f32 %v6307_v31, %v11003_v22 }
 0x4a8   :  { %v6310_v40 = vmul.f32 %v6306_v43, %v11006_v35  ;;  %v6320_v37 = vadd.f32 %v6316_v53, %v6312_v20 }
 0x4a9   :  { %v6315_v47 = vadd.f32 %v6311_v14, %v10899_v36  ;;  %v6325_v5 = vmul.f32 0.33333334, %v6321_v41  ;;  %v6629_v36 = vld [vmem:[%s11077_s11] ss:$0 sm:$0xff] }
 0x4aa   :  { %v6324_v26 = vmul.f32 0.33333334, %v6320_v37  ;;  %v6314_v48 = vadd.f32 %v6310_v40, %v10896_v16 }
 0x4ab   :  { %v6323_v39 = vadd.f32 %v6319_v6, %v6315_v47 }
 0x4ac   :  { %7222 = vmatprep.mubr.msk.f32.mxu1 %vm5270_vm13, %v6324_v26  ;;  %v6322_v52 = vadd.f32 %v6318_v61, %v6314_v48 }
 0x4ad   :  { %7223 = vmatmul.mubr.msk.f32.vlgmr.msra.gmra.mrb[46].mxu1 %vm5270_vm13, %v6325_v5  ;;  %v6327_v60 = vmul.f32 0.33333334, %v6323_v39 }
 0x4ae   :  { %v6326_v59 = vmul.f32 0.33333334, %v6322_v52 }
 0x4b0   :  { %7225 = vmatprep.mubr.msk.f32.mxu1 %vm5270_vm13, %v6326_v59 }
 0x4b1   :  { %7226 = vmatmul.mubr.msk.f32.gmra.mrb[48].mxu1 %vm5270_vm13, %v6327_v60 }
 0x580   :  { %v7224_v22 = vpop.f32.mrb[46].mxu1 }
 0x581   :  { %v6423_v35 = vadd.f32 %v7224_v22, %v6629_v36  ;;  %v6417_v16 = vpop.f32.mrb[47].mxu1 }
 0x582   :  { %v6418_v13 = vadd.f32 %v6629_v36, %v6417_v16 }
 0x583   :  { %6437 = vst.msk [vmem:[%s11078_s12 + $0x8] sm:$0xff] %vm2227_vm12, %v6423_v35 }
 0x584   :  { %6436 = vst.msk [vmem:[%s11078_s12] sm:$0xff] %vm2227_vm12, %v6418_v13  ;;  %v7227_v1 = vpop.f32.mrb[48].mxu1 }
 0x585   :  { %v6433_v33 = vadd.f32 %v7227_v1, %v6629_v36  ;;  %v6427_v9 = vpop.f32.mrb[49].mxu1 }
 0x586   :  { %v6428_v4 = vadd.f32 %v6629_v36, %v6427_v9 }
 0x587   :  { %6439 = vst.msk [vmem:[%s11078_s12 + $0x18] sm:$0xff] %vm2227_vm12, %v6433_v33 }
 0x588   :  { %6438 = vst.msk [vmem:[%s11078_s12 + $0x10] sm:$0xff] %vm2227_vm12, %v6428_v4 }

</bundles_post_ra>
